<compile_context>
chip_gen: v5e
topology: v5e:2x2
jax: 0.10.0
libtpu: 0.0.40
codegen_flags: <defaults>
</compile_context>

<pallas_src>
import functools

import jax
import jax.numpy as jnp
from jax.experimental import pallas as pl
from jax.experimental.pallas import tpu as pltpu

DIM = 256          # hidden dim (module-level `dim`)
LAYER_NUM = 4      # module-level `layer_num`
LSTM_HIDDEN = 256  # module-level `lstm_hidden`


# ----------------------------- fused Pallas kernel ------------------------- #

def _geniepath_fused_kernel(
    x_in_ref,      # (N, IN_DIM)      bf16
    adj_ref,       # (N, N)           bf16 mask (nonzero = edge)
    lin1_wT_ref,   # (IN_DIM, DIM)    bf16
    lin1_b_ref,    # (1, DIM)         f32
    gat_wT_ref,    # (1, DIM, DIM)    bf16   (layer slice)
    att_src_ref,   # (1, 1, DIM)      f32
    att_dst_ref,   # (1, 1, DIM)      f32
    gat_b_ref,     # (1, 1, DIM)      f32
    w_xh_ref,      # (1, 2*DIM, 4*H)  bf16   ([Wih; Whh] layer slice)
    lin2_wT_ref,   # (DIM, OUT_PAD)   bf16
    lin2_b_ref,    # (1, OUT_PAD)     f32
    out_ref,       # (N, OUT_PAD)     f32
    x_vmem,        # (N, DIM)         f32 scratch (node features)
    h_vmem,        # (N, H)           f32 scratch (LSTM hidden)
    c_vmem,        # (N, H)           f32 scratch (LSTM cell)
):
    layer = pl.program_id(0)

    # -------- layer 0: lin1 + zero LSTM state ------------------------------ #
    @pl.when(layer == 0)
    def _():
        x_vmem[...] = (
            jnp.dot(x_in_ref[...], lin1_wT_ref[...],
                    preferred_element_type=jnp.float32)
            + lin1_b_ref[...]
        )
        h_vmem[...] = jnp.zeros_like(h_vmem)
        c_vmem[...] = jnp.zeros_like(c_vmem)

    # -------- Breadth: GATConv(heads=1) + tanh ------------------------------ #
    x = x_vmem[...]                                                   # (N, D) f32
    xw = jnp.dot(x.astype(jnp.bfloat16), gat_wT_ref[0],
                 preferred_element_type=jnp.float32)                  # (N, D) f32

    att_dst = att_dst_ref[0]                                          # (1, D)
    att_src = att_src_ref[0]                                          # (1, D)
    a_dst = jnp.sum(xw * att_dst, axis=-1, keepdims=True)             # (N, 1)
    # a_src as a (1, N) row via a tiny dot_general (kept on MXU for robust
    # lowering at small, non-tile-aligned N).
    a_src = jax.lax.dot_general(
        att_src, xw, (((1,), (1,)), ((), ())),
        preferred_element_type=jnp.float32)                           # (1, N)

    scores = a_dst + a_src                                            # [dst, src]
    scores = jnp.where(scores > 0, scores, 0.2 * scores)              # LeakyReLU
    mask = adj_ref[...] > 0                                           # single compare
    scores = jnp.where(mask, scores, jnp.float32(-1e30))
    m = jnp.max(scores, axis=-1, keepdims=True)
    e = jnp.exp(scores - m)                                           # masked -> 0
    alpha = e / jnp.sum(e, axis=-1, keepdims=True)                    # softmax (src)

    agg = jnp.dot(alpha.astype(jnp.bfloat16), xw.astype(jnp.bfloat16),
                  preferred_element_type=jnp.float32) + gat_b_ref[0]
    xg = jnp.tanh(agg)                                                # (N, D) f32

    # -------- Depth: single-step LSTM (bias=False), one fused matmul -------- #
    H = h_vmem.shape[-1]
    xh = jnp.concatenate([xg, h_vmem[...]], axis=-1)                  # (N, 2D)
    gates = jnp.dot(xh.astype(jnp.bfloat16), w_xh_ref[0],
                    preferred_element_type=jnp.float32)               # (N, 4H)
    i = jax.nn.sigmoid(gates[:, 0 * H:1 * H])
    f = jax.nn.sigmoid(gates[:, 1 * H:2 * H])
    g = jnp.tanh(gates[:, 2 * H:3 * H])
    o = jax.nn.sigmoid(gates[:, 3 * H:4 * H])
    c_new = f * c_vmem[...] + i * g
    h_new = o * jnp.tanh(c_new)
    c_vmem[...] = c_new
    h_vmem[...] = h_new
    x_vmem[...] = h_new                                               # LSTM output

    # -------- last layer: lin2 (lane-dense padded output) ------------------- #
    @pl.when(layer == pl.num_programs(0) - 1)
    def _():
        out_ref[...] = (
            jnp.dot(h_new.astype(jnp.bfloat16), lin2_wT_ref[...],
                    preferred_element_type=jnp.float32)
            + lin2_b_ref[...]
        )


# ------------------------------ model wiring ------------------------------- #

def init_params(key, in_dim, out_dim):
    """Stacked, bf16-weight parameters for the fused kernel."""
    scale = 0.05
    out_pad = ((out_dim + 127) // 128) * 128
    keys = iter(jax.random.split(key, 4 + 6 * LAYER_NUM))

    def normal(shape):
        return scale * jax.random.normal(next(keys), shape, jnp.float32)

    lin1_wT = normal((in_dim, DIM))
    lin1_b = normal((DIM,))
    lin2_wT = normal((DIM, out_dim))
    lin2_b = normal((out_dim,))

    gat_wT, att_src, att_dst, gat_b, w_xh = [], [], [], [], []
    for _ in range(LAYER_NUM):
        gat_wT.append(normal((DIM, DIM)))
        att_src.append(normal((1, DIM)))
        att_dst.append(normal((1, DIM)))
        gat_b.append(normal((DIM,)).reshape(1, DIM))
        wihT = normal((DIM, 4 * LSTM_HIDDEN))          # LSTM weight_ih^T
        whhT = normal((LSTM_HIDDEN, 4 * LSTM_HIDDEN))  # LSTM weight_hh^T
        w_xh.append(jnp.concatenate([wihT, whhT], axis=0))   # (2D, 4H)

    lin2_wT_p = jnp.zeros((DIM, out_pad), jnp.float32).at[:, :out_dim].set(lin2_wT)
    lin2_b_p = jnp.zeros((out_pad,), jnp.float32).at[:out_dim].set(lin2_b)

    return {
        "lin1_wT": lin1_wT.astype(jnp.bfloat16),
        "lin1_b": lin1_b.reshape(1, DIM),
        "lin2_wT": lin2_wT_p.astype(jnp.bfloat16),
        "lin2_b": lin2_b_p.reshape(1, out_pad),
        "gat_wT": jnp.stack(gat_wT).astype(jnp.bfloat16),      # (L, D, D)
        "att_src": jnp.stack(att_src),                         # (L, 1, D) f32
        "att_dst": jnp.stack(att_dst),                         # (L, 1, D) f32
        "gat_b": jnp.stack(gat_b),                             # (L, 1, D) f32
        "w_xh": jnp.stack(w_xh).astype(jnp.bfloat16),          # (L, 2D, 4H)
    }


def genie_path_forward(params, x, adj, *, out_dim):
    """x: (N, in_dim) node features, adj: (N, N) dense adjacency (target-major)."""
    n, in_dim = x.shape
    d = DIM
    h4 = 4 * LSTM_HIDDEN
    out_pad = params["lin2_wT"].shape[1]

    grid_spec = pltpu.PrefetchScalarGridSpec(
        num_scalar_prefetch=0,
        grid=(LAYER_NUM,),
        in_specs=[
            pl.BlockSpec((n, in_dim), lambda l: (0, 0)),        # x (bf16)
            pl.BlockSpec((n, n), lambda l: (0, 0)),             # adj mask (bf16)
            pl.BlockSpec((in_dim, d), lambda l: (0, 0)),        # lin1_wT
            pl.BlockSpec((1, d), lambda l: (0, 0)),             # lin1_b
            pl.BlockSpec((1, d, d), lambda l: (l, 0, 0)),       # gat_wT[l]
            pl.BlockSpec((1, 1, d), lambda l: (l, 0, 0)),       # att_src[l]
            pl.BlockSpec((1, 1, d), lambda l: (l, 0, 0)),       # att_dst[l]
            pl.BlockSpec((1, 1, d), lambda l: (l, 0, 0)),       # gat_b[l]
            pl.BlockSpec((1, 2 * d, h4), lambda l: (l, 0, 0)),  # w_xh[l]
            pl.BlockSpec((d, out_pad), lambda l: (0, 0)),       # lin2_wT
            pl.BlockSpec((1, out_pad), lambda l: (0, 0)),       # lin2_b
        ],
        out_specs=pl.BlockSpec((n, out_pad), lambda l: (0, 0)),
        scratch_shapes=[
            pltpu.VMEM((n, d), jnp.float32),             # x (node features)
            pltpu.VMEM((n, LSTM_HIDDEN), jnp.float32),   # h
            pltpu.VMEM((n, LSTM_HIDDEN), jnp.float32),   # c
        ],
    )

    out_padded = pl.pallas_call(
        _geniepath_fused_kernel,
        out_shape=jax.ShapeDtypeStruct((n, out_pad), jnp.float32),
        grid_spec=grid_spec,
        compiler_params=pltpu.CompilerParams(
            dimension_semantics=("arbitrary",)),   # layers carry state -> sequential
    )(
        x.astype(jnp.bfloat16),
        adj.astype(jnp.bfloat16),
        params["lin1_wT"], params["lin1_b"],
        params["gat_wT"], params["att_src"], params["att_dst"], params["gat_b"],
        params["w_xh"],
        params["lin2_wT"], params["lin2_b"],
    )
    return out_padded[:, :out_dim]


if __name__ == "__main__":
    N = 16        # number of graph nodes
    IN_DIM = 32
    OUT_DIM = 16
    E = 48        # number of random directed edges

    key = jax.random.PRNGKey(0)
    k_x, k_src, k_dst, k_par = jax.random.split(key, 4)

    x = jax.random.normal(k_x, (N, IN_DIM), jnp.float32)

    # edge_index equivalent: (2, E) -> dense adjacency adj[dst, src] = 1, + self loops
    src = jax.random.randint(k_src, (E,), 0, N)
    dst = jax.random.randint(k_dst, (E,), 0, N)
    adj = jnp.zeros((N, N), jnp.float32).at[dst, src].set(1.0)
    adj = jnp.maximum(adj, jnp.eye(N, dtype=jnp.float32))

    params = init_params(k_par, IN_DIM, OUT_DIM)

    fwd = jax.jit(functools.partial(genie_path_forward, out_dim=OUT_DIM))
    out = fwd(params, x, adj)
    jax.block_until_ready(out)
    assert out.shape == (N, OUT_DIM)
    print("KERNEL_OK")
</pallas_src>

<mosaic_0001>
module attributes {stable_mosaic.version = 11 : i64} {
  func.func @_geniepath_fused_kernel(%arg0: i32, %arg1: memref<16x32xbf16, #tpu.memory_space<vmem>>, %arg2: memref<16x16xbf16, #tpu.memory_space<vmem>>, %arg3: memref<32x256xbf16, #tpu.memory_space<vmem>>, %arg4: memref<1x256xf32, #tpu.memory_space<vmem>>, %arg5: memref<1x256x256xbf16, #tpu.memory_space<vmem>>, %arg6: memref<1x1x256xf32, #tpu.memory_space<vmem>>, %arg7: memref<1x1x256xf32, #tpu.memory_space<vmem>>, %arg8: memref<1x1x256xf32, #tpu.memory_space<vmem>>, %arg9: memref<1x512x1024xbf16, #tpu.memory_space<vmem>>, %arg10: memref<256x128xbf16, #tpu.memory_space<vmem>>, %arg11: memref<1x128xf32, #tpu.memory_space<vmem>>, %arg12: memref<16x128xf32, #tpu.memory_space<vmem>>, %arg13: memref<16x256xf32, #tpu.memory_space<vmem>>, %arg14: memref<16x256xf32, #tpu.memory_space<vmem>>, %arg15: memref<16x256xf32, #tpu.memory_space<vmem>>) attributes {dimension_semantics = [#tpu.dimension_semantics<arbitrary>], iteration_bounds = array<i64: 4>, scalar_prefetch = 0 : i64, scratch_operands = 3 : i64, tpu.core_type = #tpu.core_type<tc>, window_params = [{pipeline_mode = #tpu.pipeline_mode<synchronous>, transform_indices = @transform_0, window_bounds = array<i64: 16, 32>}, {pipeline_mode = #tpu.pipeline_mode<synchronous>, transform_indices = @transform_1, window_bounds = array<i64: 16, 16>}, {pipeline_mode = #tpu.pipeline_mode<synchronous>, transform_indices = @transform_2, window_bounds = array<i64: 32, 256>}, {pipeline_mode = #tpu.pipeline_mode<synchronous>, transform_indices = @transform_3, window_bounds = array<i64: 1, 256>}, {transform_indices = @transform_4, window_bounds = array<i64: 1, 256, 256>}, {transform_indices = @transform_5, window_bounds = array<i64: 1, 1, 256>}, {transform_indices = @transform_6, window_bounds = array<i64: 1, 1, 256>}, {transform_indices = @transform_7, window_bounds = array<i64: 1, 1, 256>}, {transform_indices = @transform_8, window_bounds = array<i64: 1, 512, 1024>}, {pipeline_mode = #tpu.pipeline_mode<synchronous>, transform_indices = @transform_9, window_bounds = array<i64: 256, 128>}, {pipeline_mode = #tpu.pipeline_mode<synchronous>, transform_indices = @transform_10, window_bounds = array<i64: 1, 128>}, {pipeline_mode = #tpu.pipeline_mode<synchronous>, transform_indices = @transform_11, window_bounds = array<i64: 16, 128>}]} {
    %c0_i32 = arith.constant 0 : i32
    %0 = arith.cmpi eq, %arg0, %c0_i32 : i32
    %1 = arith.extui %0 : i1 to i32
    %c0_i32_0 = arith.constant 0 : i32
    %2 = arith.cmpi ne, %1, %c0_i32_0 : i32
    scf.if %2 {
      %c0_43 = arith.constant 0 : index
      %c0_44 = arith.constant 0 : index
      %85 = vector.load %arg1[%c0_43, %c0_44] : memref<16x32xbf16, #tpu.memory_space<vmem>>, vector<16x32xbf16>
      %c0_45 = arith.constant 0 : index
      %c0_46 = arith.constant 0 : index
      %86 = vector.load %arg3[%c0_45, %c0_46] : memref<32x256xbf16, #tpu.memory_space<vmem>>, vector<32x256xbf16>
      %cst_47 = arith.constant dense<0.000000e+00> : vector<16x256xf32>
      %87 = tpu.matmul %85, %86, %cst_47 {dimension_numbers = #tpu.dot_dimension_numbers<[1], [0], [0], [1], [0, 0, 1, 1], [], []>} : vector<16x32xbf16>, vector<32x256xbf16>, vector<16x256xf32> -> vector<16x256xf32>
      %c0_48 = arith.constant 0 : index
      %c0_49 = arith.constant 0 : index
      %88 = vector.load %arg4[%c0_48, %c0_49] : memref<1x256xf32, #tpu.memory_space<vmem>>, vector<1x256xf32>
      %89 = vector.broadcast %88 : vector<1x256xf32> to vector<16x256xf32>
      %90 = arith.addf %87, %89 : vector<16x256xf32>
      %c0_50 = arith.constant 0 : index
      %c0_51 = arith.constant 0 : index
      %91 = vector.load %arg13[%c0_50, %c0_51] : memref<16x256xf32, #tpu.memory_space<vmem>>, vector<16x256xf32>
      tpu.vector_store %arg13[%c0_50, %c0_51], %90 {strides = array<i32>} : memref<16x256xf32, #tpu.memory_space<vmem>>, vector<16x256xf32>,
      %cst_52 = arith.constant 0.000000e+00 : f32
      %92 = vector.broadcast %cst_52 : f32 to vector<16x256xf32>
      %c0_53 = arith.constant 0 : index
      %c0_54 = arith.constant 0 : index
      %93 = vector.load %arg14[%c0_53, %c0_54] : memref<16x256xf32, #tpu.memory_space<vmem>>, vector<16x256xf32>
      tpu.vector_store %arg14[%c0_53, %c0_54], %92 {strides = array<i32>} : memref<16x256xf32, #tpu.memory_space<vmem>>, vector<16x256xf32>,
      %cst_55 = arith.constant 0.000000e+00 : f32
      %94 = vector.broadcast %cst_55 : f32 to vector<16x256xf32>
      %c0_56 = arith.constant 0 : index
      %c0_57 = arith.constant 0 : index
      %95 = vector.load %arg15[%c0_56, %c0_57] : memref<16x256xf32, #tpu.memory_space<vmem>>, vector<16x256xf32>
      tpu.vector_store %arg15[%c0_56, %c0_57], %94 {strides = array<i32>} : memref<16x256xf32, #tpu.memory_space<vmem>>, vector<16x256xf32>,
    } else {
    }
    %c0 = arith.constant 0 : index
    %c0_1 = arith.constant 0 : index
    %3 = vector.load %arg13[%c0, %c0_1] : memref<16x256xf32, #tpu.memory_space<vmem>>, vector<16x256xf32>
    %4 = arith.truncf %3 : vector<16x256xf32> to vector<16x256xbf16>
    %c0_2 = arith.constant 0 : index
    %c0_3 = arith.constant 0 : index
    %c0_4 = arith.constant 0 : index
    %5 = vector.load %arg5[%c0_2, %c0_3, %c0_4] : memref<1x256x256xbf16, #tpu.memory_space<vmem>>, vector<1x256x256xbf16>
    %6 = vector.shape_cast %5 : vector<1x256x256xbf16> to vector<256x256xbf16>
    %cst = arith.constant dense<0.000000e+00> : vector<16x256xf32>
    %7 = tpu.matmul %4, %6, %cst {dimension_numbers = #tpu.dot_dimension_numbers<[1], [0], [0], [1], [0, 0, 1, 1], [], []>} : vector<16x256xbf16>, vector<256x256xbf16>, vector<16x256xf32> -> vector<16x256xf32>
    %c0_5 = arith.constant 0 : index
    %c0_6 = arith.constant 0 : index
    %c0_7 = arith.constant 0 : index
    %8 = vector.load %arg7[%c0_5, %c0_6, %c0_7] : memref<1x1x256xf32, #tpu.memory_space<vmem>>, vector<1x1x256xf32>
    %9 = vector.shape_cast %8 : vector<1x1x256xf32> to vector<1x256xf32>
    %c0_8 = arith.constant 0 : index
    %c0_9 = arith.constant 0 : index
    %c0_10 = arith.constant 0 : index
    %10 = vector.load %arg6[%c0_8, %c0_9, %c0_10] : memref<1x1x256xf32, #tpu.memory_space<vmem>>, vector<1x1x256xf32>
    %11 = vector.shape_cast %10 : vector<1x1x256xf32> to vector<1x256xf32>
    %12 = vector.broadcast %9 : vector<1x256xf32> to vector<16x256xf32>
    %13 = arith.mulf %7, %12 : vector<16x256xf32>
    %cst_11 = arith.constant dense<0.000000e+00> : vector<16xf32>
    %14 = vector.multi_reduction <add>, %13, %cst_11 [1] : vector<16x256xf32> to vector<16xf32>
    %15 = vector.shape_cast %14 : vector<16xf32> to vector<16x1xf32>
    %cst_12 = arith.constant dense<0.000000e+00> : vector<1x16xf32>
    %16 = tpu.matmul %11, %7, %cst_12 {dimension_numbers = #tpu.dot_dimension_numbers<[1], [1], [0], [0], [0, 0, 1, 0], [], []>} : vector<1x256xf32>, vector<16x256xf32>, vector<1x16xf32> -> vector<1x16xf32>
    %17 = vector.broadcast %15 : vector<16x1xf32> to vector<16x16xf32>
    %18 = vector.broadcast %16 : vector<1x16xf32> to vector<16x16xf32>
    %19 = arith.addf %17, %18 : vector<16x16xf32>
    %cst_13 = arith.constant 0.000000e+00 : f32
    %20 = vector.broadcast %cst_13 : f32 to vector<16x16xf32>
    %21 = arith.cmpf ogt, %19, %20 : vector<16x16xf32>
    %cst_14 = arith.constant 2.000000e-01 : f32
    %22 = vector.broadcast %cst_14 : f32 to vector<16x16xf32>
    %23 = arith.mulf %22, %19 : vector<16x16xf32>
    %24 = arith.select %21, %19, %23 : vector<16x16xi1>, vector<16x16xf32>
    %c0_15 = arith.constant 0 : index
    %c0_16 = arith.constant 0 : index
    %25 = vector.load %arg2[%c0_15, %c0_16] : memref<16x16xbf16, #tpu.memory_space<vmem>>, vector<16x16xbf16>
    %cst_17 = arith.constant 0.000000e+00 : bf16
    %26 = vector.broadcast %cst_17 : bf16 to vector<16x16xbf16>
    %27 = arith.cmpf ogt, %25, %26 : vector<16x16xbf16>
    %cst_18 = arith.constant -1.000000e+30 : f32
    %28 = vector.broadcast %cst_18 : f32 to vector<16x16xf32>
    %29 = arith.select %27, %24, %28 : vector<16x16xi1>, vector<16x16xf32>
    %cst_19 = arith.constant dense<0xFF800000> : vector<16xf32>
    %30 = vector.multi_reduction <maximumf>, %29, %cst_19 [1] : vector<16x16xf32> to vector<16xf32>
    %31 = vector.shape_cast %30 : vector<16xf32> to vector<16x1xf32>
    %32 = vector.broadcast %31 : vector<16x1xf32> to vector<16x16xf32>
    %33 = arith.subf %29, %32 : vector<16x16xf32>
    %34 = math.exp %33 : vector<16x16xf32>
    %cst_20 = arith.constant dense<0.000000e+00> : vector<16xf32>
    %35 = vector.multi_reduction <add>, %34, %cst_20 [1] : vector<16x16xf32> to vector<16xf32>
    %36 = vector.shape_cast %35 : vector<16xf32> to vector<16x1xf32>
    %37 = vector.broadcast %36 : vector<16x1xf32> to vector<16x16xf32>
    %38 = arith.divf %34, %37 : vector<16x16xf32>
    %39 = arith.truncf %38 : vector<16x16xf32> to vector<16x16xbf16>
    %40 = arith.truncf %7 : vector<16x256xf32> to vector<16x256xbf16>
    %cst_21 = arith.constant dense<0.000000e+00> : vector<16x256xf32>
    %41 = tpu.matmul %39, %40, %cst_21 {dimension_numbers = #tpu.dot_dimension_numbers<[1], [0], [0], [1], [0, 0, 1, 1], [], []>} : vector<16x16xbf16>, vector<16x256xbf16>, vector<16x256xf32> -> vector<16x256xf32>
    %c0_22 = arith.constant 0 : index
    %c0_23 = arith.constant 0 : index
    %c0_24 = arith.constant 0 : index
    %42 = vector.load %arg8[%c0_22, %c0_23, %c0_24] : memref<1x1x256xf32, #tpu.memory_space<vmem>>, vector<1x1x256xf32>
    %43 = vector.shape_cast %42 : vector<1x1x256xf32> to vector<1x256xf32>
    %44 = vector.broadcast %43 : vector<1x256xf32> to vector<16x256xf32>
    %45 = arith.addf %41, %44 : vector<16x256xf32>
    %46 = math.tanh %45 : vector<16x256xf32>
    %c0_25 = arith.constant 0 : index
    %c0_26 = arith.constant 0 : index
    %47 = vector.load %arg14[%c0_25, %c0_26] : memref<16x256xf32, #tpu.memory_space<vmem>>, vector<16x256xf32>
    %48 = tpu.concatenate %46, %47 in 1 : vector<16x256xf32>, vector<16x256xf32> -> vector<16x512xf32>
    %49 = arith.truncf %48 : vector<16x512xf32> to vector<16x512xbf16>
    %c0_27 = arith.constant 0 : index
    %c0_28 = arith.constant 0 : index
    %c0_29 = arith.constant 0 : index
    %50 = vector.load %arg9[%c0_27, %c0_28, %c0_29] : memref<1x512x1024xbf16, #tpu.memory_space<vmem>>, vector<1x512x1024xbf16>
    %51 = vector.shape_cast %50 : vector<1x512x1024xbf16> to vector<512x1024xbf16>
    %cst_30 = arith.constant dense<0.000000e+00> : vector<16x1024xf32>
    %52 = tpu.matmul %49, %51, %cst_30 {dimension_numbers = #tpu.dot_dimension_numbers<[1], [0], [0], [1], [0, 0, 1, 1], [], []>} : vector<16x512xbf16>, vector<512x1024xbf16>, vector<16x1024xf32> -> vector<16x1024xf32>
    %53 = vector.extract_strided_slice %52 {offsets = [0, 0], sizes = [16, 256], strides = [1, 1]} : vector<16x1024xf32> to vector<16x256xf32>
    %54 = arith.negf %53 : vector<16x256xf32>
    %55 = math.exp %54 : vector<16x256xf32>
    %cst_31 = arith.constant 1.000000e+00 : f32
    %56 = vector.broadcast %cst_31 : f32 to vector<16x256xf32>
    %57 = arith.addf %56, %55 : vector<16x256xf32>
    %58 = arith.divf %56, %57 : vector<16x256xf32>
    %59 = vector.extract_strided_slice %52 {offsets = [0, 256], sizes = [16, 256], strides = [1, 1]} : vector<16x1024xf32> to vector<16x256xf32>
    %60 = arith.negf %59 : vector<16x256xf32>
    %61 = math.exp %60 : vector<16x256xf32>
    %cst_32 = arith.constant 1.000000e+00 : f32
    %62 = vector.broadcast %cst_32 : f32 to vector<16x256xf32>
    %63 = arith.addf %62, %61 : vector<16x256xf32>
    %64 = arith.divf %62, %63 : vector<16x256xf32>
    %65 = vector.extract_strided_slice %52 {offsets = [0, 512], sizes = [16, 256], strides = [1, 1]} : vector<16x1024xf32> to vector<16x256xf32>
    %66 = math.tanh %65 : vector<16x256xf32>
    %67 = vector.extract_strided_slice %52 {offsets = [0, 768], sizes = [16, 256], strides = [1, 1]} : vector<16x1024xf32> to vector<16x256xf32>
    %68 = arith.negf %67 : vector<16x256xf32>
    %69 = math.exp %68 : vector<16x256xf32>
    %cst_33 = arith.constant 1.000000e+00 : f32
    %70 = vector.broadcast %cst_33 : f32 to vector<16x256xf32>
    %71 = arith.addf %70, %69 : vector<16x256xf32>
    %72 = arith.divf %70, %71 : vector<16x256xf32>
    %c0_34 = arith.constant 0 : index
    %c0_35 = arith.constant 0 : index
    %73 = vector.load %arg15[%c0_34, %c0_35] : memref<16x256xf32, #tpu.memory_space<vmem>>, vector<16x256xf32>
    %74 = arith.mulf %64, %73 : vector<16x256xf32>
    %75 = arith.mulf %58, %66 : vector<16x256xf32>
    %76 = arith.addf %74, %75 : vector<16x256xf32>
    %77 = math.tanh %76 : vector<16x256xf32>
    %78 = arith.mulf %72, %77 : vector<16x256xf32>
    %c0_36 = arith.constant 0 : index
    %c0_37 = arith.constant 0 : index
    %79 = vector.load %arg15[%c0_36, %c0_37] : memref<16x256xf32, #tpu.memory_space<vmem>>, vector<16x256xf32>
    tpu.vector_store %arg15[%c0_36, %c0_37], %76 {strides = array<i32>} : memref<16x256xf32, #tpu.memory_space<vmem>>, vector<16x256xf32>,
    %c0_38 = arith.constant 0 : index
    %c0_39 = arith.constant 0 : index
    %80 = vector.load %arg14[%c0_38, %c0_39] : memref<16x256xf32, #tpu.memory_space<vmem>>, vector<16x256xf32>
    tpu.vector_store %arg14[%c0_38, %c0_39], %78 {strides = array<i32>} : memref<16x256xf32, #tpu.memory_space<vmem>>, vector<16x256xf32>,
    %c0_40 = arith.constant 0 : index
    %c0_41 = arith.constant 0 : index
    %81 = vector.load %arg13[%c0_40, %c0_41] : memref<16x256xf32, #tpu.memory_space<vmem>>, vector<16x256xf32>
    tpu.vector_store %arg13[%c0_40, %c0_41], %78 {strides = array<i32>} : memref<16x256xf32, #tpu.memory_space<vmem>>, vector<16x256xf32>,
    %c3_i32 = arith.constant 3 : i32
    %82 = arith.cmpi eq, %arg0, %c3_i32 : i32
    %83 = arith.extui %82 : i1 to i32
    %c0_i32_42 = arith.constant 0 : i32
    %84 = arith.cmpi ne, %83, %c0_i32_42 : i32
    scf.if %84 {
      %85 = arith.truncf %78 : vector<16x256xf32> to vector<16x256xbf16>
      %c0_43 = arith.constant 0 : index
      %c0_44 = arith.constant 0 : index
      %86 = vector.load %arg10[%c0_43, %c0_44] : memref<256x128xbf16, #tpu.memory_space<vmem>>, vector<256x128xbf16>
      %cst_45 = arith.constant dense<0.000000e+00> : vector<16x128xf32>
      %87 = tpu.matmul %85, %86, %cst_45 {dimension_numbers = #tpu.dot_dimension_numbers<[1], [0], [0], [1], [0, 0, 1, 1], [], []>} : vector<16x256xbf16>, vector<256x128xbf16>, vector<16x128xf32> -> vector<16x128xf32>
      %c0_46 = arith.constant 0 : index
      %c0_47 = arith.constant 0 : index
      %88 = vector.load %arg11[%c0_46, %c0_47] : memref<1x128xf32, #tpu.memory_space<vmem>>, vector<1x128xf32>
      %89 = vector.broadcast %88 : vector<1x128xf32> to vector<16x128xf32>
      %90 = arith.addf %87, %89 : vector<16x128xf32>
      %c0_48 = arith.constant 0 : index
      %c0_49 = arith.constant 0 : index
      %91 = vector.load %arg12[%c0_48, %c0_49] : memref<16x128xf32, #tpu.memory_space<vmem>>, vector<16x128xf32>
      tpu.vector_store %arg12[%c0_48, %c0_49], %90 {strides = array<i32>} : memref<16x128xf32, #tpu.memory_space<vmem>>, vector<16x128xf32>,
    } else {
    }
    return
  }
  func.func @transform_0(%arg0: i32) -> (i32, i32) {
    %c0_i32 = arith.constant 0 : i32
    %c0_i32_0 = arith.constant 0 : i32
    %c0_i32_1 = arith.constant 0 : i32
    return %c0_i32, %c0_i32_0 : i32, i32
  }
  func.func @transform_1(%arg0: i32) -> (i32, i32) {
    %c0_i32 = arith.constant 0 : i32
    %c0_i32_0 = arith.constant 0 : i32
    %c0_i32_1 = arith.constant 0 : i32
    return %c0_i32, %c0_i32_0 : i32, i32
  }
  func.func @transform_2(%arg0: i32) -> (i32, i32) {
    %c0_i32 = arith.constant 0 : i32
    %c0_i32_0 = arith.constant 0 : i32
    %c0_i32_1 = arith.constant 0 : i32
    return %c0_i32, %c0_i32_0 : i32, i32
  }
  func.func @transform_3(%arg0: i32) -> (i32, i32) {
    %c0_i32 = arith.constant 0 : i32
    %c0_i32_0 = arith.constant 0 : i32
    %c0_i32_1 = arith.constant 0 : i32
    return %c0_i32, %c0_i32_0 : i32, i32
  }
  func.func @transform_4(%arg0: i32) -> (i32, i32, i32) {
    %c0_i32 = arith.constant 0 : i32
    %c0_i32_0 = arith.constant 0 : i32
    %c0_i32_1 = arith.constant 0 : i32
    return %arg0, %c0_i32, %c0_i32_0 : i32, i32, i32
  }
  func.func @transform_5(%arg0: i32) -> (i32, i32, i32) {
    %c0_i32 = arith.constant 0 : i32
    %c0_i32_0 = arith.constant 0 : i32
    %c0_i32_1 = arith.constant 0 : i32
    return %arg0, %c0_i32, %c0_i32_0 : i32, i32, i32
  }
  func.func @transform_6(%arg0: i32) -> (i32, i32, i32) {
    %c0_i32 = arith.constant 0 : i32
    %c0_i32_0 = arith.constant 0 : i32
    %c0_i32_1 = arith.constant 0 : i32
    return %arg0, %c0_i32, %c0_i32_0 : i32, i32, i32
  }
  func.func @transform_7(%arg0: i32) -> (i32, i32, i32) {
    %c0_i32 = arith.constant 0 : i32
    %c0_i32_0 = arith.constant 0 : i32
    %c0_i32_1 = arith.constant 0 : i32
    return %arg0, %c0_i32, %c0_i32_0 : i32, i32, i32
  }
  func.func @transform_8(%arg0: i32) -> (i32, i32, i32) {
    %c0_i32 = arith.constant 0 : i32
    %c0_i32_0 = arith.constant 0 : i32
    %c0_i32_1 = arith.constant 0 : i32
    return %arg0, %c0_i32, %c0_i32_0 : i32, i32, i32
  }
  func.func @transform_9(%arg0: i32) -> (i32, i32) {
    %c0_i32 = arith.constant 0 : i32
    %c0_i32_0 = arith.constant 0 : i32
    %c0_i32_1 = arith.constant 0 : i32
    return %c0_i32, %c0_i32_0 : i32, i32
  }
  func.func @transform_10(%arg0: i32) -> (i32, i32) {
    %c0_i32 = arith.constant 0 : i32
    %c0_i32_0 = arith.constant 0 : i32
    %c0_i32_1 = arith.constant 0 : i32
    return %c0_i32, %c0_i32_0 : i32, i32
  }
  func.func @transform_11(%arg0: i32) -> (i32, i32) {
    %c0_i32 = arith.constant 0 : i32
    %c0_i32_0 = arith.constant 0 : i32
    %c0_i32_1 = arith.constant 0 : i32
    return %c0_i32, %c0_i32_0 : i32, i32
  }
}

</mosaic_0001>

<bundles_post_ra>
// kernel: genie_path_forward.1
= control target key start
LH: loop header
LB: loop body
LE: loop exit
PB: predicated region body
PF: predicated region fallthrough
CT: control target
= control target key end

     0   :  { %s7083_s0 = inlined_call_operand.vmem [shape: bf16[16,32], index: 0, kind: input, shape index: {}]   ;;  %s7084_s1 = inlined_call_operand.vmem [shape: bf16[16,16], index: 1, kind: input, shape index: {}]   ;;  %s7085_s2 = inlined_call_operand.hbm [shape: bf16[32,256], index: 2, kind: input, shape index: {}]   ;;  %s7086_s3 = inlined_call_operand.hbm [shape: f32[1,256], index: 3, kind: input, shape index: {}]   ;;  %s7087_s4 = inlined_call_operand.hbm [shape: bf16[4,256,256], index: 4, kind: input, shape index: {}]   ;;  %s7088_s5 = inlined_call_operand.hbm [shape: f32[4,1,256], index: 5, kind: input, shape index: {}]   ;;  %s7089_s6 = inlined_call_operand.hbm [shape: f32[4,1,256], index: 6, kind: input, shape index: {}]   ;;  %s7090_s7 = inlined_call_operand.hbm [shape: f32[4,1,256], index: 7, kind: input, shape index: {}]   ;;  %s7091_s8 = inlined_call_operand.hbm [shape: bf16[4,512,1024], index: 8, kind: input, shape index: {}]   ;;  %s7092_s9 = inlined_call_operand.hbm [shape: bf16[256,128], index: 9, kind: input, shape index: {}]   ;;  %s7093_s10 = inlined_call_operand.hbm [shape: f32[1,128], index: 10, kind: input, shape index: {}]   ;;  %s7094_s11 = inlined_call_operand.hbm [shape: f32[16,128], index: 11, kind: output, shape index: {}]  }
   0x1   :  { %7105 = sst [smem:[#allocation31_spill]] %s7083_s0 }
   0x2   :  { %7106 = sst [smem:[#allocation32_spill]] %s7084_s1 }
   0x3   :  { %7107 = sst [smem:[#allocation33_spill]] %s7085_s2 }
   0x4   :  { %7108 = sst [smem:[#allocation34_spill]] %s7087_s4 }
   0x5   :  { %7109 = sst [smem:[#allocation35_spill]] %s7094_s11 }
   0x6   :  { %16 = vsyncpa [#allocation6], 0 }
   0x7   :  { %17 = vsyncpa [#allocation9], 0 }
   0x8   :  { %18 = vsyncpa [#allocation17], 0 }
   0x9   :  { %19 = vsyncpa [#allocation7], 0  ;;  %s5948_s17 = smov 0   ;;  %s5950_s18 = smov 0  }
   0xa   :  { %s5952_s19 = smov 0   ;;  %s5954_s20 = smov 0  }
   0xb LB: > { %7110 = sst [smem:[#allocation25_spill]] %s5864_s18  ;;  %s5967_s21 = sadd.s32 4294967295, %s5872_s20   ;;  %s5872_s20 = sphi %s5954_s20, %s7145_s20   ;;  %s5868_s19 = sphi %s5952_s19, %s7148_s19   ;;  %s5864_s18 = sphi %s5950_s18, %s7147_s18   ;;  %s5860_s17 = sphi %s5948_s17, %s7146_s17  }
   0xc   : > { %7111 = sst [smem:[#allocation26_spill]] %s5868_s19  ;;  %p129_p0 = scmp.ne.s32.totalorder %s5864_s18, %s5860_s17 }
   0xd   : > { %7112 = sst [smem:[#allocation27_spill]] %s5967_s21  ;;  %p130_p1 = scmp.eq.s32.totalorder %s5967_s21, 0 }
   0xe   : > { %p3722_p2 = scmp.ge.s32.totalorder %s5872_s20, 1  ;;  %p307_p3 = scmp.lt.s32.totalorder %s5872_s20, 5 }
   0xf   : > { %p3723_p4 = scmp.ne.s32.totalorder %s5967_s21, 0  ;;  %p5976_p5 = por %p130_p1, %p129_p0 }
  0x10   : > { %s7115_s2 = sld [smem:[#allocation33_spill]]  ;;  %p5983_p6 = pnand %p3722_p2, %p307_p3 }
  0x11   : > { %s7113_s22 = scalar_select %p5976_p5, 1, 0 }
  0x12   : > { %p5353_p7 = pneg %p5983_p6  ;;  %s5874_s27 = smov [#allocation5]  }
  0x13   : > { %7114 = sst [smem:[#allocation28_spill]] %s7113_s22  ;;  %s326_s28 = sshll.u32 %s5874_s27, 4  ;;  %s327_s28 = int_to_ptr.vmem [resolvable:$true] %s326_s28 }
  0x14   : > { %p5991_p8 = pnand %p5353_p7, %p130_p1  ;;  %s5996_s30 = sadd.s32 1, %s5872_s20  }
  0x15   : > { %7118 = sst [smem:[#allocation29_spill]] %s5996_s30  ;;  %s7095_s12 = smov 128  }
  0x16   : > { %s324_s25 = sshll.u32 %s7115_s2, 4  ;;  %s7096_s13 = smov 8   ;;  %s325_s25 = int_to_ptr.hbm [resolvable:$true] %s324_s25 }
  0x17   : > { %5356 = dma.hbm_to_vmem [thread:$0]  (!%p5991_p8), %s325_s25, 512, %s327_s28, [#allocation6], %s7095_s12, %s7095_s12, %s7096_s13  }
  0x18   : > { %s113_s14 = ssub.s32 %s5872_s20, %s5996_s30  ;;  %s116_s15 = sadd.s32 1, %s5868_s19 }
  0x19   : > { %p114_p9 = scmp.eq.s32.totalorder %s113_s14, 0  ;;  %p123_p10 = scmp.ne.s32.totalorder %s5868_s19, %s5864_s18 }
  0x1a   : > { %p124_p11 = scmp.eq.s32.totalorder %s5872_s20, 0  ;;  %p5386_p12 = scmp.lt.s32.totalorder %s5872_s20, 4 }
  0x1b   : > { %s6011_s16 = scalar_select %p114_p9, %s5868_s19, %s116_s15  }
  0x1c   : > { %p125_p13 = por %p124_p11, %p123_p10  ;;  %s378_s17 = sand.u32 1, %s5872_s20  }
  0x1d   : > { %7119 = sst [smem:[#allocation30_spill]] %s6011_s16  ;;  %s6015_s23 = sand.u32 1, %s5868_s19  }
  0x1e   : > { %s3728_s24 = sshll.u32 %s6015_s23, 8  ;;  %s5008_s27 = sshll.u32 %s5872_s20, 8 }
  0x1f   : > { %s7120_s4 = sld [smem:[#allocation34_spill]]  ;;  %s382_s12 = scalar_lea.vmem [#allocation10], %s3728_s24 }
  0x20   : > { %s390_s13 = sshll.u32 %s382_s12, 4  ;;  %p6024_p0 = pnand %p5386_p12, %p125_p13  ;;  %s391_s13 = int_to_ptr.vmem [resolvable:$true] %s390_s13 }
  0x21   : > { %s6029_s16 = sshll.u32 %s6015_s23, 1  ;;  %s6032_s19 = sshll.u32 %s5872_s20, 1 }
  0x22   : > { %s408_s2 = scalar_lea.hbm %s7088_s5, %s6032_s19  ;;  %p6042_p3 = pneg %p6024_p0 }
  0x25   : > { %s387_s28 = scalar_lea.hbm %s7120_s4, %s5008_s27  ;;  %s6038_s27 = scalar_lea.sflag [#allocation6], %s378_s17 }
  0x26   : > { %s388_s14 = sshll.u32 %s387_s28, 4  ;;  %s5557_s11 = scalar_lea.hbm %s7120_s4, 1024  ;;  %s389_s14 = int_to_ptr.hbm [resolvable:$true] %s388_s14 }
  0x27   : > { %s5550_s12 = sshra.s32 %s389_s14, 4  ;;  %s5551_s12 = int_to_ptr.hbm [resolvable:$true] %s5550_s12 }
  0x28   : > { %s5552_s24 = scalar_lea.hbm %s5551_s12, 256  ;;  %p5558_p10 = scmp.lt.s32.totalorder %s5551_s12, %s7120_s4 }
  0x29   : > { %p5553_p2 = scmp.ne.s32.totalorder %s5551_s12, %s5552_s24  ;;  %p5559_p11 = scmp.lt.s32.totalorder %s5557_s11, %s5552_s24 }
  0x2b   : > { %p5555_p7 = pnand %p6042_p3, %p5553_p2  ;;  %p5560_p12 = por %p5559_p11, %p5558_p10 }
  0x2d   : > { %p5556_p9 = pneg %p5555_p7 }
  0x2f   : > { %p5561_p13 = pnand %p5560_p12, %p5556_p9 }
  0x31   : > { %5564 = shalt.err (!%p5561_p13)
}
  0x32   : > { %s7123_s0 = smov 8   ;;  %s7124_s22 = smov 128  }
  0x33   : > { %5369 = dma.hbm_to_vmem [thread:$0]  (!%p6024_p0), %s389_s14, 4096, %s391_s13, %s6038_s27, %s7124_s22, %s7124_s22, %s7123_s0  }
  0x34   : > { %s410_s18 = sshll.u32 %s408_s2, 4  ;;  %s404_s1 = scalar_lea.vmem [#allocation11], %s6029_s16  ;;  %s411_s18 = int_to_ptr.hbm [resolvable:$true] %s410_s18 }
  0x35   : > { %s412_s28 = sshll.u32 %s404_s1, 4  ;;  %s5580_s30 = sshra.s32 %s411_s18, 4  ;;  %s413_s28 = int_to_ptr.vmem [resolvable:$true] %s412_s28  ;;  %s5581_s30 = int_to_ptr.hbm [resolvable:$true] %s5580_s30 }
  0x36   : > { %s5582_s12 = scalar_lea.hbm %s5581_s30, 2  ;;  %s5587_s17 = scalar_lea.hbm %s7088_s5, 8 }
  0x37   : > { %p5583_p2 = scmp.ne.s32.totalorder %s5581_s30, %s5582_s12  ;;  %p5588_p10 = scmp.lt.s32.totalorder %s5581_s30, %s7088_s5 }
  0x38   : > { %p5589_p11 = scmp.lt.s32.totalorder %s5587_s17, %s5582_s12 }
  0x39   : > { %p5585_p7 = pnand %p5583_p2, %p6042_p3 }
  0x3a   : > { %p5590_p12 = por %p5589_p11, %p5588_p10 }
  0x3b   : > { %p5586_p9 = pneg %p5585_p7 }
  0x3d   : > { %p5591_p13 = pnand %p5590_p12, %p5586_p9 }
  0x3f   : > { %5594 = shalt.err (!%p5591_p13)
}
  0x40   : > { %5372 = dma.hbm_to_vmem [thread:$0]  (!%p6024_p0), %s411_s18, 32, %s413_s28, %s6038_s27  }
  0x41   : > { %s427_s13 = scalar_lea.hbm %s7089_s6, %s6032_s19  ;;  %s423_s2 = scalar_lea.vmem [#allocation12], %s6029_s16 }
  0x42   : > { %s429_s14 = sshll.u32 %s427_s13, 4  ;;  %s431_s1 = sshll.u32 %s423_s2, 4  ;;  %s430_s14 = int_to_ptr.hbm [resolvable:$true] %s429_s14  ;;  %s432_s1 = int_to_ptr.vmem [resolvable:$true] %s431_s1 }
  0x43   : > { %s5610_s4 = sshra.s32 %s430_s14, 4  ;;  %s5617_s18 = scalar_lea.hbm %s7089_s6, 8  ;;  %s5611_s4 = int_to_ptr.hbm [resolvable:$true] %s5610_s4 }
  0x44   : > { %s5612_s21 = scalar_lea.hbm %s5611_s4, 2  ;;  %p5618_p10 = scmp.lt.s32.totalorder %s5611_s4, %s7089_s6 }
  0x45   : > { %p5613_p2 = scmp.ne.s32.totalorder %s5611_s4, %s5612_s21  ;;  %p5619_p11 = scmp.lt.s32.totalorder %s5617_s18, %s5612_s21 }
  0x47   : > { %p5615_p7 = pnand %p5613_p2, %p6042_p3  ;;  %p5620_p12 = por %p5619_p11, %p5618_p10 }
  0x49   : > { %p5616_p9 = pneg %p5615_p7 }
  0x4b   : > { %p5621_p13 = pnand %p5620_p12, %p5616_p9 }
  0x4d   : > { %5624 = shalt.err (!%p5621_p13)
}
  0x4e   : > { %5375 = dma.hbm_to_vmem [thread:$0]  (!%p6024_p0), %s430_s14, 32, %s432_s1, %s6038_s27  }
  0x4f   : > { %s339_s0 = sshll.u32 %s7086_s3, 4  ;;  %s5877_s22 = smov [#allocation8]   ;;  %s340_s0 = int_to_ptr.hbm [resolvable:$true] %s339_s0 }
  0x50   : > { %s341_s13 = sshll.u32 %s5877_s22, 4  ;;  %s446_s21 = scalar_lea.hbm %s7090_s7, %s6032_s19  ;;  %s342_s13 = int_to_ptr.vmem [resolvable:$true] %s341_s13 }
  0x51   : > { %5359 = dma.hbm_to_vmem [thread:$0]  (!%p5991_p8), %s340_s0, 32, %s342_s13, [#allocation9]  }
  0x52   : > { %s442_s30 = scalar_lea.vmem [#allocation13], %s6029_s16  ;;  %s448_s18 = sshll.u32 %s446_s21, 4  ;;  %s449_s18 = int_to_ptr.hbm [resolvable:$true] %s448_s18 }
  0x53   : > { %s450_s12 = sshll.u32 %s442_s30, 4  ;;  %s350_s28 = sshll.u32 %s7092_s9, 4  ;;  %s451_s12 = int_to_ptr.vmem [resolvable:$true] %s450_s12  ;;  %s351_s28 = int_to_ptr.hbm [resolvable:$true] %s350_s28 }
  0x54   : > { %s5670_s24 = sshra.s32 %s449_s18, 4  ;;  %s5677_s19 = scalar_lea.hbm %s7090_s7, 8  ;;  %s5671_s24 = int_to_ptr.hbm [resolvable:$true] %s5670_s24 }
  0x55   : > { %s5672_s11 = scalar_lea.hbm %s5671_s24, 2  ;;  %p5678_p10 = scmp.lt.s32.totalorder %s5671_s24, %s7090_s7 }
  0x56   : > { %p5673_p2 = scmp.ne.s32.totalorder %s5671_s24, %s5672_s11  ;;  %p5679_p11 = scmp.lt.s32.totalorder %s5677_s19, %s5672_s11 }
  0x58   : > { %p5675_p7 = pnand %p5673_p2, %p6042_p3  ;;  %p5680_p12 = por %p5679_p11, %p5678_p10 }
  0x5a   : > { %p5676_p9 = pneg %p5675_p7 }
  0x5c   : > { %p5681_p13 = pnand %p5680_p12, %p5676_p9 }
  0x5e   : > { %5684 = shalt.err (!%p5681_p13)
}
  0x5f   : > { %5378 = dma.hbm_to_vmem [thread:$0]  (!%p6024_p0), %s449_s18, 32, %s451_s12, %s6038_s27  }
  0x60   : > { %s5878_s13 = smov [#allocation15]   ;;  %s5879_s4 = smov 64  }
  0x61   : > { %s352_s2 = sshll.u32 %s5878_s13, 4  ;;  %s5880_s21 = smov 4   ;;  %s353_s2 = int_to_ptr.vmem [resolvable:$true] %s352_s2 }
  0x62   : > { %5362 = dma.hbm_to_vmem [thread:$0]  (!%p5991_p8), %s351_s28, 2048, %s353_s2, [#allocation9], %s5879_s4, %s5879_s4, %s5880_s21  }
  0x63   : > { %s365_s1 = sshll.u32 %s7093_s10, 4  ;;  %s5881_s24 = smov [#allocation16]   ;;  %s366_s1 = int_to_ptr.hbm [resolvable:$true] %s365_s1 }
  0x64   : > { %s367_s11 = sshll.u32 %s5881_s24, 4  ;;  %s3737_s17 = sshll.u32 %s6015_s23, 11  ;;  %s368_s11 = int_to_ptr.vmem [resolvable:$true] %s367_s11 }
  0x65   : > { %5365 = dma.hbm_to_vmem [thread:$0]  (!%p5991_p8), %s366_s1, 16, %s368_s11, [#allocation17]  }
  0x66   : > { %s5009_s12 = sshll.u32 %s5872_s20, 11  ;;  %s461_s16 = scalar_lea.vmem [#allocation14], %s3737_s17 }
  0x67   : > { %s466_s19 = scalar_lea.hbm %s7091_s8, %s5009_s12  ;;  %s469_s22 = sshll.u32 %s461_s16, 4  ;;  %s470_s22 = int_to_ptr.vmem [resolvable:$true] %s469_s22 }
  0x68   : > { %s467_s28 = sshll.u32 %s466_s19, 4  ;;  %s5767_s20 = scalar_lea.hbm %s7091_s8, 8192  ;;  %s468_s28 = int_to_ptr.hbm [resolvable:$true] %s467_s28 }
  0x69   : > { %s5760_s13 = sshra.s32 %s468_s28, 4  ;;  %s5761_s13 = int_to_ptr.hbm [resolvable:$true] %s5760_s13 }
  0x6a   : > { %s5762_s2 = scalar_lea.hbm %s5761_s13, 2048  ;;  %p5768_p8 = scmp.lt.s32.totalorder %s5761_s13, %s7091_s8 }
  0x6b   : > { %p5763_p2 = scmp.ne.s32.totalorder %s5761_s13, %s5762_s2  ;;  %p5769_p10 = scmp.lt.s32.totalorder %s5767_s20, %s5762_s2 }
  0x6d   : > { %p5765_p7 = pnand %p5763_p2, %p6042_p3  ;;  %p5770_p11 = por %p5769_p10, %p5768_p8 }
  0x6f   : > { %p5766_p9 = pneg %p5765_p7 }
  0x71   : > { %p5771_p12 = pnand %p5770_p11, %p5766_p9 }
  0x73   : > { %5774 = shalt.err (!%p5771_p12)
}
  0x74   : > { %s5882_s30 = smov 512   ;;  %s5883_s14 = smov 32  }
  0x75   : > { %5381 = dma.hbm_to_vmem [thread:$0]  (!%p6024_p0), %s468_s28, 32768, %s470_s22, %s6038_s27, %s5882_s30, %s5882_s30, %s5883_s14  }
  0x76   : > { %481 = sbr.rel (%p5983_p6) target bundleno = 1588 (0x634), region = 64  ;;  %s7125_s25 = sld [smem:[#allocation27_spill]] (!%p5983_p6) }
  0x7b   : > { %5835 = dma.done.wait (%p130_p1), [#allocation6], 512  }
  0x7c   : > { %5837 = vsyncadd (%p130_p1), [#allocation6], 4294966784 }
  0x7d   : > { %5839 = dma.done.wait (%p130_p1), [#allocation9], 32  }
  0x7e   : > { %5841 = vsyncadd (%p130_p1), [#allocation9], 4294967264  ;;  %s7126_s1 = sld [smem:[#allocation25_spill]]  ;;  %s493_s15 = sand.u32 1, %s7125_s25  }
  0x7f   : > { %s494_s26 = scalar_lea.sflag [#allocation6], %s493_s15 }
  0x84   : > { %s495_s27 = sand.u32 1, %s7126_s1  }
  0x85   : > { %s3743_s11 = sshll.u32 %s495_s27, 8 }
  0x86   : > { %s6147_s17 = scalar_lea.vmem [#allocation10], %s3743_s11 }
  0x87   : > { %5843 = dma.done.wait (%p5976_p5), %s494_s26, 36960  }
  0x88   : > { %5845 = vsyncadd (%p5976_p5), %s494_s26, 4294930336  ;;  %s6153_s12 = sshll.u32 %s495_s27, 1  ;;  %s3747_s18 = sshll.u32 %s495_s27, 11 }
  0x89   : > { %s507_s0 = scalar_lea.vmem [#allocation11], %s6153_s12  ;;  %s517_s19 = scalar_lea.vmem [#allocation12], %s6153_s12 }
  0x8a   : > { %s527_s16 = scalar_lea.vmem [#allocation13], %s6153_s12  ;;  %s6158_s22 = scalar_lea.vmem [#allocation14], %s3747_s18 }
  0x8b   : > { %5847 = dma.done.wait (%p130_p1), [#allocation9], 2048  }
  0x8c   : > { %5849 = vsyncadd (%p130_p1), [#allocation9], 4294965248 }
  0x8d   : > { %5851 = dma.done.wait (%p130_p1), [#allocation17], 16  }
  0x8e   : > { %5853 = vsyncadd (%p130_p1), [#allocation17], 4294967280  ;;  %606 = sbr.rel (%p3723_p4) target bundleno = 295 (0x127), region = 104  ;;  %s7128_s2 = sld [smem:[#allocation31_spill]] (!%p3723_p4) }
  0x93   : > { %v3765_v0 = vld [vmem:[#allocation5 + $0x10] sm:$0xf]  ;;  %v5014_v1 = vld [vmem:[#allocation5 + $0x14] sm:$0xf0]  ;;  %v5013_v2 = vld [vmem:[#allocation5 + $0x14] sm:$0xf] }
  0x94   : > { %v3766_v3 = vor.u32 %v5014_v1, %v3765_v0  ;;  %v3767_v4 = vld [vmem:[#allocation5 + $0x18] sm:$0xf0]  ;;  %v3757_v5 = vld [vmem:[#allocation5] sm:$0xf]  ;;  %v5012_v6 = vld [vmem:[#allocation5 + $0x4] sm:$0xf0] }
  0x95   : > { %v3770_v7 = vor.u32 %v5013_v2, %v3767_v4  ;;  %v5011_v8 = vld [vmem:[#allocation5 + $0x4] sm:$0xf]  ;;  %v3759_v9 = vld [vmem:[#allocation5 + $0x8] sm:$0xf0]  ;;  %v3758_v10 = vor.u32 %v5012_v6, %v3757_v5  ;;  %vm644_vm0 = vcmask 261120   ;;  %v5884_v13 = vmov 0.0  }
  0x96   : > { %654 = vmatpush.bf16.msra.mxu0 %v3766_v3  ;;  %v3762_v11 = vor.u32 %v5011_v8, %v3759_v9  ;;  %v5010_v12 = vld [vmem:[%s7128_s2] sm:$0xff]  ;;  %680 = vst [vmem:[#allocation3] sm:$0xff] %v5884_v13 }
  0x97   : > { %668 = vmatpush.bf16.msra.mxu1 %v3770_v7  ;;  %681 = vst [vmem:[#allocation3 + $0x18] sm:$0xff] %v5884_v13  ;;  %v613_v14 = vld [vmem:[#allocation8] sm:$0x3] }
  0x98   : > { %682 = vst [vmem:[#allocation3 + $0x8] sm:$0xff] %v5884_v13  ;;  %v615_v15 = vperm.slane %v613_v14, 0  ;;  %v616_v16 = vperm.slane %v613_v14, 1 }
  0x99   : > { %683 = vst [vmem:[#allocation3 + $0x10] sm:$0xff] %v5884_v13 }
  0x9a   : > { %655 = vmatpush.bf16.msra.mxu0 %v3758_v10  ;;  %684 = vst [vmem:[#allocation4] sm:$0xff] %v5884_v13 }
  0x9b   : > { %669 = vmatpush.bf16.msra.mxu1 %v3762_v11  ;;  %685 = vst [vmem:[#allocation4 + $0x8] sm:$0xff] %v5884_v13 }
  0x9c   : > { %686 = vst [vmem:[#allocation4 + $0x10] sm:$0xff] %v5884_v13 }
  0x9d   : > { %3771 = vmatmul.msk.bf16.vlgmr.msra.gmra.mxu0 %vm644_vm0, %v5010_v12  ;;  %687 = vst [vmem:[#allocation4 + $0x18] sm:$0xff] %v5884_v13 }
  0x9e   : > { %3772 = vmatmul.msk.bf16.vlgmr.msra.gmra.mxu1 %vm644_vm0, %v5010_v12 }
 0x11a   : > { %v657_v17 = vpop.f32.mrf.mxu0 }
 0x11b   : > { %v658_v18 = vadd.f32 %v657_v17, %v615_v15  ;;  %v671_v19 = vpop.f32.mrf.mxu1 }
 0x11c   : > { %v672_v20 = vadd.f32 %v671_v19, %v616_v16 }
 0x11d   : > { %676 = vst [vmem:[#allocation2 + $0x10] sm:$0xff] %v658_v18 }
 0x11e   : > { %677 = vst [vmem:[#allocation2] sm:$0xff] %v672_v20 }
 0x122   : > { %v659_v21 = vpop.f32.mrf.mxu0 }
 0x123   : > { %v660_v22 = vadd.f32 %v659_v21, %v615_v15  ;;  %v673_v23 = vpop.f32.mrf.mxu1 }
 0x124   : > { %v674_v24 = vadd.f32 %v673_v23, %v616_v16 }
 0x125   : > { %678 = vst [vmem:[#allocation2 + $0x18] sm:$0xff] %v660_v22 }
 0x126   : > { %679 = vst [vmem:[#allocation2 + $0x8] sm:$0xff] %v674_v24 }
 0x127 PF: > { %v3831_v25 = vld [vmem:[%s6147_s17 + $0x70] sm:$0xf]  ;;  %v5030_v26 = vld [vmem:[%s6147_s17 + $0x74] sm:$0xf0]  ;;  %v5029_v30 = vld [vmem:[%s6147_s17 + $0x74] sm:$0xf] }
 0x128   : > { %v3895_v27 = vld [vmem:[%s6147_s17 + $0xf0] sm:$0xf]  ;;  %v3832_v28 = vor.u32 %v5030_v26, %v3831_v25  ;;  %v5046_v29 = vld [vmem:[%s6147_s17 + $0xf4] sm:$0xf0]  ;;  %v3833_v31 = vld [vmem:[%s6147_s17 + $0x78] sm:$0xf0] }
 0x129   : > { %v3896_v32 = vor.u32 %v5046_v29, %v3895_v27  ;;  %v3836_v33 = vor.u32 %v5029_v30, %v3833_v31  ;;  %v5045_v34 = vld [vmem:[%s6147_s17 + $0xf4] sm:$0xf]  ;;  %v3897_v35 = vld [vmem:[%s6147_s17 + $0xf8] sm:$0xf0]  ;;  %v3823_v36 = vld [vmem:[%s6147_s17 + $0x60] sm:$0xf] }
 0x12a   : > { %886 = vmatpush.bf16.msra.mxu0 %v3832_v28  ;;  %v3900_v37 = vor.u32 %v5045_v34, %v3897_v35  ;;  %v5028_v38 = vld [vmem:[%s6147_s17 + $0x64] sm:$0xf0]  ;;  %v3887_v39 = vld [vmem:[%s6147_s17 + $0xe0] sm:$0xf]  ;;  %v5027_v43 = vld [vmem:[%s6147_s17 + $0x64] sm:$0xf] }
 0x12b   : > { %v5044_v40 = vld [vmem:[%s6147_s17 + $0xe4] sm:$0xf0]  ;;  %900 = vmatpush.bf16.msra.mxu1 %v3896_v32  ;;  %914 = vmatpush.bf16.msra.mxu2 %v3836_v33  ;;  %v3824_v41 = vor.u32 %v5028_v38, %v3823_v36  ;;  %v3825_v44 = vld [vmem:[%s6147_s17 + $0x68] sm:$0xf0]  ;;  %v5043_v45 = vld [vmem:[%s6147_s17 + $0xe4] sm:$0xf] }
 0x12c   : > { %v3888_v42 = vor.u32 %v5044_v40, %v3887_v39  ;;  %928 = vmatpush.bf16.msra.mxu3 %v3900_v37  ;;  %v3828_v46 = vor.u32 %v5027_v43, %v3825_v44  ;;  %v3889_v47 = vld [vmem:[%s6147_s17 + $0xe8] sm:$0xf0]  ;;  %v3815_v48 = vld [vmem:[%s6147_s17 + $0x50] sm:$0xf]  ;;  %v5026_v49 = vld [vmem:[%s6147_s17 + $0x54] sm:$0xf0] }
 0x12d   : > { %v3892_v50 = vor.u32 %v5043_v45, %v3889_v47  ;;  %v3879_v51 = vld [vmem:[%s6147_s17 + $0xd0] sm:$0xf]  ;;  %v5042_v52 = vld [vmem:[%s6147_s17 + $0xd4] sm:$0xf0]  ;;  %v5025_v53 = vld [vmem:[%s6147_s17 + $0x54] sm:$0xf]  ;;  %v3816_v54 = vor.u32 %v5026_v49, %v3815_v48 }
 0x12e   : > { %887 = vmatpush.bf16.msra.mxu0 %v3824_v41  ;;  %v3817_v55 = vld [vmem:[%s6147_s17 + $0x58] sm:$0xf0]  ;;  %v5041_v56 = vld [vmem:[%s6147_s17 + $0xd4] sm:$0xf]  ;;  %v3880_v58 = vor.u32 %v5042_v52, %v3879_v51  ;;  %v3807_v60 = vld [vmem:[%s6147_s17 + $0x40] sm:$0xf] }
 0x12f   : > { %v3881_v57 = vld [vmem:[%s6147_s17 + $0xd8] sm:$0xf0]  ;;  %901 = vmatpush.bf16.msra.mxu1 %v3888_v42  ;;  %915 = vmatpush.bf16.msra.mxu2 %v3828_v46  ;;  %v3820_v59 = vor.u32 %v5025_v53, %v3817_v55  ;;  %v5024_v61 = vld [vmem:[%s6147_s17 + $0x44] sm:$0xf0]  ;;  %v3871_v62 = vld [vmem:[%s6147_s17 + $0xc0] sm:$0xf] }
 0x130   : > { %929 = vmatpush.bf16.msra.mxu3 %v3892_v50  ;;  %v3884_v63 = vor.u32 %v5041_v56, %v3881_v57  ;;  %v5040_v0 = vld [vmem:[%s6147_s17 + $0xc4] sm:$0xf0]  ;;  %v5023_v1 = vld [vmem:[%s6147_s17 + $0x44] sm:$0xf]  ;;  %v3809_v2 = vld [vmem:[%s6147_s17 + $0x48] sm:$0xf0]  ;;  %v3808_v5 = vor.u32 %v5024_v61, %v3807_v60 }
 0x131   : > { %v5039_v3 = vld [vmem:[%s6147_s17 + $0xc4] sm:$0xf]  ;;  %v3873_v4 = vld [vmem:[%s6147_s17 + $0xc8] sm:$0xf0]  ;;  %v3872_v6 = vor.u32 %v5040_v0, %v3871_v62  ;;  %v3812_v7 = vor.u32 %v5023_v1, %v3809_v2  ;;  %v3799_v8 = vld [vmem:[%s6147_s17 + $0x30] sm:$0xf] }
 0x132   : > { %888 = vmatpush.bf16.msra.mxu0 %v3816_v54  ;;  %v5022_v9 = vld [vmem:[%s6147_s17 + $0x34] sm:$0xf0]  ;;  %v3863_v10 = vld [vmem:[%s6147_s17 + $0xb0] sm:$0xf]  ;;  %v3876_v11 = vor.u32 %v5039_v3, %v3873_v4  ;;  %v5021_v13 = vld [vmem:[%s6147_s17 + $0x34] sm:$0xf] }
 0x133   : > { %902 = vmatpush.bf16.msra.mxu1 %v3880_v58  ;;  %916 = vmatpush.bf16.msra.mxu2 %v3820_v59  ;;  %v5038_v12 = vld [vmem:[%s6147_s17 + $0xb4] sm:$0xf0]  ;;  %v3801_v14 = vld [vmem:[%s6147_s17 + $0x38] sm:$0xf0]  ;;  %v5037_v15 = vld [vmem:[%s6147_s17 + $0xb4] sm:$0xf]  ;;  %v3800_v17 = vor.u32 %v5022_v9, %v3799_v8 }
 0x134   : > { %930 = vmatpush.bf16.msra.mxu3 %v3884_v63  ;;  %v3865_v16 = vld [vmem:[%s6147_s17 + $0xb8] sm:$0xf0]  ;;  %v3864_v18 = vor.u32 %v5038_v12, %v3863_v10  ;;  %v3804_v19 = vor.u32 %v5021_v13, %v3801_v14  ;;  %v3791_v20 = vld [vmem:[%s6147_s17 + $0x20] sm:$0xf]  ;;  %v5020_v21 = vld [vmem:[%s6147_s17 + $0x24] sm:$0xf0] }
 0x135   : > { %v3855_v22 = vld [vmem:[%s6147_s17 + $0xa0] sm:$0xf]  ;;  %v3868_v23 = vor.u32 %v5037_v15, %v3865_v16  ;;  %v5036_v24 = vld [vmem:[%s6147_s17 + $0xa4] sm:$0xf0]  ;;  %v5019_v25 = vld [vmem:[%s6147_s17 + $0x24] sm:$0xf]  ;;  %v3792_v29 = vor.u32 %v5020_v21, %v3791_v20 }
 0x136   : > { %889 = vmatpush.bf16.msra.mxu0 %v3808_v5  ;;  %v3793_v26 = vld [vmem:[%s6147_s17 + $0x28] sm:$0xf0]  ;;  %v5035_v27 = vld [vmem:[%s6147_s17 + $0xa4] sm:$0xf]  ;;  %v3856_v30 = vor.u32 %v5036_v24, %v3855_v22  ;;  %v3783_v32 = vld [vmem:[%s6147_s17 + $0x10] sm:$0xf] }
 0x137   : > { %903 = vmatpush.bf16.msra.mxu1 %v3872_v6  ;;  %917 = vmatpush.bf16.msra.mxu2 %v3812_v7  ;;  %v3857_v28 = vld [vmem:[%s6147_s17 + $0xa8] sm:$0xf0]  ;;  %v3796_v31 = vor.u32 %v5019_v25, %v3793_v26  ;;  %v5018_v33 = vld [vmem:[%s6147_s17 + $0x14] sm:$0xf0]  ;;  %v3847_v34 = vld [vmem:[%s6147_s17 + $0x90] sm:$0xf] }
 0x138   : > { %931 = vmatpush.bf16.msra.mxu3 %v3876_v11  ;;  %v3860_v35 = vor.u32 %v5035_v27, %v3857_v28  ;;  %v5034_v36 = vld [vmem:[%s6147_s17 + $0x94] sm:$0xf0]  ;;  %v5017_v37 = vld [vmem:[%s6147_s17 + $0x14] sm:$0xf]  ;;  %v3785_v38 = vld [vmem:[%s6147_s17 + $0x18] sm:$0xf0]  ;;  %v3784_v41 = vor.u32 %v5018_v33, %v3783_v32 }
 0x139   : > { %v5033_v39 = vld [vmem:[%s6147_s17 + $0x94] sm:$0xf]  ;;  %v3849_v40 = vld [vmem:[%s6147_s17 + $0x98] sm:$0xf0]  ;;  %v3848_v42 = vor.u32 %v5034_v36, %v3847_v34  ;;  %v3788_v43 = vor.u32 %v5017_v37, %v3785_v38  ;;  %v3775_v44 = vld [vmem:[%s6147_s17] sm:$0xf] }
 0x13a   : > { %890 = vmatpush.bf16.msra.mxu0 %v3800_v17  ;;  %v5016_v45 = vld [vmem:[%s6147_s17 + $0x4] sm:$0xf0]  ;;  %v3839_v46 = vld [vmem:[%s6147_s17 + $0x80] sm:$0xf]  ;;  %v3852_v47 = vor.u32 %v5033_v39, %v3849_v40  ;;  %v5015_v49 = vld [vmem:[%s6147_s17 + $0x4] sm:$0xf] }
 0x13b   : > { %904 = vmatpush.bf16.msra.mxu1 %v3864_v18  ;;  %918 = vmatpush.bf16.msra.mxu2 %v3804_v19  ;;  %v5032_v48 = vld [vmem:[%s6147_s17 + $0x84] sm:$0xf0]  ;;  %v3777_v50 = vld [vmem:[%s6147_s17 + $0x8] sm:$0xf0]  ;;  %v5031_v51 = vld [vmem:[%s6147_s17 + $0x84] sm:$0xf]  ;;  %v3776_v53 = vor.u32 %v5016_v45, %v3775_v44 }
 0x13c   : > { %932 = vmatpush.bf16.msra.mxu3 %v3868_v23  ;;  %v3841_v52 = vld [vmem:[%s6147_s17 + $0x88] sm:$0xf0]  ;;  %v690_v55 = vld [vmem:[#allocation2 + $0x18] sm:$0xff]  ;;  %v3840_v56 = vor.u32 %v5032_v48, %v3839_v46  ;;  %v3780_v57 = vor.u32 %v5015_v49, %v3777_v50  ;;  %v689_v58 = vld [vmem:[#allocation2] sm:$0xff]  ;;  %s7129_s20 = sld [smem:[#allocation32_spill]]  ;;  %vm1021_vm3 = vcmask 130048  }
 0x13d   : > { %v688_v54 = vld [vmem:[#allocation2 + $0x10] sm:$0xff]  ;;  %v691_v59 = vld [vmem:[#allocation2 + $0x8] sm:$0xff]  ;;  %v3844_v60 = vor.u32 %v5031_v51, %v3841_v52  ;;  %v943_v14 = vld [vmem:[%s507_s0] sm:$0x3]  ;;  %s7142_s4 = sld [smem:[#allocation27_spill]] }
 0x13e   : > { %891 = vmatpush.bf16.msra.mxu0 %v3792_v29  ;;  %v692_v61 = vpack.c.bf16 %v690_v55, %v688_v54  ;;  %v693_v62 = vpack.c.bf16 %v691_v59, %v689_v58  ;;  %v942_v1 = vld [vmem:[%s517_s19] sm:$0x3]  ;;  %v960_v17 = vperm.slane %v943_v14, 0  ;;  %v961_v24 = vperm.slane %v943_v14, 1  ;;  %v4641_v54 = vld [vmem:[%s6158_s22 + $0x5c0] sm:$0xf] }
 0x13f   : > { %905 = vmatpush.bf16.msra.mxu1 %v3856_v30  ;;  %919 = vmatpush.bf16.msra.mxu2 %v3796_v31  ;;  %v945_v3 = vperm.slane %v942_v1, 0  ;;  %v946_v5 = vperm.slane %v942_v1, 1  ;;  %v5235_v55 = vld [vmem:[%s6158_s22 + $0x5dc] sm:$0xf0] }
 0x140   : > { %933 = vmatpush.bf16.msra.mxu3 %v3860_v35  ;;  %v5299_v58 = vld [vmem:[%s6158_s22 + $0x7dc] sm:$0xf0] }
 0x141   : > { %v4609_v59 = vld [vmem:[%s6158_s22 + $0x580] sm:$0xf] }
 0x142   : > { %892 = vmatpush.bf16.msra.mxu0 %v3784_v41  ;;  %v5320_v28 = vld [vmem:[%s7129_s20] sm:$0xff]   ;;  %v4545_v14 = vld [vmem:[%s6158_s22 + $0x500] sm:$0xf] }
 0x143   : > { %906 = vmatpush.bf16.msra.mxu1 %v3848_v42  ;;  %920 = vmatpush.bf16.msra.mxu2 %v3788_v43  ;;  %v5321_v31 = vunpack.c.l.bf16 %v5320_v28  ;;  %v5322_v38 = vunpack.c.h.bf16 %v5320_v28  ;;  %v4065_v28 = vld [vmem:[%s6158_s22 + $0x140] sm:$0xf]  ;;  %p4939_p1 = scmp.ne.s32.totalorder %s7142_s4, 3 }
 0x144   : > { %934 = vmatpush.bf16.msra.mxu3 %v3852_v47 }
 0x145   : > { %vm1017_vm2 = vcmp.gt.f32.partialorder %v5321_v31, 0.0  ;;  %vm1018_vm5 = vcmp.gt.f32.partialorder %v5322_v38, 0.0  ;;  %v4513_v31 = vld [vmem:[%s6158_s22 + $0x4c0] sm:$0xf] }
 0x146   : > { %893 = vmatpush.bf16.msra.mxu0 %v3776_v53  ;;  %v4769_v38 = vld [vmem:[%s6158_s22 + $0x6c0] sm:$0xf] }
 0x147   : > { %907 = vmatpush.bf16.msra.mxu1 %v3840_v56  ;;  %921 = vmatpush.bf16.msra.mxu2 %v3780_v57  ;;  %v4897_v56 = vld [vmem:[%s6158_s22 + $0x7c0] sm:$0xf]  ;;  %v4642_v57 = vor.u32 %v5235_v55, %v4641_v54 }
 0x148   : > { %935 = vmatpush.bf16.msra.mxu3 %v3844_v60  ;;  %v5227_v60 = vld [vmem:[%s6158_s22 + $0x59c] sm:$0xf0] }
 0x149   : > { %894 = vmatmul.bf16.vlgmr.msra.gmra.mxu0 %v692_v61  ;;  %v4610_v1 = vor.u32 %v5227_v60, %v4609_v59  ;;  %v5259_v55 = vld [vmem:[%s6158_s22 + $0x69c] sm:$0xf0] }
 0x14a   : > { %908 = vmatmul.bf16.vlgmr.msra.gmra.mxu1 %v693_v62  ;;  %922 = vmatmul.bf16.vlgmr.msra.gmra.mxu2 %v692_v61 }
 0x14b   : > { %936 = vmatmul.bf16.vlgmr.msra.gmra.mxu3 %v693_v62  ;;  %v4898_v62 = vor.u32 %v5299_v58, %v4897_v56  ;;  %v5075_v58 = vld [vmem:[%s6158_s22 + $0xdc] sm:$0xf0] }
 0x1c6   : > { %v895_v63 = vpop.f32.mrf.mxu0 }
 0x1c7   : > { %v909_v0 = vpop.f32.mrf.mxu1 }
 0x1c8   : > { %v910_v2 = vadd.f32 %v909_v0, %v895_v63  ;;  %v4865_v63 = vld [vmem:[%s6158_s22 + $0x780] sm:$0xf] }
 0x1c9   : > { %v5291_v0 = vld [vmem:[%s6158_s22 + $0x79c] sm:$0xf0] }
 0x1ca   : > { %v949_v10 = vmul.f32 %v945_v3, %v910_v2 }
 0x1cd   : > { %v923_v4 = vpop.f32.mrf.mxu2 }
 0x1ce   : > { %v937_v6 = vpop.f32.mrf.mxu3  ;;  %v897_v7 = vpop.f32.mrf.mxu0 }
 0x1cf   : > { %v938_v8 = vadd.f32 %v937_v6, %v923_v4  ;;  %v911_v9 = vpop.f32.mrf.mxu1  ;;  %v5219_v4 = vld [vmem:[%s6158_s22 + $0x55c] sm:$0xf0] }
 0x1d0   : > { %v912_v11 = vadd.f32 %v911_v9, %v897_v7  ;;  %v4129_v6 = vld [vmem:[%s6158_s22 + $0x1c0] sm:$0xf] }
 0x1d1   : > { %v950_v12 = vmul.f32 %v946_v5, %v938_v8  ;;  %v5283_v7 = vld [vmem:[%s6158_s22 + $0x75c] sm:$0xf0] }
 0x1d2   : > { %978 = vmatpush.xpose.msrb.mxu0 %v912_v11  ;;  %v1071_v13 = vpack.c.bf16 %v912_v11, %v910_v2  ;;  %v951_v21 = vmul.f32 %v945_v3, %v912_v11  ;;  %v4866_v3 = vor.u32 %v5291_v0, %v4865_v63  ;;  %v4385_v9 = vld [vmem:[%s6158_s22 + $0x3c0] sm:$0xf] }
 0x1d3   : > { %v953_v15 = vadd.f32 %v950_v12, %v949_v10  ;;  %v5171_v11 = vld [vmem:[%s6158_s22 + $0x3dc] sm:$0xf0] }
 0x1d4   : > { %1089 = vmatpush.bf16.msrb.mxu2 %v1071_v13  ;;  %v4386_v13 = vor.u32 %v5171_v11, %v4385_v9  ;;  %v5139_v63 = vld [vmem:[%s6158_s22 + $0x2dc] sm:$0xf0] }
 0x1d5   : > { %954 = vadd.xlane.f32.xlu0 %v953_v15  ;;  %v925_v16 = vpop.f32.mrf.mxu2  ;;  %v5211_v15 = vld [vmem:[%s6158_s22 + $0x51c] sm:$0xf0] }
 0x1d6   : > { %v939_v18 = vpop.f32.mrf.mxu3  ;;  %979 = vmatpush.xpose.msrb.mxu0 %v910_v2  ;;  %v4577_v2 = vld [vmem:[%s6158_s22 + $0x540] sm:$0xf] }
 0x1d7   : > { %v940_v19 = vadd.f32 %v939_v18, %v925_v16  ;;  %v4578_v12 = vor.u32 %v5219_v4, %v4577_v2  ;;  %v4097_v16 = vld [vmem:[%s6158_s22 + $0x180] sm:$0xf]  ;;  %v5279_v4 = vld [vmem:[%s6158_s22 + $0x744] sm:$0xf] }
 0x1d8   : > { %2686 = vmatpush.bf16.msra.mxu2 %v4642_v57  ;;  %v5099_v18 = vld [vmem:[%s6158_s22 + $0x19c] sm:$0xf0] }
 0x1d9   : > { %998 = vmatpush.xpose.msrb.mxu1 %v940_v19  ;;  %v1072_v20 = vpack.c.bf16 %v940_v19, %v938_v8  ;;  %v952_v22 = vmul.f32 %v946_v5, %v940_v19  ;;  %980 = vmatmul.f32.vlgmr.msrb.gmra.mxu0 %v960_v17  ;;  %v4833_v5 = vld [vmem:[%s6158_s22 + $0x740] sm:$0xf] }
 0x1da   : > { %v4834_v17 = vor.u32 %v5283_v7, %v4833_v5  ;;  %v4353_v19 = vld [vmem:[%s6158_s22 + $0x380] sm:$0xf] }
 0x1db   : > { %1103 = vmatpush.bf16.msrb.mxu3 %v1072_v20  ;;  %v956_v23 = vadd.f32 %v952_v22, %v951_v21  ;;  %v5163_v20 = vld [vmem:[%s6158_s22 + $0x39c] sm:$0xf0] }
 0x1dc   : > { %2687 = vmatpush.bf16.msra.mxu2 %v4610_v1  ;;  %v4801_v22 = vld [vmem:[%s6158_s22 + $0x700] sm:$0xf] }
 0x1dd   : > { %999 = vmatpush.xpose.msrb.mxu1 %v938_v8  ;;  %957 = vadd.xlane.f32.xlu0 %v956_v23  ;;  %v5107_v8 = vld [vmem:[%s6158_s22 + $0x1dc] sm:$0xf0] }
 0x1de   : > { %v4130_v10 = vor.u32 %v5107_v8, %v4129_v6  ;;  %v5275_v23 = vld [vmem:[%s6158_s22 + $0x71c] sm:$0xf0] }
 0x1df   : > { %2700 = vmatpush.bf16.msra.mxu3 %v4898_v62  ;;  %v4001_v57 = vld [vmem:[%s6158_s22 + $0xc0] sm:$0xf] }
 0x1e0   : > { %1000 = vmatmul.f32.vlgmr.msrb.gmra.mxu1 %v961_v24  ;;  %2658 = vmatpush.bf16.msra.mxu0 %v4130_v10  ;;  %v4098_v24 = vor.u32 %v5099_v18, %v4097_v16  ;;  %v4257_v62 = vld [vmem:[%s6158_s22 + $0x2c0] sm:$0xf]  ;;  %v4002_v9 = vor.u32 %v5075_v58, %v4001_v57  ;;  %v5103_v58 = vld [vmem:[%s6158_s22 + $0x1c4] sm:$0xf] }
 0x1e1   : > { %2672 = vmatpush.bf16.msra.mxu1 %v4386_v13  ;;  %2688 = vmatpush.bf16.msra.mxu2 %v4578_v12  ;;  %v5187_v8 = vld [vmem:[%s6158_s22 + $0x45c] sm:$0xf0]  ;;  %v4258_v12 = vor.u32 %v5139_v63, %v4257_v62  ;;  %v5167_v62 = vld [vmem:[%s6158_s22 + $0x3c4] sm:$0xf] }
 0x1e2   : > { %v4705_v10 = vld [vmem:[%s6158_s22 + $0x640] sm:$0xf]  ;;  %v4387_v63 = vld [vmem:[%s6158_s22 + $0x3e0] sm:$0xf0] }
 0x1e3   : > { %2701 = vmatpush.bf16.msra.mxu3 %v4866_v3  ;;  %v5251_v11 = vld [vmem:[%s6158_s22 + $0x65c] sm:$0xf0] }
 0x1e4   : > { %2659 = vmatpush.bf16.msra.mxu0 %v4098_v24  ;;  %v3969_v13 = vld [vmem:[%s6158_s22 + $0x80] sm:$0xf] }
 0x1e5   : > { %v5067_v16 = vld [vmem:[%s6158_s22 + $0x9c] sm:$0xf0] }
 0x1e6   : > { %v5131_v18 = vld [vmem:[%s6158_s22 + $0x29c] sm:$0xf0] }
 0x1e7   : > { %2702 = vmatpush.bf16.msra.mxu3 %v4834_v17  ;;  %v4225_v17 = vld [vmem:[%s6158_s22 + $0x280] sm:$0xf] }
 0x1e8   : > { %v5179_v24 = vld [vmem:[%s6158_s22 + $0x41c] sm:$0xf0] }
 0x1e9   : > { %v5115_v57 = vld [vmem:[%s6158_s22 + $0x21c] sm:$0xf0] }
 0x248   : > { %v955_v25 = vpop.xlane.xlu0 %954 }
 0x250   : > { %v958_v32 = vpop.xlane.xlu0 %957 }
 0x256   : > { %v981_v26 = vpop.f32.mrf.mxu0 }
 0x25d   : > { %v1001_v27 = vpop.f32.mrf.mxu1 }
 0x25e   : > { %v1002_v29 = vadd.f32 %v1001_v27, %v981_v26 }
 0x260   : > { %v1004_v30 = vperm.slane %v1002_v29, 0  ;;  %v5091_v29 = vld [vmem:[%s6158_s22 + $0x15c] sm:$0xf0] }
 0x262   : > { %v1005_v33 = vadd.f32 %v1004_v30, %v955_v25  ;;  %v1006_v34 = vadd.f32 %v1004_v30, %v958_v32  ;;  %v4354_v25 = vor.u32 %v5163_v20, %v4353_v19  ;;  %v4546_v30 = vor.u32 %v5211_v15, %v4545_v14  ;;  %v4321_v32 = vld [vmem:[%s6158_s22 + $0x340] sm:$0xf] }
 0x264   : > { %vm1007_vm1 = vcmp.gt.f32.partialorder %v1005_v33, 0.0  ;;  %v1009_v35 = vmul.f32 0.2, %v1005_v33  ;;  %v1010_v37 = vmul.f32 0.2, %v1006_v34  ;;  %vm1008_vm4 = vcmp.gt.f32.partialorder %v1006_v34, 0.0  ;;  %2673 = vmatpush.bf16.msra.mxu1 %v4354_v25  ;;  %2689 = vmatpush.bf16.msra.mxu2 %v4546_v30 }
 0x265   : > { %v3970_v25 = vor.u32 %v5067_v16, %v3969_v13  ;;  %v4226_v30 = vor.u32 %v5131_v18, %v4225_v17  ;;  %v5271_v16 = vld [vmem:[%s6158_s22 + $0x704] sm:$0xf] }
 0x266   : > { %v1011_v36 = vsel %vm1007_vm1, %v1005_v33, %v1009_v35  ;;  %v1012_v41 = vsel %vm1008_vm4, %v1006_v34, %v1010_v37  ;;  %v4802_v34 = vor.u32 %v5275_v23, %v4801_v22  ;;  %v5203_v35 = vld [vmem:[%s6158_s22 + $0x4dc] sm:$0xf0]  ;;  %v4803_v17 = vld [vmem:[%s6158_s22 + $0x720] sm:$0xf0] }
 0x267   : > { %v1019_v39 = vsel %vm1017_vm2, %v1011_v36, -1e+30  ;;  %v1020_v42 = vsel %vm1018_vm5, %v1012_v41, -1e+30  ;;  %v4066_v36 = vor.u32 %v5091_v29, %v4065_v28  ;;  %v5155_v37 = vld [vmem:[%s6158_s22 + $0x35c] sm:$0xf0] }
 0x268   : > { %v1022_v40 = vsel %vm1021_vm3, %v1019_v39, -inf  ;;  %v1025_v43 = vsel %vm1021_vm3, %v1020_v42, -inf  ;;  %2703 = vmatpush.bf16.msra.mxu3 %v4802_v34  ;;  %v4417_v23 = vld [vmem:[%s6158_s22 + $0x400] sm:$0xf]  ;;  %v4643_v29 = vld [vmem:[%s6158_s22 + $0x5e0] sm:$0xf0] }
 0x269   : > { %1023 = vmax.xlane.f32.xlu1 %v1022_v40  ;;  %v4322_v40 = vor.u32 %v5155_v37, %v4321_v32  ;;  %2660 = vmatpush.bf16.msra.mxu0 %v4066_v36  ;;  %v4673_v32 = vld [vmem:[%s6158_s22 + $0x600] sm:$0xf]  ;;  %v5295_v34 = vld [vmem:[%s6158_s22 + $0x7c4] sm:$0xf]  ;;  %v4418_v36 = vor.u32 %v5179_v24, %v4417_v23 }
 0x26a   : > { %v4899_v37 = vld [vmem:[%s6158_s22 + $0x7e0] sm:$0xf0] }
 0x26b   : > { %2674 = vmatpush.bf16.msra.mxu1 %v4322_v40  ;;  %v5151_v23 = vld [vmem:[%s6158_s22 + $0x344] sm:$0xf] }
 0x26c   : > { %v4323_v24 = vld [vmem:[%s6158_s22 + $0x360] sm:$0xf0] }
 0x271   : > { %1026 = vmax.xlane.f32.xlu1 %v1025_v43  ;;  %v5083_v43 = vld [vmem:[%s6158_s22 + $0x11c] sm:$0xf0] }
 0x2dc   : > { %v1024_v44 = vpop.xlane.xlu1 %1023 }
 0x2dd   : > { %v1028_v45 = vsub.f32 %v1019_v39, %v1024_v44  ;;  %v5267_v39 = vld [vmem:[%s6158_s22 + $0x6dc] sm:$0xf0]  ;;  %v4514_v44 = vor.u32 %v5203_v35, %v4513_v31 }
 0x2df   : > { %v1030_v46 = vmul.f32 1.442695, %v1028_v45  ;;  %v4289_v45 = vld [vmem:[%s6158_s22 + $0x300] sm:$0xf]  ;;  %2690 = vmatpush.bf16.msra.mxu2 %v4514_v44 }
 0x2e1   : > { %5439 = vpow2.f32 %v1030_v46  ;;  %v5147_v46 = vld [vmem:[%s6158_s22 + $0x31c] sm:$0xf0] }
 0x2e2   : > { %v4290_v56 = vor.u32 %v5147_v46, %v4289_v45  ;;  %v5223_v46 = vld [vmem:[%s6158_s22 + $0x584] sm:$0xf] }
 0x2e4   : > { %v1027_v47 = vpop.xlane.xlu1 %1026  ;;  %2675 = vmatpush.bf16.msra.mxu1 %v4290_v56  ;;  %v4161_v56 = vld [vmem:[%s6158_s22 + $0x200] sm:$0xf] }
 0x2e5   : > { %v1029_v48 = vsub.f32 %v1020_v42, %v1027_v47  ;;  %v4033_v42 = vld [vmem:[%s6158_s22 + $0x100] sm:$0xf]  ;;  %v4770_v47 = vor.u32 %v5267_v39, %v4769_v38 }
 0x2e6   : > { %v3937_v38 = vld [vmem:[%s6158_s22 + $0x40] sm:$0xf] }
 0x2e7   : > { %v6246_v49 = vpop.eup %5439  ;;  %v1032_v50 = vmul.f32 1.442695, %v1029_v48  ;;  %v4481_v48 = vld [vmem:[%s6158_s22 + $0x480] sm:$0xf]  ;;  %2704 = vmatpush.bf16.msra.mxu3 %v4770_v47 }
 0x2e8   : > { %v1034_v51 = vsel %vm1021_vm3, %v6246_v49, 0.0  ;;  %2676 = vmatpush.bf16.msra.mxu1 %v4258_v12  ;;  %v5059_v39 = vld [vmem:[%s6158_s22 + $0x5c] sm:$0xf0]  ;;  %v4355_v12 = vld [vmem:[%s6158_s22 + $0x3a0] sm:$0xf0] }
 0x2e9   : > { %5441 = vpow2.f32 %v1032_v50  ;;  %1035 = vadd.xlane.f32.xlu2 %v1034_v51  ;;  %v5195_v50 = vld [vmem:[%s6158_s22 + $0x49c] sm:$0xf0] }
 0x2ea   : > { %v4737_v51 = vld [vmem:[%s6158_s22 + $0x680] sm:$0xf]  ;;  %v4482_v3 = vor.u32 %v5195_v50, %v4481_v48  ;;  %v4902_v48 = vor.u32 %v5295_v34, %v4899_v37  ;;  %v4611_v50 = vld [vmem:[%s6158_s22 + $0x5a0] sm:$0xf0] }
 0x2eb   : > { %v4738_v7 = vor.u32 %v5259_v55, %v4737_v51  ;;  %v3938_v51 = vor.u32 %v5059_v39, %v3937_v38  ;;  %v5051_v55 = vld [vmem:[%s6158_s22 + $0x1c] sm:$0xf0]  ;;  %v5191_v34 = vld [vmem:[%s6158_s22 + $0x484] sm:$0xf] }
 0x2ec   : > { %2691 = vmatpush.bf16.msra.mxu2 %v4482_v3  ;;  %2677 = vmatpush.bf16.msra.mxu1 %v4226_v30  ;;  %v5255_v37 = vld [vmem:[%s6158_s22 + $0x684] sm:$0xf] }
 0x2ed   : > { %2705 = vmatpush.bf16.msra.mxu3 %v4738_v7  ;;  %v4739_v38 = vld [vmem:[%s6158_s22 + $0x6a0] sm:$0xf0] }
 0x2ee   : > { %v4742_v39 = vor.u32 %v5255_v37, %v4739_v38  ;;  %v3907_v37 = vld [vmem:[%s6158_s22 + $0x20] sm:$0xf0] }
 0x2ef   : > { %v6250_v52 = vpop.eup %5441  ;;  %v5111_v38 = vld [vmem:[%s6158_s22 + $0x204] sm:$0xf] }
 0x2f0   : > { %v1037_v53 = vsel %vm1021_vm3, %v6250_v52, 0.0 }
 0x2f1   : > { %1038 = vadd.xlane.f32.xlu2 %v1037_v53  ;;  %v4034_v53 = vor.u32 %v5083_v43, %v4033_v42  ;;  %v4193_v42 = vld [vmem:[%s6158_s22 + $0x240] sm:$0xf] }
 0x2f2   : > { %v5123_v43 = vld [vmem:[%s6158_s22 + $0x25c] sm:$0xf0] }
 0x2f3   : > { %2661 = vmatpush.bf16.msra.mxu0 %v4034_v53  ;;  %v4194_v53 = vor.u32 %v5123_v43, %v4193_v42  ;;  %v5143_v42 = vld [vmem:[%s6158_s22 + $0x304] sm:$0xf] }
 0x2f5   : > { %2678 = vmatpush.bf16.msra.mxu1 %v4194_v53  ;;  %v4003_v53 = vld [vmem:[%s6158_s22 + $0xe0] sm:$0xf0] }
 0x2f7   : > { %2662 = vmatpush.bf16.msra.mxu0 %v4002_v9  ;;  %v4099_v9 = vld [vmem:[%s6158_s22 + $0x1a0] sm:$0xf0] }
 0x2fb   : > { %2663 = vmatpush.bf16.msra.mxu0 %v3970_v25  ;;  %v4806_v25 = vor.u32 %v5271_v16, %v4803_v17  ;;  %v4227_v16 = vld [vmem:[%s6158_s22 + $0x2a0] sm:$0xf0]  ;;  %v4617_v17 = vld [vmem:[%s6158_s22 + $0x588] sm:$0xf] }
 0x2ff   : > { %2664 = vmatpush.bf16.msra.mxu0 %v3938_v51  ;;  %v5071_v51 = vld [vmem:[%s6158_s22 + $0xc4] sm:$0xf] }
 0x35c   : > { %v6260_v61 = vpop.xlane.xlu2 %1035 }
 0x35d   : > { %5443 = vrcp.f32 %v6260_v61  ;;  %vm1045_vm7 = vweird.f32 %v6260_v61  ;;  %v1049_v0 = vand.u32 2147483647, %v6260_v61  ;;  %v1051_v1 = vand.u32 2147483648, %v6260_v61 }
 0x35f   : > { %vm1050_vm10 = vcmp.eq.f32.partialorder %v1049_v0, 8.507059e+37  ;;  %v1052_v19 = vor.u32 1.1754944e-38, %v1051_v1  ;;  %v5215_v1 = vld [vmem:[%s6158_s22 + $0x544] sm:$0xf] }
 0x363   : > { %v6279_v21 = vpop.eup %5443 }
 0x364   : > { %v1041_v26 = vmul.f32 %v6279_v21, %v6260_v61  ;;  %v6285_v27 = vpop.xlane.xlu2 %1038  ;;  %vm1046_vm6 = vweird.f32 %v6279_v21  ;;  %v4449_v61 = vld [vmem:[%s6158_s22 + $0x440] sm:$0xf] }
 0x365   : > { %5445 = vrcp.f32 %v6285_v27  ;;  %v1064_v2 = vand.u32 2147483647, %v6285_v27  ;;  %vm6321_vm8 = vmor %vm1045_vm7, %vm1046_vm6  ;;  %v1066_v6 = vand.u32 2147483648, %v6285_v27  ;;  %v4450_v20 = vor.u32 %v5187_v8, %v4449_v61  ;;  %v5095_v8 = vld [vmem:[%s6158_s22 + $0x184] sm:$0xf] }
 0x366   : > { %v1042_v33 = vsub.f32 1.0, %v1041_v26  ;;  %vm1060_vm11 = vweird.f32 %v6285_v27  ;;  %v4390_v61 = vor.u32 %v5167_v62, %v4387_v63  ;;  %v4102_v18 = vor.u32 %v5095_v8, %v4099_v9  ;;  %v1114_v62 = vld [vmem:[#allocation3] sm:$0xff]  ;;  %v1116_v63 = vld [vmem:[#allocation3 + $0x8] sm:$0xff]  ;;  %v4905_v8 = vld [vmem:[%s6158_s22 + $0x7c8] sm:$0xf] }
 0x367   : > { %vm1065_vm13 = vcmp.eq.f32.partialorder %v1064_v2, 8.507059e+37  ;;  %v1067_v26 = vor.u32 1.1754944e-38, %v1066_v6  ;;  %2692 = vmatpush.bf16.msra.mxu2 %v4450_v20  ;;  %v4579_v2 = vld [vmem:[%s6158_s22 + $0x560] sm:$0xf0]  ;;  %v4162_v6 = vor.u32 %v5115_v57, %v4161_v56 }
 0x368   : > { %v1043_v41 = vmul.f32 %v6279_v21, %v1042_v33  ;;  %v5243_v33 = vld [vmem:[%s6158_s22 + $0x61c] sm:$0xf0]  ;;  %v5087_v20 = vld [vmem:[%s6158_s22 + $0x144] sm:$0xf] }
 0x369   : > { %v4674_v45 = vor.u32 %v5243_v33, %v4673_v32  ;;  %2679 = vmatpush.bf16.msra.mxu1 %v4162_v6  ;;  %v4259_v56 = vld [vmem:[%s6158_s22 + $0x2e0] sm:$0xf0] }
 0x36a   : > { %v1044_v59 = vadd.f32 %v6279_v21, %v1043_v41  ;;  %v5175_v57 = vld [vmem:[%s6158_s22 + $0x404] sm:$0xf] }
 0x36b   : > { %v6304_v54 = vpop.eup %5445  ;;  %2693 = vmatpush.bf16.msra.mxu2 %v4418_v36 }
 0x36c   : > { %v1056_v60 = vmul.f32 %v6304_v54, %v6285_v27  ;;  %v1048_v14 = vsel %vm6321_vm8, %v6279_v21, %v1044_v59  ;;  %vm1061_vm9 = vweird.f32 %v6304_v54  ;;  %v4706_v21 = vor.u32 %v5251_v11, %v4705_v10  ;;  %v5231_v27 = vld [vmem:[%s6158_s22 + $0x5c4] sm:$0xf] }
 0x36d   : > { %vm1062_vm12 = vmor %vm1060_vm11, %vm1061_vm9  ;;  %v1053_v28 = vsel %vm1050_vm10, %v1052_v19, %v1048_v14  ;;  %v4646_v44 = vor.u32 %v5231_v27, %v4643_v29  ;;  %v4131_v59 = vld [vmem:[%s6158_s22 + $0x1e0] sm:$0xf0]  ;;  %v4582_v10 = vor.u32 %v5215_v1, %v4579_v2  ;;  %2728 = vmatpush.bf16.msrb.mxu1 %v4390_v61  ;;  %v6411_v1 = vpack.c.bf16 %v1116_v63, %v1114_v62  ;;  %v5236_v2 = vld [vmem:[%s6158_s22 + $0x5e4] sm:$0xf0] }
 0x36e   : > { %v1057_v5 = vsub.f32 1.0, %v1056_v60  ;;  %v1054_v40 = vmul.f32 %v6246_v49, %v1053_v28  ;;  %2706 = vmatpush.bf16.msra.mxu3 %v4706_v21  ;;  %v5287_v49 = vld [vmem:[%s6158_s22 + $0x784] sm:$0xf]  ;;  %v4614_v60 = vor.u32 %v5223_v46, %v4611_v50  ;;  %v4134_v7 = vor.u32 %v5103_v58, %v4131_v59  ;;  %v4457_v62 = vld [vmem:[%s6158_s22 + $0x448] sm:$0xf] }
 0x36f   : > { %v5159_v11 = vld [vmem:[%s6158_s22 + $0x384] sm:$0xf] }
 0x370   : > { %v1058_v15 = vmul.f32 %v6304_v54, %v1057_v5  ;;  %v4835_v5 = vld [vmem:[%s6158_s22 + $0x760] sm:$0xf0]  ;;  %v4358_v19 = vor.u32 %v5159_v11, %v4355_v12 }
 0x371   : > { %v4838_v13 = vor.u32 %v5279_v4, %v4835_v5  ;;  %v5207_v14 = vld [vmem:[%s6158_s22 + $0x504] sm:$0xf] }
 0x372   : > { %v1059_v22 = vadd.f32 %v6304_v54, %v1058_v15  ;;  %2707 = vmatpush.bf16.msra.mxu3 %v4674_v45  ;;  %v4547_v15 = vld [vmem:[%s6158_s22 + $0x520] sm:$0xf0]  ;;  %2729 = vmatpush.bf16.msrb.mxu1 %v4358_v19  ;;  %v5228_v19 = vld [vmem:[%s6158_s22 + $0x5a4] sm:$0xf0] }
 0x373   : > { %v4550_v21 = vor.u32 %v5207_v14, %v4547_v15  ;;  %v4515_v28 = vld [vmem:[%s6158_s22 + $0x4e0] sm:$0xf0] }
 0x374   : > { %v1063_v31 = vsel %vm1062_vm12, %v6304_v54, %v1059_v22  ;;  %v3905_v54 = vld [vmem:[%s6158_s22] sm:$0xf]  ;;  %v4067_v22 = vld [vmem:[%s6158_s22 + $0x160] sm:$0xf0] }
 0x375   : > { %v1068_v35 = vsel %vm1065_vm13, %v1067_v26, %v1063_v31  ;;  %v3906_v3 = vor.u32 %v5051_v55, %v3905_v54  ;;  %v5199_v26 = vld [vmem:[%s6158_s22 + $0x4c4] sm:$0xf]  ;;  %v4070_v30 = vor.u32 %v5087_v20, %v4067_v22  ;;  %v4326_v31 = vor.u32 %v5151_v23, %v4323_v24  ;;  %v4873_v22 = vld [vmem:[%s6158_s22 + $0x788] sm:$0xf] }
 0x376   : > { %v1069_v41 = vmul.f32 %v6250_v52, %v1068_v35  ;;  %v4867_v52 = vld [vmem:[%s6158_s22 + $0x7a0] sm:$0xf0]  ;;  %v4518_v32 = vor.u32 %v5199_v26, %v4515_v28  ;;  %v4006_v55 = vor.u32 %v5071_v51, %v4003_v53  ;;  %v4618_v20 = vor.u32 %v5228_v19, %v4617_v17  ;;  %v5268_v51 = vld [vmem:[%s6158_s22 + $0x6e4] sm:$0xf0]  ;;  %v5296_v19 = vld [vmem:[%s6158_s22 + $0x7cc] sm:$0xf] }
 0x377   : > { %v4870_v0 = vor.u32 %v5287_v49, %v4867_v52  ;;  %2665 = vmatpush.bf16.msra.mxu0 %v3906_v3  ;;  %v5263_v27 = vld [vmem:[%s6158_s22 + $0x6c4] sm:$0xf]  ;;  %2730 = vmatpush.bf16.msrb.mxu1 %v4326_v31 }
 0x378   : > { %v1070_v47 = vpack.c.bf16 %v1069_v41, %v1054_v40  ;;  %v4771_v29 = vld [vmem:[%s6158_s22 + $0x6e0] sm:$0xf0] }
 0x379   : > { %v4774_v33 = vor.u32 %v5263_v27, %v4771_v29  ;;  %v4483_v35 = vld [vmem:[%s6158_s22 + $0x4a0] sm:$0xf0]  ;;  %v4585_v29 = vld [vmem:[%s6158_s22 + $0x548] sm:$0xf] }
 0x37a   : > { %3901 = vmatmul.msk.bf16.vlgmr.msrb.gmra.mxu2 %vm1021_vm3, %v1070_v47  ;;  %3902 = vmatmul.msk.bf16.vlgmr.msrb.gmra.mxu3 %vm1021_vm3, %v1070_v47  ;;  %v4486_v36 = vor.u32 %v5191_v34, %v4483_v35  ;;  %v5079_v40 = vld [vmem:[%s6158_s22 + $0x104] sm:$0xf]  ;;  %v5284_v34 = vld [vmem:[%s6158_s22 + $0x764] sm:$0xf0] }
 0x37b   : > { %2742 = vmatpush.bf16.msrb.mxu2 %v4646_v44  ;;  %2756 = vmatpush.bf16.msrb.mxu3 %v4902_v48  ;;  %v4035_v41 = vld [vmem:[%s6158_s22 + $0x120] sm:$0xf0] }
 0x37c   : > { %2714 = vmatpush.bf16.msrb.mxu0 %v4134_v7  ;;  %v4038_v43 = vor.u32 %v5079_v40, %v4035_v41  ;;  %v4291_v44 = vld [vmem:[%s6158_s22 + $0x320] sm:$0xf0]  ;;  %v1115_v7 = vld [vmem:[#allocation3 + $0x18] sm:$0xff] }
 0x37d   : > { %v5183_v45 = vld [vmem:[%s6158_s22 + $0x444] sm:$0xf]  ;;  %v4294_v47 = vor.u32 %v5143_v42, %v4291_v44  ;;  %v4553_v42 = vld [vmem:[%s6158_s22 + $0x508] sm:$0xf] }
 0x37e   : > { %v4451_v46 = vld [vmem:[%s6158_s22 + $0x460] sm:$0xf0] }
 0x37f   : > { %2743 = vmatpush.bf16.msrb.mxu2 %v4614_v60  ;;  %2757 = vmatpush.bf16.msrb.mxu3 %v4870_v0  ;;  %v4454_v48 = vor.u32 %v5183_v45, %v4451_v46  ;;  %v5247_v50 = vld [vmem:[%s6158_s22 + $0x644] sm:$0xf]  ;;  %v4649_v0 = vld [vmem:[%s6158_s22 + $0x5c8] sm:$0xf] }
 0x380   : > { %2715 = vmatpush.bf16.msrb.mxu0 %v4102_v18  ;;  %v4707_v49 = vld [vmem:[%s6158_s22 + $0x660] sm:$0xf0]  ;;  %2731 = vmatpush.bf16.msrb.mxu1 %v4294_v47  ;;  %v4650_v5 = vor.u32 %v5236_v2, %v4649_v0  ;;  %v4809_v45 = vld [vmem:[%s6158_s22 + $0x708] sm:$0xf] }
 0x381   : > { %v4710_v52 = vor.u32 %v5247_v50, %v4707_v49  ;;  %v5135_v54 = vld [vmem:[%s6158_s22 + $0x2c4] sm:$0xf]  ;;  %v5276_v46 = vld [vmem:[%s6158_s22 + $0x724] sm:$0xf0] }
 0x382   : > { %v4419_v58 = vld [vmem:[%s6158_s22 + $0x420] sm:$0xf0]  ;;  %v4262_v59 = vor.u32 %v5135_v54, %v4259_v56  ;;  %v4810_v47 = vor.u32 %v5276_v46, %v4809_v45  ;;  %v5204_v50 = vld [vmem:[%s6158_s22 + $0x4e4] sm:$0xf0] }
 0x383   : > { %2744 = vmatpush.bf16.msrb.mxu2 %v4582_v10  ;;  %2758 = vmatpush.bf16.msrb.mxu3 %v4838_v13  ;;  %v4422_v60 = vor.u32 %v5175_v57, %v4419_v58  ;;  %v5239_v3 = vld [vmem:[%s6158_s22 + $0x604] sm:$0xf]  ;;  %v5300_v10 = vld [vmem:[%s6158_s22 + $0x7e4] sm:$0xf0] }
 0x384   : > { %2716 = vmatpush.bf16.msrb.mxu0 %v4070_v30  ;;  %v4675_v4 = vld [vmem:[%s6158_s22 + $0x620] sm:$0xf0]  ;;  %2732 = vmatpush.bf16.msrb.mxu1 %v4262_v59  ;;  %v4906_v13 = vor.u32 %v5300_v10, %v4905_v8  ;;  %v5220_v30 = vld [vmem:[%s6158_s22 + $0x564] sm:$0xf0]  ;;  %v1073_v59 = vld [vmem:[%s527_s16] sm:$0x3] }
 0x385   : > { %v4678_v6 = vor.u32 %v5239_v3, %v4675_v4  ;;  %v1117_v61 = vld [vmem:[#allocation3 + $0x10] sm:$0xff]  ;;  %v1075_v3 = vperm.slane %v1073_v59, 0 }
 0x386   : > { %v6417_v9 = vpack.c.bf16 %v1117_v61, %v1115_v7  ;;  %v5063_v11 = vld [vmem:[%s6158_s22 + $0x84] sm:$0xf]  ;;  %v4489_v54 = vld [vmem:[%s6158_s22 + $0x488] sm:$0xf]  ;;  %v1076_v7 = vperm.slane %v1073_v59, 1 }
 0x387   : > { %2745 = vmatpush.bf16.msrb.mxu2 %v4550_v21  ;;  %2759 = vmatpush.bf16.msrb.mxu3 %v4806_v25  ;;  %v3971_v12 = vld [vmem:[%s6158_s22 + $0xa0] sm:$0xf0]  ;;  %v5292_v21 = vld [vmem:[%s6158_s22 + $0x7a4] sm:$0xf0] }
 0x388   : > { %2717 = vmatpush.bf16.msrb.mxu0 %v4038_v43  ;;  %v3974_v14 = vor.u32 %v5063_v11, %v3971_v12  ;;  %v5127_v15 = vld [vmem:[%s6158_s22 + $0x284] sm:$0xf]  ;;  %v4874_v23 = vor.u32 %v5292_v21, %v4873_v22  ;;  %v5212_v43 = vld [vmem:[%s6158_s22 + $0x524] sm:$0xf0] }
 0x389   : > { %v4230_v18 = vor.u32 %v5127_v15, %v4227_v16  ;;  %v5055_v24 = vld [vmem:[%s6158_s22 + $0x44] sm:$0xf]  ;;  %v4554_v44 = vor.u32 %v5212_v43, %v4553_v42  ;;  %v4745_v57 = vld [vmem:[%s6158_s22 + $0x688] sm:$0xf] }
 0x38a   : > { %2694 = vmatmul.bf16.vlgmr.msra.gmra.mxu2 %v6411_v1  ;;  %2708 = vmatmul.bf16.vlgmr.msra.gmra.mxu3 %v6417_v9  ;;  %v3939_v25 = vld [vmem:[%s6158_s22 + $0x60] sm:$0xf0]  ;;  %v5260_v58 = vld [vmem:[%s6158_s22 + $0x6a4] sm:$0xf0] }
 0x38b   : > { %2746 = vmatpush.bf16.msrb.mxu2 %v4518_v32  ;;  %2760 = vmatpush.bf16.msrb.mxu3 %v4774_v33  ;;  %v5119_v26 = vld [vmem:[%s6158_s22 + $0x244] sm:$0xf]  ;;  %v3942_v28 = vor.u32 %v5055_v24, %v3939_v25  ;;  %v4586_v32 = vor.u32 %v5220_v30, %v4585_v29  ;;  %v4841_v33 = vld [vmem:[%s6158_s22 + $0x748] sm:$0xf]  ;;  %v5224_v25 = vld [vmem:[%s6158_s22 + $0x58c] sm:$0xf] }
 0x38c   : > { %2718 = vmatpush.bf16.msrb.mxu0 %v4006_v55  ;;  %2733 = vmatpush.bf16.msrb.mxu1 %v4230_v18  ;;  %v4195_v27 = vld [vmem:[%s6158_s22 + $0x260] sm:$0xf0]  ;;  %v4842_v35 = vor.u32 %v5284_v34, %v4841_v33  ;;  %v5196_v55 = vld [vmem:[%s6158_s22 + $0x4a4] sm:$0xf0]  ;;  %v5288_v30 = vld [vmem:[%s6158_s22 + $0x78c] sm:$0xf] }
 0x38d   : > { %v4198_v31 = vor.u32 %v5119_v26, %v4195_v27  ;;  %v4163_v40 = vld [vmem:[%s6158_s22 + $0x220] sm:$0xf0]  ;;  %v4490_v56 = vor.u32 %v5196_v55, %v4489_v54  ;;  %v5188_v2 = vld [vmem:[%s6158_s22 + $0x464] sm:$0xf0]  ;;  %v4619_v26 = vld [vmem:[%s6158_s22 + $0x5a8] sm:$0xf0] }
 0x38e   : > { %v4166_v41 = vor.u32 %v5111_v38, %v4163_v40  ;;  %v4458_v4 = vor.u32 %v5188_v2, %v4457_v62  ;;  %v4425_v8 = vld [vmem:[%s6158_s22 + $0x408] sm:$0xf]  ;;  %v4622_v29 = vor.u32 %v5224_v25, %v4619_v26  ;;  %v5216_v33 = vld [vmem:[%s6158_s22 + $0x54c] sm:$0xf] }
 0x38f   : > { %2747 = vmatpush.bf16.msrb.mxu2 %v4486_v36  ;;  %2761 = vmatpush.bf16.msrb.mxu3 %v4742_v39  ;;  %v5047_v36 = vld [vmem:[%s6158_s22 + $0x4] sm:$0xf]  ;;  %v5180_v10 = vld [vmem:[%s6158_s22 + $0x424] sm:$0xf0]  ;;  %v4587_v34 = vld [vmem:[%s6158_s22 + $0x568] sm:$0xf0] }
 0x390   : > { %2719 = vmatpush.bf16.msrb.mxu0 %v3974_v14  ;;  %2734 = vmatpush.bf16.msrb.mxu1 %v4198_v31  ;;  %v3910_v39 = vor.u32 %v5047_v36, %v3907_v37  ;;  %v4426_v12 = vor.u32 %v5180_v10, %v4425_v8  ;;  %v4651_v14 = vld [vmem:[%s6158_s22 + $0x5e8] sm:$0xf0]  ;;  %v4681_v15 = vld [vmem:[%s6158_s22 + $0x608] sm:$0xf]  ;;  %v4590_v36 = vor.u32 %v5216_v33, %v4587_v34 }
 0x391   : > { %v5244_v18 = vld [vmem:[%s6158_s22 + $0x624] sm:$0xf0]  ;;  %v4875_v31 = vld [vmem:[%s6158_s22 + $0x7a8] sm:$0xf0] }
 0x392   : > { %v4682_v22 = vor.u32 %v5244_v18, %v4681_v15  ;;  %v5108_v37 = vld [vmem:[%s6158_s22 + $0x1e4] sm:$0xf0]  ;;  %v5280_v38 = vld [vmem:[%s6158_s22 + $0x74c] sm:$0xf] }
 0x393   : > { %2748 = vmatpush.bf16.msrb.mxu2 %v4454_v48  ;;  %2762 = vmatpush.bf16.msrb.mxu3 %v4710_v52  ;;  %v4521_v48 = vld [vmem:[%s6158_s22 + $0x4c8] sm:$0xf]  ;;  %v5272_v55 = vld [vmem:[%s6158_s22 + $0x70c] sm:$0xf] }
 0x394   : > { %2720 = vmatpush.bf16.msrb.mxu0 %v3942_v28  ;;  %2735 = vmatpush.bf16.msrb.mxu1 %v4166_v41  ;;  %v4522_v49 = vor.u32 %v5204_v50, %v4521_v48  ;;  %v4777_v52 = vld [vmem:[%s6158_s22 + $0x6c8] sm:$0xf]  ;;  %v5208_v48 = vld [vmem:[%s6158_s22 + $0x50c] sm:$0xf] }
 0x395   : > { %v4778_v53 = vor.u32 %v5268_v51, %v4777_v52  ;;  %v4393_v41 = vld [vmem:[%s6158_s22 + $0x3c8] sm:$0xf]  ;;  %v4555_v50 = vld [vmem:[%s6158_s22 + $0x528] sm:$0xf0] }
 0x396   : > { %v5172_v42 = vld [vmem:[%s6158_s22 + $0x3e4] sm:$0xf0]  ;;  %v4558_v54 = vor.u32 %v5208_v48, %v4555_v50  ;;  %v4523_v2 = vld [vmem:[%s6158_s22 + $0x4e8] sm:$0xf0] }
 0x397   : > { %2749 = vmatpush.bf16.msrb.mxu2 %v4422_v60  ;;  %2763 = vmatpush.bf16.msrb.mxu3 %v4678_v6  ;;  %v4746_v60 = vor.u32 %v5260_v58, %v4745_v57  ;;  %v5252_v6 = vld [vmem:[%s6158_s22 + $0x664] sm:$0xf0]  ;;  %v4394_v51 = vor.u32 %v5172_v42, %v4393_v41  ;;  %v5256_v18 = vld [vmem:[%s6158_s22 + $0x68c] sm:$0xf]  ;;  %v5237_v41 = vld [vmem:[%s6158_s22 + $0x5ec] sm:$0xf0] }
 0x398   : > { %2721 = vmatpush.bf16.msrb.mxu0 %v3910_v39  ;;  %v4843_v39 = vld [vmem:[%s6158_s22 + $0x768] sm:$0xf0]  ;;  %v4361_v58 = vld [vmem:[%s6158_s22 + $0x388] sm:$0xf] }
 0x399   : > { %v4846_v43 = vor.u32 %v5280_v38, %v4843_v39  ;;  %v5164_v59 = vld [vmem:[%s6158_s22 + $0x3a4] sm:$0xf0]  ;;  %v4459_v26 = vld [vmem:[%s6158_s22 + $0x468] sm:$0xf0] }
 0x39a   : > { %2750 = vmatmul.bf16.vlgmr.msrb.gmra.mxu2 %v6411_v1  ;;  %2764 = vmatmul.bf16.vlgmr.msrb.gmra.mxu3 %v6417_v9  ;;  %v5156_v8 = vld [vmem:[%s6158_s22 + $0x364] sm:$0xf0]  ;;  %v4427_v39 = vld [vmem:[%s6158_s22 + $0x428] sm:$0xf0] }
 0x39b   : > { %2798 = vmatpush.bf16.msra.mxu2 %v4650_v5  ;;  %2812 = vmatpush.bf16.msra.mxu3 %v4906_v13  ;;  %v4713_v5 = vld [vmem:[%s6158_s22 + $0x648] sm:$0xf]  ;;  %v5232_v13 = vld [vmem:[%s6158_s22 + $0x5cc] sm:$0xf] }
 0x39c   : > { %v4714_v61 = vor.u32 %v5252_v6, %v4713_v5  ;;  %v4654_v17 = vor.u32 %v5232_v13, %v4651_v14  ;;  %v5264_v6 = vld [vmem:[%s6158_s22 + $0x6cc] sm:$0xf]  ;;  %v4041_v13 = vld [vmem:[%s6158_s22 + $0x108] sm:$0xf] }
 0x39d   : > { %v4491_v14 = vld [vmem:[%s6158_s22 + $0x4a8] sm:$0xf0]  ;;  %v4009_v25 = vld [vmem:[%s6158_s22 + $0xc8] sm:$0xf] }
 0x39e   : > { %v5140_v33 = vld [vmem:[%s6158_s22 + $0x2e4] sm:$0xf0] }
 0x39f   : > { %2799 = vmatpush.bf16.msra.mxu2 %v4618_v20  ;;  %2813 = vmatpush.bf16.msra.mxu3 %v4874_v23  ;;  %v4907_v20 = vld [vmem:[%s6158_s22 + $0x7e8] sm:$0xf0]  ;;  %v5132_v48 = vld [vmem:[%s6158_s22 + $0x2a4] sm:$0xf0] }
 0x3a0   : > { %v4910_v21 = vor.u32 %v5296_v19, %v4907_v20  ;;  %v4747_v19 = vld [vmem:[%s6158_s22 + $0x6a8] sm:$0xf0]  ;;  %v4297_v20 = vld [vmem:[%s6158_s22 + $0x308] sm:$0xf] }
 0x3a3   : > { %2800 = vmatpush.bf16.msra.mxu2 %v4586_v32  ;;  %2814 = vmatpush.bf16.msra.mxu3 %v4842_v35  ;;  %v4878_v32 = vor.u32 %v5288_v30, %v4875_v31  ;;  %v4137_v35 = vld [vmem:[%s6158_s22 + $0x1c8] sm:$0xf]  ;;  %v5248_v30 = vld [vmem:[%s6158_s22 + $0x64c] sm:$0xf] }
 0x3a4   : > { %v4138_v46 = vor.u32 %v5108_v37, %v4137_v35  ;;  %v4715_v31 = vld [vmem:[%s6158_s22 + $0x668] sm:$0xf0]  ;;  %v3977_v35 = vld [vmem:[%s6158_s22 + $0x88] sm:$0xf] }
 0x3a5   : > { %v4718_v34 = vor.u32 %v5248_v30, %v4715_v31  ;;  %v5176_v37 = vld [vmem:[%s6158_s22 + $0x40c] sm:$0xf]  ;;  %v4817_v30 = vld [vmem:[%s6158_s22 + $0x710] sm:$0xf] }
 0x3a6   : > { %v5277_v31 = vld [vmem:[%s6158_s22 + $0x72c] sm:$0xf0] }
 0x3a7   : > { %2801 = vmatpush.bf16.msra.mxu2 %v4554_v44  ;;  %2815 = vmatpush.bf16.msra.mxu3 %v4810_v47  ;;  %v4105_v47 = vld [vmem:[%s6158_s22 + $0x188] sm:$0xf] }
 0x3ab   : > { %2802 = vmatpush.bf16.msra.mxu2 %v4522_v49  ;;  %2816 = vmatpush.bf16.msra.mxu3 %v4778_v53  ;;  %v5100_v53 = vld [vmem:[%s6158_s22 + $0x1a4] sm:$0xf0] }
 0x3ac   : > { %v4106_v62 = vor.u32 %v5100_v53, %v4105_v47  ;;  %v4683_v47 = vld [vmem:[%s6158_s22 + $0x628] sm:$0xf0] }
 0x3af   : > { %2803 = vmatpush.bf16.msra.mxu2 %v4490_v56  ;;  %2817 = vmatpush.bf16.msra.mxu3 %v4746_v60  ;;  %v4811_v56 = vld [vmem:[%s6158_s22 + $0x728] sm:$0xf0] }
 0x3b0   : > { %v4814_v60 = vor.u32 %v5272_v55, %v4811_v56  ;;  %v4625_v55 = vld [vmem:[%s6158_s22 + $0x590] sm:$0xf] }
 0x3b1   : > { %v5229_v56 = vld [vmem:[%s6158_s22 + $0x5ac] sm:$0xf0] }
 0x3b3   : > { %2804 = vmatpush.bf16.msra.mxu2 %v4458_v4  ;;  %2818 = vmatpush.bf16.msra.mxu3 %v4714_v61  ;;  %v5092_v4 = vld [vmem:[%s6158_s22 + $0x164] sm:$0xf0] }
 0x3b4   : > { %v4329_v61 = vld [vmem:[%s6158_s22 + $0x348] sm:$0xf] }
 0x3b5   : > { %v4330_v15 = vor.u32 %v5156_v8, %v4329_v61  ;;  %v4593_v61 = vld [vmem:[%s6158_s22 + $0x550] sm:$0xf] }
 0x3b6   : > { %v5221_v8 = vld [vmem:[%s6158_s22 + $0x56c] sm:$0xf0] }
 0x3b7   : > { %2805 = vmatpush.bf16.msra.mxu2 %v4426_v12  ;;  %2819 = vmatpush.bf16.msra.mxu3 %v4682_v22  ;;  %v5148_v22 = vld [vmem:[%s6158_s22 + $0x324] sm:$0xf0] }
 0x3ba   : > { %2806 = vmatmul.bf16.vlgmr.msra.gmra.mxu2 %v6411_v1  ;;  %2820 = vmatmul.bf16.vlgmr.msra.gmra.mxu3 %v6417_v9 }
 0x3bb   : > { %2854 = vmatpush.bf16.msrb.mxu2 %v4654_v17  ;;  %2868 = vmatpush.bf16.msrb.mxu3 %v4910_v21  ;;  %v4750_v21 = vor.u32 %v5256_v18, %v4747_v19  ;;  %v5168_v18 = vld [vmem:[%s6158_s22 + $0x3cc] sm:$0xf] }
 0x3bc   : > { %v4395_v19 = vld [vmem:[%s6158_s22 + $0x3e8] sm:$0xf0] }
 0x3bf   : > { %2855 = vmatpush.bf16.msrb.mxu2 %v4622_v29  ;;  %2869 = vmatpush.bf16.msrb.mxu3 %v4878_v32  ;;  %v4265_v32 = vld [vmem:[%s6158_s22 + $0x2c8] sm:$0xf] }
 0x3c0   : > { %v4266_v42 = vor.u32 %v5140_v33, %v4265_v32  ;;  %v5160_v32 = vld [vmem:[%s6158_s22 + $0x38c] sm:$0xf] }
 0x3c1   : > { %v4363_v33 = vld [vmem:[%s6158_s22 + $0x3a8] sm:$0xf0] }
 0x3c3   : > { %2856 = vmatpush.bf16.msrb.mxu2 %v4590_v36  ;;  %2870 = vmatpush.bf16.msrb.mxu3 %v4846_v43  ;;  %v5068_v36 = vld [vmem:[%s6158_s22 + $0xa4] sm:$0xf0] }
 0x3c4   : > { %v4233_v43 = vld [vmem:[%s6158_s22 + $0x288] sm:$0xf] }
 0x3c7   : > { %2857 = vmatpush.bf16.msrb.mxu2 %v4558_v54  ;;  %2871 = vmatpush.bf16.msrb.mxu3 %v4814_v60  ;;  %v3978_v54 = vor.u32 %v5068_v36, %v3977_v35  ;;  %v5060_v60 = vld [vmem:[%s6158_s22 + $0x64] sm:$0xf0]  ;;  %v5088_v36 = vld [vmem:[%s6158_s22 + $0x14c] sm:$0xf] }
 0x3fd   : > { %v1091_v63 = vpop.f32.mrf.mxu2  ;;  %v1105_v0 = vpop.f32.mrf.mxu3 }
 0x3fe   : > { %v1092_v11 = vadd.f32 %v1091_v63, %v1075_v3  ;;  %v1106_v16 = vadd.f32 %v1105_v0, %v1076_v7  ;;  %v4073_v63 = vld [vmem:[%s6158_s22 + $0x148] sm:$0xf]  ;;  %v5200_v0 = vld [vmem:[%s6158_s22 + $0x4cc] sm:$0xf] }
 0x3ff   : > { %v4526_v5 = vor.u32 %v5200_v0, %v4523_v2  ;;  %v4074_v12 = vor.u32 %v5092_v4, %v4073_v63  ;;  %v4626_v63 = vor.u32 %v5229_v56, %v4625_v55  ;;  %v5124_v0 = vld [vmem:[%s6158_s22 + $0x264] sm:$0xf0]  ;;  %v4881_v2 = vld [vmem:[%s6158_s22 + $0x790] sm:$0xf] }
 0x400   : > { %5447 = vtanh.f32 %v1092_v11  ;;  %v5192_v11 = vld [vmem:[%s6158_s22 + $0x48c] sm:$0xf]  ;;  %v3913_v4 = vld [vmem:[%s6158_s22 + $0x8] sm:$0xf]  ;;  %v4753_v55 = vld [vmem:[%s6158_s22 + $0x690] sm:$0xf] }
 0x401   : > { %5449 = vtanh.f32 %v1106_v16  ;;  %2858 = vmatpush.bf16.msrb.mxu2 %v4526_v5  ;;  %v5084_v16 = vld [vmem:[%s6158_s22 + $0x124] sm:$0xf0]  ;;  %v4494_v17 = vor.u32 %v5192_v11, %v4491_v14  ;;  %v4594_v14 = vor.u32 %v5221_v8, %v4593_v61  ;;  %v5261_v56 = vld [vmem:[%s6158_s22 + $0x6ac] sm:$0xf0]  ;;  %v5136_v61 = vld [vmem:[%s6158_s22 + $0x2cc] sm:$0xf] }
 0x402   : > { %v4169_v11 = vld [vmem:[%s6158_s22 + $0x208] sm:$0xf]  ;;  %v4267_v8 = vld [vmem:[%s6158_s22 + $0x2e8] sm:$0xf0] }
 0x405   : > { %v1093_v23 = vpop.f32.mrf.mxu2  ;;  %v1107_v24 = vpop.f32.mrf.mxu3  ;;  %2859 = vmatpush.bf16.msrb.mxu2 %v4494_v17  ;;  %v5285_v17 = vld [vmem:[%s6158_s22 + $0x76c] sm:$0xf0] }
 0x406   : > { %v1094_v28 = vadd.f32 %v1093_v23, %v1075_v3  ;;  %v1108_v27 = vadd.f32 %v1107_v24, %v1076_v7  ;;  %v5448_v40 = vpop.eup %5447  ;;  %v4362_v3 = vor.u32 %v5164_v59, %v4361_v58  ;;  %v4779_v7 = vld [vmem:[%s6158_s22 + $0x6e8] sm:$0xf0]  ;;  %v4042_v24 = vor.u32 %v5084_v16, %v4041_v13  ;;  %v3945_v59 = vld [vmem:[%s6158_s22 + $0x48] sm:$0xf]  ;;  %v4849_v16 = vld [vmem:[%s6158_s22 + $0x750] sm:$0xf] }
 0x407   : > { %v5450_v44 = vpop.eup %5449  ;;  %v4782_v10 = vor.u32 %v5264_v6, %v4779_v7  ;;  %v5184_v23 = vld [vmem:[%s6158_s22 + $0x44c] sm:$0xf]  ;;  %v4234_v58 = vor.u32 %v5132_v48, %v4233_v43  ;;  %v3946_v6 = vor.u32 %v5060_v60, %v3945_v59  ;;  %v5052_v7 = vld [vmem:[%s6158_s22 + $0x24] sm:$0xf0]  ;;  %v5269_v43 = vld [vmem:[%s6158_s22 + $0x6ec] sm:$0xf0]  ;;  %v4754_v60 = vor.u32 %v5261_v56, %v4753_v55 }
 0x408   : > { %5451 = vtanh.f32 %v1094_v28  ;;  %v4298_v28 = vor.u32 %v5148_v22, %v4297_v20  ;;  %v4462_v29 = vor.u32 %v5184_v23, %v4459_v26  ;;  %v5104_v13 = vld [vmem:[%s6158_s22 + $0x1cc] sm:$0xf]  ;;  %v4850_v20 = vor.u32 %v5285_v17, %v4849_v16  ;;  %v5213_v26 = vld [vmem:[%s6158_s22 + $0x52c] sm:$0xf0]  ;;  %v5233_v16 = vld [vmem:[%s6158_s22 + $0x5d4] sm:$0xf] }
 0x409   : > { %5453 = vtanh.f32 %v1108_v27  ;;  %2872 = vmatpush.bf16.msrb.mxu3 %v4782_v10  ;;  %v5076_v27 = vld [vmem:[%s6158_s22 + $0xe4] sm:$0xf0]  ;;  %v3914_v22 = vor.u32 %v5052_v7, %v3913_v4  ;;  %v4299_v59 = vld [vmem:[%s6158_s22 + $0x328] sm:$0xf0]  ;;  %v5253_v7 = vld [vmem:[%s6158_s22 + $0x66c] sm:$0xf0] }
 0x40a   : > { %2860 = vmatpush.bf16.msrb.mxu2 %v4462_v29  ;;  %v4010_v38 = vor.u32 %v5076_v27, %v4009_v25  ;;  %v4561_v25 = vld [vmem:[%s6158_s22 + $0x510] sm:$0xf]  ;;  %v4107_v27 = vld [vmem:[%s6158_s22 + $0x1a8] sm:$0xf0]  ;;  %v4659_v17 = vld [vmem:[%s6158_s22 + $0x5f0] sm:$0xf0] }
 0x40b   : > { %v4562_v29 = vor.u32 %v5213_v26, %v4561_v25  ;;  %v4011_v4 = vld [vmem:[%s6158_s22 + $0xe8] sm:$0xf0]  ;;  %v5297_v26 = vld [vmem:[%s6158_s22 + $0x7d4] sm:$0xf]  ;;  %v4401_v55 = vld [vmem:[%s6158_s22 + $0x3d0] sm:$0xf] }
 0x40c   : > { %v5173_v56 = vld [vmem:[%s6158_s22 + $0x3ec] sm:$0xf0] }
 0x40d   : > { %2873 = vmatpush.bf16.msrb.mxu3 %v4750_v21 }
 0x40e   : > { %v5452_v45 = vpop.eup %5451 }
 0x40f   : > { %v5454_v49 = vpop.eup %5453  ;;  %v6487_v52 = vpack.c.bf16 %v5452_v45, %v5448_v40  ;;  %v4657_v40 = vld [vmem:[%s6158_s22 + $0x5d0] sm:$0xf] }
 0x410   : > { %v6492_v57 = vpack.c.bf16 %v5454_v49, %v5450_v44  ;;  %v4430_v44 = vor.u32 %v5176_v37, %v4427_v39  ;;  %v4658_v45 = vor.u32 %v5237_v41, %v4657_v40  ;;  %v4913_v49 = vld [vmem:[%s6158_s22 + $0x7d0] sm:$0xf]  ;;  %v4366_v39 = vor.u32 %v5160_v32, %v4363_v33  ;;  %v4075_v40 = vld [vmem:[%s6158_s22 + $0x168] sm:$0xf0] }
 0x411   : > { %2666 = vmatmul.bf16.vlgmr.msra.gmra.mxu0 %v6487_v52  ;;  %2874 = vmatpush.bf16.msrb.mxu3 %v4718_v34  ;;  %v4818_v34 = vor.u32 %v5277_v31, %v4817_v30  ;;  %v4529_v37 = vld [vmem:[%s6158_s22 + $0x4d0] sm:$0xf]  ;;  %v4078_v48 = vor.u32 %v5088_v36, %v4075_v40  ;;  %v5225_v30 = vld [vmem:[%s6158_s22 + $0x594] sm:$0xf]  ;;  %v5056_v33 = vld [vmem:[%s6158_s22 + $0x4c] sm:$0xf] }
 0x412   : > { %2680 = vmatmul.bf16.vlgmr.msra.gmra.mxu1 %v6492_v57  ;;  %2770 = vmatpush.bf16.msra.mxu0 %v4138_v46  ;;  %v5240_v46 = vld [vmem:[%s6158_s22 + $0x60c] sm:$0xf]  ;;  %v4627_v31 = vld [vmem:[%s6158_s22 + $0x5b0] sm:$0xf0] }
 0x413   : > { %2784 = vmatpush.bf16.msra.mxu1 %v4394_v51  ;;  %v4686_v50 = vor.u32 %v5240_v46, %v4683_v47  ;;  %v5301_v51 = vld [vmem:[%s6158_s22 + $0x7ec] sm:$0xf0]  ;;  %2861 = vmatpush.bf16.msrb.mxu2 %v4430_v44  ;;  %v5152_v44 = vld [vmem:[%s6158_s22 + $0x34c] sm:$0xf] }
 0x414   : > { %v4914_v53 = vor.u32 %v5301_v51, %v4913_v49  ;;  %v4497_v47 = vld [vmem:[%s6158_s22 + $0x490] sm:$0xf]  ;;  %v4203_v36 = vld [vmem:[%s6158_s22 + $0x268] sm:$0xf0] }
 0x415   : > { %2875 = vmatpush.bf16.msrb.mxu3 %v4686_v50  ;;  %v5080_v50 = vld [vmem:[%s6158_s22 + $0x10c] sm:$0xf]  ;;  %v5197_v49 = vld [vmem:[%s6158_s22 + $0x4ac] sm:$0xf0] }
 0x416   : > { %2771 = vmatpush.bf16.msra.mxu0 %v4106_v62  ;;  %v4201_v62 = vld [vmem:[%s6158_s22 + $0x248] sm:$0xf]  ;;  %2862 = vmatmul.bf16.vlgmr.msrb.gmra.mxu2 %v6411_v1  ;;  %v5048_v40 = vld [vmem:[%s6158_s22 + $0xc] sm:$0xf] }
 0x417   : > { %2785 = vmatpush.bf16.msra.mxu1 %v4362_v3  ;;  %2910 = vmatpush.bf16.msra.mxu2 %v4658_v45  ;;  %v5293_v3 = vld [vmem:[%s6158_s22 + $0x7ac] sm:$0xf0]  ;;  %v4202_v10 = vor.u32 %v5124_v0, %v4201_v62  ;;  %v4331_v45 = vld [vmem:[%s6158_s22 + $0x368] sm:$0xf0] }
 0x418   : > { %v4882_v5 = vor.u32 %v5293_v3, %v4881_v2  ;;  %2876 = vmatmul.bf16.vlgmr.msrb.gmra.mxu3 %v6417_v9  ;;  %v4334_v51 = vor.u32 %v5152_v44, %v4331_v45  ;;  %v4465_v62 = vld [vmem:[%s6158_s22 + $0x450] sm:$0xf]  ;;  %v5072_v0 = vld [vmem:[%s6158_s22 + $0xcc] sm:$0xf]  ;;  %v5217_v44 = vld [vmem:[%s6158_s22 + $0x554] sm:$0xf] }
 0x419   : > { %2924 = vmatpush.bf16.msra.mxu3 %v4914_v53  ;;  %v4043_v53 = vld [vmem:[%s6158_s22 + $0x128] sm:$0xf0]  ;;  %v5189_v2 = vld [vmem:[%s6158_s22 + $0x46c] sm:$0xf0]  ;;  %v4595_v45 = vld [vmem:[%s6158_s22 + $0x570] sm:$0xf0] }
 0x41a   : > { %2772 = vmatpush.bf16.msra.mxu0 %v4074_v12  ;;  %v5116_v12 = vld [vmem:[%s6158_s22 + $0x224] sm:$0xf0] }
 0x41b   : > { %2786 = vmatpush.bf16.msra.mxu1 %v4330_v15  ;;  %2911 = vmatpush.bf16.msra.mxu2 %v4626_v63  ;;  %v4139_v15 = vld [vmem:[%s6158_s22 + $0x1e8] sm:$0xf0]  ;;  %v4170_v21 = vor.u32 %v5116_v12, %v4169_v11  ;;  %v4046_v63 = vor.u32 %v5080_v50, %v4043_v53  ;;  %v4145_v50 = vld [vmem:[%s6158_s22 + $0x1d0] sm:$0xf]  ;;  %v5281_v53 = vld [vmem:[%s6158_s22 + $0x754] sm:$0xf] }
 0x41c   : > { %v4142_v23 = vor.u32 %v5104_v13, %v4139_v15  ;;  %v5064_v11 = vld [vmem:[%s6158_s22 + $0x8c] sm:$0xf]  ;;  %v4433_v13 = vld [vmem:[%s6158_s22 + $0x410] sm:$0xf] }
 0x41d   : > { %2925 = vmatpush.bf16.msra.mxu3 %v4882_v5  ;;  %v4466_v5 = vor.u32 %v5189_v2, %v4465_v62  ;;  %v3979_v12 = vld [vmem:[%s6158_s22 + $0xa8] sm:$0xf0]  ;;  %v5181_v15 = vld [vmem:[%s6158_s22 + $0x42c] sm:$0xf0]  ;;  %v4563_v2 = vld [vmem:[%s6158_s22 + $0x530] sm:$0xf0] }
 0x41e   : > { %2773 = vmatpush.bf16.msra.mxu0 %v4042_v24  ;;  %v5096_v24 = vld [vmem:[%s6158_s22 + $0x18c] sm:$0xf] }
 0x41f   : > { %2787 = vmatpush.bf16.msra.mxu1 %v4298_v28  ;;  %2912 = vmatpush.bf16.msra.mxu2 %v4594_v14  ;;  %v4398_v28 = vor.u32 %v5168_v18, %v4395_v19  ;;  %v4110_v35 = vor.u32 %v5096_v24, %v4107_v27  ;;  %v4014_v14 = vor.u32 %v5072_v0, %v4011_v4  ;;  %v5128_v19 = vld [vmem:[%s6158_s22 + $0x28c] sm:$0xf]  ;;  %v5209_v0 = vld [vmem:[%s6158_s22 + $0x514] sm:$0xf]  ;;  %v5101_v4 = vld [vmem:[%s6158_s22 + $0x1ac] sm:$0xf0] }
 0x420   : > { %v4270_v18 = vor.u32 %v5136_v61, %v4267_v8  ;;  %v4662_v24 = vor.u32 %v5233_v16, %v4659_v17  ;;  %v4369_v61 = vld [vmem:[%s6158_s22 + $0x390] sm:$0xf] }
 0x421   : > { %2722 = vmatmul.bf16.vlgmr.msrb.gmra.mxu0 %v6487_v52  ;;  %2926 = vmatpush.bf16.msra.mxu3 %v4850_v20  ;;  %v4434_v20 = vor.u32 %v5181_v15, %v4433_v13  ;;  %v5165_v8 = vld [vmem:[%s6158_s22 + $0x3ac] sm:$0xf0]  ;;  %v5201_v13 = vld [vmem:[%s6158_s22 + $0x4d4] sm:$0xf] }
 0x422   : > { %2736 = vmatmul.bf16.vlgmr.msrb.gmra.mxu1 %v6492_v57  ;;  %2774 = vmatpush.bf16.msra.mxu0 %v4010_v38  ;;  %v5205_v38 = vld [vmem:[%s6158_s22 + $0x4ec] sm:$0xf0]  ;;  %v4370_v15 = vor.u32 %v5165_v8, %v4369_v61 }
 0x423   : > { %2788 = vmatpush.bf16.msra.mxu1 %v4266_v42  ;;  %2913 = vmatpush.bf16.msra.mxu2 %v4562_v29  ;;  %v4530_v41 = vor.u32 %v5205_v38, %v4529_v37  ;;  %v4785_v42 = vld [vmem:[%s6158_s22 + $0x6d0] sm:$0xf]  ;;  %v3982_v29 = vor.u32 %v5064_v11, %v3979_v12  ;;  %v4630_v37 = vor.u32 %v5225_v30, %v4627_v31  ;;  %v5289_v38 = vld [vmem:[%s6158_s22 + $0x794] sm:$0xf] }
 0x424   : > { %v4786_v46 = vor.u32 %v5269_v43, %v4785_v42  ;;  %v3915_v43 = vld [vmem:[%s6158_s22 + $0x28] sm:$0xf0]  ;;  %v4081_v12 = vld [vmem:[%s6158_s22 + $0x150] sm:$0xf]  ;;  %v5257_v30 = vld [vmem:[%s6158_s22 + $0x694] sm:$0xf] }
 0x425   : > { %2927 = vmatpush.bf16.msra.mxu3 %v4818_v34  ;;  %v3947_v34 = vld [vmem:[%s6158_s22 + $0x68] sm:$0xf0]  ;;  %v5093_v16 = vld [vmem:[%s6158_s22 + $0x16c] sm:$0xf0]  ;;  %v4755_v31 = vld [vmem:[%s6158_s22 + $0x6b0] sm:$0xf0] }
 0x426   : > { %2775 = vmatpush.bf16.msra.mxu0 %v3978_v54  ;;  %v4498_v54 = vor.u32 %v5197_v49, %v4497_v47  ;;  %v3950_v42 = vor.u32 %v5056_v33, %v3947_v34  ;;  %v5112_v47 = vld [vmem:[%s6158_s22 + $0x20c] sm:$0xf]  ;;  %v5109_v49 = vld [vmem:[%s6158_s22 + $0x1ec] sm:$0xf0]  ;;  %v4758_v34 = vor.u32 %v5257_v30, %v4755_v31  ;;  %v5169_v30 = vld [vmem:[%s6158_s22 + $0x3d4] sm:$0xf] }
 0x427   : > { %2789 = vmatpush.bf16.msra.mxu1 %v4234_v58  ;;  %2914 = vmatpush.bf16.msra.mxu2 %v4530_v41  ;;  %v5144_v58 = vld [vmem:[%s6158_s22 + $0x30c] sm:$0xf]  ;;  %v4146_v62 = vor.u32 %v5109_v49, %v4145_v50  ;;  %v5149_v33 = vld [vmem:[%s6158_s22 + $0x32c] sm:$0xf0]  ;;  %v5177_v50 = vld [vmem:[%s6158_s22 + $0x414] sm:$0xf] }
 0x428   : > { %v4302_v3 = vor.u32 %v5144_v58, %v4299_v59  ;;  %v3918_v59 = vor.u32 %v5048_v40, %v3915_v43  ;;  %v5077_v40 = vld [vmem:[%s6158_s22 + $0xec] sm:$0xf0]  ;;  %v4723_v43 = vld [vmem:[%s6158_s22 + $0x670] sm:$0xf0] }
 0x429   : > { %2928 = vmatpush.bf16.msra.mxu3 %v4786_v46  ;;  %v3953_v8 = vld [vmem:[%s6158_s22 + $0x50] sm:$0xf]  ;;  %v4403_v31 = vld [vmem:[%s6158_s22 + $0x3f0] sm:$0xf0] }
 0x42a   : > { %2776 = vmatpush.bf16.msra.mxu0 %v3946_v6  ;;  %v4721_v6 = vld [vmem:[%s6158_s22 + $0x650] sm:$0xf] }
 0x42b   : > { %2790 = vmatpush.bf16.msra.mxu1 %v4202_v10  ;;  %2915 = vmatpush.bf16.msra.mxu2 %v4498_v54  ;;  %v4722_v10 = vor.u32 %v5253_v7, %v4721_v6  ;;  %v4851_v54 = vld [vmem:[%s6158_s22 + $0x770] sm:$0xf0] }
 0x42c   : > { %v4854_v58 = vor.u32 %v5281_v53, %v4851_v54  ;;  %v5273_v6 = vld [vmem:[%s6158_s22 + $0x714] sm:$0xf]  ;;  %v4665_v53 = vld [vmem:[%s6158_s22 + $0x5d8] sm:$0xf] }
 0x42d   : > { %2929 = vmatpush.bf16.msra.mxu3 %v4754_v60  ;;  %v4819_v7 = vld [vmem:[%s6158_s22 + $0x730] sm:$0xf0]  ;;  %v5238_v54 = vld [vmem:[%s6158_s22 + $0x5f4] sm:$0xf0] }
 0x42e   : > { %2777 = vmatpush.bf16.msra.mxu0 %v3914_v22  ;;  %v4689_v22 = vld [vmem:[%s6158_s22 + $0x610] sm:$0xf] }
 0x42f   : > { %2791 = vmatpush.bf16.msra.mxu1 %v4170_v21  ;;  %2916 = vmatpush.bf16.msra.mxu2 %v4466_v5  ;;  %v5245_v21 = vld [vmem:[%s6158_s22 + $0x62c] sm:$0xf0]  ;;  %v4566_v5 = vor.u32 %v5209_v0, %v4563_v2  ;;  %v4921_v2 = vld [vmem:[%s6158_s22 + $0x7d8] sm:$0xf] }
 0x430   : > { %v4690_v25 = vor.u32 %v5245_v21, %v4689_v22  ;;  %v5157_v22 = vld [vmem:[%s6158_s22 + $0x36c] sm:$0xf0] }
 0x431   : > { %2778 = vmatmul.bf16.vlgmr.msra.gmra.mxu0 %v6487_v52  ;;  %2930 = vmatpush.bf16.msra.mxu3 %v4722_v10  ;;  %v4822_v10 = vor.u32 %v5273_v6, %v4819_v7  ;;  %v4633_v6 = vld [vmem:[%s6158_s22 + $0x598] sm:$0xf] }
 0x432   : > { %2826 = vmatpush.bf16.msrb.mxu0 %v4142_v23  ;;  %2792 = vmatmul.bf16.vlgmr.msra.gmra.mxu1 %v6492_v57  ;;  %v4235_v23 = vld [vmem:[%s6158_s22 + $0x2a8] sm:$0xf0]  ;;  %v5230_v7 = vld [vmem:[%s6158_s22 + $0x5b4] sm:$0xf0] }
 0x433   : > { %2840 = vmatpush.bf16.msrb.mxu1 %v4398_v28  ;;  %v4915_v28 = vld [vmem:[%s6158_s22 + $0x7f0] sm:$0xf0]  ;;  %v4238_v32 = vor.u32 %v5128_v19, %v4235_v23  ;;  %2917 = vmatpush.bf16.msra.mxu2 %v4434_v20  ;;  %v4337_v20 = vld [vmem:[%s6158_s22 + $0x350] sm:$0xf] }
 0x434   : > { %v4918_v27 = vor.u32 %v5297_v26, %v4915_v28  ;;  %v4787_v19 = vld [vmem:[%s6158_s22 + $0x6f0] sm:$0xf0]  ;;  %v4338_v28 = vor.u32 %v5157_v22, %v4337_v20  ;;  %v4601_v20 = vld [vmem:[%s6158_s22 + $0x558] sm:$0xf] }
 0x435   : > { %2931 = vmatpush.bf16.msra.mxu3 %v4690_v25  ;;  %v5193_v23 = vld [vmem:[%s6158_s22 + $0x494] sm:$0xf]  ;;  %v4049_v25 = vld [vmem:[%s6158_s22 + $0x110] sm:$0xf]  ;;  %v5222_v22 = vld [vmem:[%s6158_s22 + $0x574] sm:$0xf0] }
 0x436   : > { %2827 = vmatpush.bf16.msrb.mxu0 %v4110_v35  ;;  %v5120_v35 = vld [vmem:[%s6158_s22 + $0x24c] sm:$0xf]  ;;  %2918 = vmatmul.bf16.vlgmr.msra.gmra.mxu2 %v6411_v1  ;;  %v4499_v26 = vld [vmem:[%s6158_s22 + $0x4b0] sm:$0xf0] }
 0x437   : > { %2841 = vmatpush.bf16.msrb.mxu1 %v4366_v39  ;;  %2966 = vmatpush.bf16.msrb.mxu2 %v4662_v24  ;;  %v4883_v39 = vld [vmem:[%s6158_s22 + $0x7b0] sm:$0xf0]  ;;  %v4206_v46 = vor.u32 %v5120_v35, %v4203_v36  ;;  %v4082_v24 = vor.u32 %v5093_v16, %v4081_v12  ;;  %v5125_v12 = vld [vmem:[%s6158_s22 + $0x26c] sm:$0xf0] }
 0x438   : > { %v4886_v41 = vor.u32 %v5289_v38, %v4883_v39  ;;  %2932 = vmatmul.bf16.vlgmr.msra.gmra.mxu3 %v6417_v9  ;;  %v5185_v35 = vld [vmem:[%s6158_s22 + $0x454] sm:$0xf]  ;;  %v3921_v16 = vld [vmem:[%s6158_s22 + $0x10] sm:$0xf] }
 0x439   : > { %2980 = vmatpush.bf16.msrb.mxu3 %v4918_v27  ;;  %v5085_v27 = vld [vmem:[%s6158_s22 + $0x12c] sm:$0xf0]  ;;  %v4467_v38 = vld [vmem:[%s6158_s22 + $0x470] sm:$0xf0] }
 0x43a   : > { %2828 = vmatpush.bf16.msrb.mxu0 %v4078_v48  ;;  %v4171_v48 = vld [vmem:[%s6158_s22 + $0x228] sm:$0xf0]  ;;  %v4050_v36 = vor.u32 %v5085_v27, %v4049_v25  ;;  %v5105_v25 = vld [vmem:[%s6158_s22 + $0x1d4] sm:$0xf]  ;;  %v4857_v27 = vld [vmem:[%s6158_s22 + $0x758] sm:$0xf] }
 0x43b   : > { %2842 = vmatpush.bf16.msrb.mxu1 %v4334_v51  ;;  %2967 = vmatpush.bf16.msrb.mxu2 %v4630_v37  ;;  %v4598_v51 = vor.u32 %v5217_v44, %v4595_v45  ;;  %v4174_v60 = vor.u32 %v5112_v47, %v4171_v48  ;;  %v4017_v37 = vld [vmem:[%s6158_s22 + $0xd0] sm:$0xf] }
 0x43c   : > { %v4273_v44 = vld [vmem:[%s6158_s22 + $0x2d0] sm:$0xf]  ;;  %v4018_v49 = vor.u32 %v5077_v40, %v4017_v37  ;;  %v4569_v37 = vld [vmem:[%s6158_s22 + $0x518] sm:$0xf]  ;;  %v4115_v40 = vld [vmem:[%s6158_s22 + $0x1b0] sm:$0xf0] }
 0x43d   : > { %2981 = vmatpush.bf16.msrb.mxu3 %v4886_v41  ;;  %v4470_v41 = vor.u32 %v5185_v35, %v4467_v38  ;;  %v5141_v45 = vld [vmem:[%s6158_s22 + $0x2ec] sm:$0xf0]  ;;  %v5214_v38 = vld [vmem:[%s6158_s22 + $0x534] sm:$0xf0] }
 0x43e   : > { %2829 = vmatpush.bf16.msrb.mxu0 %v4046_v63  ;;  %v4113_v63 = vld [vmem:[%s6158_s22 + $0x190] sm:$0xf] }
 0x43f   : > { %2843 = vmatpush.bf16.msrb.mxu1 %v4302_v3  ;;  %v4402_v3 = vor.u32 %v5173_v56, %v4401_v55  ;;  %2968 = vmatpush.bf16.msrb.mxu2 %v4598_v51  ;;  %v4114_v11 = vor.u32 %v5101_v4, %v4113_v63  ;;  %v3985_v47 = vld [vmem:[%s6158_s22 + $0x90] sm:$0xf]  ;;  %v4435_v51 = vld [vmem:[%s6158_s22 + $0x430] sm:$0xf0]  ;;  %v4274_v55 = vor.u32 %v5141_v45, %v4273_v44 }
 0x440   : > { %v5069_v48 = vld [vmem:[%s6158_s22 + $0xac] sm:$0xf0]  ;;  %v4666_v63 = vor.u32 %v5238_v54, %v4665_v53  ;;  %v5161_v44 = vld [vmem:[%s6158_s22 + $0x394] sm:$0xf] }
 0x441   : > { %2982 = vmatpush.bf16.msrb.mxu3 %v4854_v58  ;;  %v4241_v56 = vld [vmem:[%s6158_s22 + $0x290] sm:$0xf]  ;;  %v4438_v58 = vor.u32 %v5177_v50, %v4435_v51  ;;  %v4371_v45 = vld [vmem:[%s6158_s22 + $0x3b0] sm:$0xf0]  ;;  %v4537_v50 = vld [vmem:[%s6158_s22 + $0x4d8] sm:$0xf] }
 0x442   : > { %2830 = vmatpush.bf16.msrb.mxu0 %v4014_v14  ;;  %v4531_v14 = vld [vmem:[%s6158_s22 + $0x4f0] sm:$0xf0]  ;;  %v4374_v51 = vor.u32 %v5161_v44, %v4371_v45 }
 0x443   : > { %2844 = vmatpush.bf16.msrb.mxu1 %v4270_v18  ;;  %2969 = vmatpush.bf16.msrb.mxu2 %v4566_v5  ;;  %v4534_v17 = vor.u32 %v5201_v13, %v4531_v14  ;;  %v5265_v18 = vld [vmem:[%s6158_s22 + $0x6d4] sm:$0xf]  ;;  %v3986_v5 = vor.u32 %v5069_v48, %v3985_v47  ;;  %v4634_v13 = vor.u32 %v5230_v7, %v4633_v6  ;;  %v4889_v14 = vld [vmem:[%s6158_s22 + $0x798] sm:$0xf] }
 0x444   : > { %v4790_v21 = vor.u32 %v5265_v18, %v4787_v19  ;;  %v5053_v19 = vld [vmem:[%s6158_s22 + $0x2c] sm:$0xf0]  ;;  %v5089_v48 = vld [vmem:[%s6158_s22 + $0x154] sm:$0xf]  ;;  %v4761_v6 = vld [vmem:[%s6158_s22 + $0x698] sm:$0xf] }
 0x445   : > { %2983 = vmatpush.bf16.msrb.mxu3 %v4822_v10  ;;  %v5061_v10 = vld [vmem:[%s6158_s22 + $0x6c] sm:$0xf0]  ;;  %v4083_v53 = vld [vmem:[%s6158_s22 + $0x170] sm:$0xf0]  ;;  %v5262_v7 = vld [vmem:[%s6158_s22 + $0x6b4] sm:$0xf0] }
 0x446   : > { %2831 = vmatpush.bf16.msrb.mxu0 %v3982_v29  ;;  %v4502_v29 = vor.u32 %v5193_v23, %v4499_v26  ;;  %v3954_v18 = vor.u32 %v5061_v10, %v3953_v8  ;;  %v4177_v23 = vld [vmem:[%s6158_s22 + $0x210] sm:$0xf]  ;;  %v4147_v26 = vld [vmem:[%s6158_s22 + $0x1f0] sm:$0xf0]  ;;  %v4762_v10 = vor.u32 %v5262_v7, %v4761_v6  ;;  %v4409_v6 = vld [vmem:[%s6158_s22 + $0x3d8] sm:$0xf] }
 0x447   : > { %2845 = vmatpush.bf16.msrb.mxu1 %v4238_v32  ;;  %2970 = vmatpush.bf16.msrb.mxu2 %v4534_v17  ;;  %v4305_v32 = vld [vmem:[%s6158_s22 + $0x310] sm:$0xf]  ;;  %v4150_v35 = vor.u32 %v5105_v25, %v4147_v26  ;;  %v4307_v8 = vld [vmem:[%s6158_s22 + $0x330] sm:$0xf0]  ;;  %v5174_v7 = vld [vmem:[%s6158_s22 + $0x3f4] sm:$0xf0] }
 0x448   : > { %v4306_v39 = vor.u32 %v5149_v33, %v4305_v32  ;;  %v3922_v33 = vor.u32 %v5053_v19, %v3921_v16  ;;  %v4019_v16 = vld [vmem:[%s6158_s22 + $0xf0] sm:$0xf0]  ;;  %v5254_v19 = vld [vmem:[%s6158_s22 + $0x674] sm:$0xf0] }
 0x449   : > { %2984 = vmatpush.bf16.msrb.mxu3 %v4790_v21  ;;  %v5129_v26 = vld [vmem:[%s6158_s22 + $0x294] sm:$0xf] }
 0x44a   : > { %2832 = vmatpush.bf16.msrb.mxu0 %v3950_v42  ;;  %v5249_v42 = vld [vmem:[%s6158_s22 + $0x654] sm:$0xf] }
 0x44b   : > { %2846 = vmatpush.bf16.msrb.mxu1 %v4206_v46  ;;  %2971 = vmatpush.bf16.msrb.mxu2 %v4502_v29  ;;  %v4726_v46 = vor.u32 %v5249_v42, %v4723_v43  ;;  %v5286_v29 = vld [vmem:[%s6158_s22 + $0x774] sm:$0xf0]  ;;  %v5057_v45 = vld [vmem:[%s6158_s22 + $0x54] sm:$0xf] }
 0x44c   : > { %v4858_v32 = vor.u32 %v5286_v29, %v4857_v27  ;;  %v4825_v42 = vld [vmem:[%s6158_s22 + $0x718] sm:$0xf] }
 0x44d   : > { %2985 = vmatpush.bf16.msrb.mxu3 %v4758_v34  ;;  %v5278_v43 = vld [vmem:[%s6158_s22 + $0x734] sm:$0xf0] }
 0x44e   : > { %2833 = vmatpush.bf16.msrb.mxu0 %v3918_v59  ;;  %v5241_v59 = vld [vmem:[%s6158_s22 + $0x614] sm:$0xf]  ;;  %v4441_v27 = vld [vmem:[%s6158_s22 + $0x418] sm:$0xf] }
 0x44f   : > { %2847 = vmatpush.bf16.msrb.mxu1 %v4174_v60  ;;  %2972 = vmatpush.bf16.msrb.mxu2 %v4470_v41  ;;  %v4691_v60 = vld [vmem:[%s6158_s22 + $0x630] sm:$0xf0]  ;;  %v4570_v41 = vor.u32 %v5214_v38, %v4569_v37  ;;  %v5182_v29 = vld [vmem:[%s6158_s22 + $0x434] sm:$0xf0]  ;;  %v5298_v37 = vld [vmem:[%s6158_s22 + $0x7dc] sm:$0xf] }
 0x450   : > { %v4694_v0 = vor.u32 %v5241_v59, %v4691_v60  ;;  %v4339_v59 = vld [vmem:[%s6158_s22 + $0x370] sm:$0xf0]  ;;  %v4923_v38 = vld [vmem:[%s6158_s22 + $0x7f8] sm:$0xf0] }
 0x451   : > { %2834 = vmatmul.bf16.vlgmr.msrb.gmra.mxu0 %v6487_v52  ;;  %2986 = vmatpush.bf16.msrb.mxu3 %v4726_v46  ;;  %v4826_v46 = vor.u32 %v5278_v43, %v4825_v42  ;;  %v5226_v42 = vld [vmem:[%s6158_s22 + $0x59c] sm:$0xf] }
 0x452   : > { %2882 = vmatpush.bf16.msra.mxu0 %v4146_v62  ;;  %2848 = vmatmul.bf16.vlgmr.msrb.gmra.mxu1 %v6492_v57  ;;  %v5133_v62 = vld [vmem:[%s6158_s22 + $0x2ac] sm:$0xf0]  ;;  %v4635_v43 = vld [vmem:[%s6158_s22 + $0x5b8] sm:$0xf0] }
 0x453   : > { %2896 = vmatpush.bf16.msra.mxu1 %v4402_v3  ;;  %v5302_v3 = vld [vmem:[%s6158_s22 + $0x7f4] sm:$0xf0]  ;;  %v4242_v61 = vor.u32 %v5133_v62, %v4241_v56  ;;  %2973 = vmatpush.bf16.msrb.mxu2 %v4438_v58  ;;  %v5153_v58 = vld [vmem:[%s6158_s22 + $0x354] sm:$0xf] }
 0x454   : > { %v4922_v4 = vor.u32 %v5302_v3, %v4921_v2  ;;  %v5270_v56 = vld [vmem:[%s6158_s22 + $0x6f4] sm:$0xf0]  ;;  %v4342_v3 = vor.u32 %v5153_v58, %v4339_v59  ;;  %v5218_v58 = vld [vmem:[%s6158_s22 + $0x55c] sm:$0xf] }
 0x455   : > { %2987 = vmatpush.bf16.msrb.mxu3 %v4694_v0  ;;  %v4505_v62 = vld [vmem:[%s6158_s22 + $0x498] sm:$0xf]  ;;  %v5081_v0 = vld [vmem:[%s6158_s22 + $0x114] sm:$0xf]  ;;  %v4603_v59 = vld [vmem:[%s6158_s22 + $0x578] sm:$0xf0] }
 0x456   : > { %2883 = vmatpush.bf16.msra.mxu0 %v4114_v11  ;;  %v4209_v11 = vld [vmem:[%s6158_s22 + $0x250] sm:$0xf]  ;;  %2974 = vmatmul.bf16.vlgmr.msrb.gmra.mxu2 %v6411_v1  ;;  %v5198_v2 = vld [vmem:[%s6158_s22 + $0x4b4] sm:$0xf0] }
 0x457   : > { %2897 = vmatpush.bf16.msra.mxu1 %v4370_v15  ;;  %3022 = vmatpush.bf16.msra.mxu2 %v4666_v63  ;;  %v5294_v15 = vld [vmem:[%s6158_s22 + $0x7b4] sm:$0xf0]  ;;  %v4210_v21 = vor.u32 %v5125_v12, %v4209_v11  ;;  %v4086_v63 = vor.u32 %v5089_v48, %v4083_v53  ;;  %v5073_v12 = vld [vmem:[%s6158_s22 + $0xd4] sm:$0xf] }
 0x458   : > { %v4890_v17 = vor.u32 %v5294_v15, %v4889_v14  ;;  %2988 = vmatmul.bf16.vlgmr.msrb.gmra.mxu3 %v6417_v9  ;;  %v5190_v14 = vld [vmem:[%s6158_s22 + $0x474] sm:$0xf0]  ;;  %v4022_v25 = vor.u32 %v5073_v12, %v4019_v16  ;;  %v4211_v48 = vld [vmem:[%s6158_s22 + $0x270] sm:$0xf0]  ;;  %v4571_v16 = vld [vmem:[%s6158_s22 + $0x538] sm:$0xf0] }
 0x459   : > { %3036 = vmatpush.bf16.msra.mxu3 %v4922_v4  ;;  %v4051_v4 = vld [vmem:[%s6158_s22 + $0x130] sm:$0xf0]  ;;  %v4121_v12 = vld [vmem:[%s6158_s22 + $0x198] sm:$0xf] }
 0x45a   : > { %2884 = vmatpush.bf16.msra.mxu0 %v4082_v24  ;;  %v5117_v24 = vld [vmem:[%s6158_s22 + $0x22c] sm:$0xf0]  ;;  %v4054_v11 = vor.u32 %v5081_v0, %v4051_v4  ;;  %v5049_v53 = vld [vmem:[%s6158_s22 + $0x14] sm:$0xf]  ;;  %v4153_v0 = vld [vmem:[%s6158_s22 + $0x1d8] sm:$0xf] }
 0x45b   : > { %2898 = vmatpush.bf16.msra.mxu1 %v4338_v28  ;;  %3023 = vmatpush.bf16.msra.mxu2 %v4634_v13  ;;  %v4602_v28 = vor.u32 %v5222_v22, %v4601_v20  ;;  %v4178_v34 = vor.u32 %v5117_v24, %v4177_v23  ;;  %v4473_v13 = vld [vmem:[%s6158_s22 + $0x458] sm:$0xf]  ;;  %v5137_v20 = vld [vmem:[%s6158_s22 + $0x2d4] sm:$0xf]  ;;  %v5282_v4 = vld [vmem:[%s6158_s22 + $0x75c] sm:$0xf] }
 0x45c   : > { %v4275_v22 = vld [vmem:[%s6158_s22 + $0x2f0] sm:$0xf0] }
 0x45d   : > { %3037 = vmatpush.bf16.msra.mxu3 %v4890_v17  ;;  %v4474_v17 = vor.u32 %v5190_v14, %v4473_v13  ;;  %v5065_v23 = vld [vmem:[%s6158_s22 + $0x94] sm:$0xf]  ;;  %v5102_v13 = vld [vmem:[%s6158_s22 + $0x1b4] sm:$0xf0]  ;;  %v5210_v14 = vld [vmem:[%s6158_s22 + $0x51c] sm:$0xf] }
 0x45e   : > { %2885 = vmatpush.bf16.msra.mxu0 %v4050_v36  ;;  %v5097_v36 = vld [vmem:[%s6158_s22 + $0x194] sm:$0xf] }
 0x45f   : > { %2899 = vmatpush.bf16.msra.mxu1 %v4306_v39  ;;  %v4406_v39 = vor.u32 %v5169_v30, %v4403_v31  ;;  %3024 = vmatpush.bf16.msra.mxu2 %v4602_v28  ;;  %v4118_v47 = vor.u32 %v5097_v36, %v4115_v40  ;;  %v3987_v24 = vld [vmem:[%s6158_s22 + $0xb0] sm:$0xf0]  ;;  %v4278_v30 = vor.u32 %v5137_v20, %v4275_v22  ;;  %v5246_v36 = vld [vmem:[%s6158_s22 + $0x634] sm:$0xf0] }
 0x460   : > { %v4243_v28 = vld [vmem:[%s6158_s22 + $0x2b0] sm:$0xf0]  ;;  %v4442_v31 = vor.u32 %v5182_v29, %v4441_v27  ;;  %v4926_v40 = vor.u32 %v5298_v37, %v4923_v38  ;;  %v5166_v20 = vld [vmem:[%s6158_s22 + $0x3b4] sm:$0xf0]  ;;  %v4574_v22 = vor.u32 %v5210_v14, %v4571_v16  ;;  %v5194_v37 = vld [vmem:[%s6158_s22 + $0x49c] sm:$0xf] }
 0x461   : > { %3038 = vmatpush.bf16.msra.mxu3 %v4858_v32  ;;  %v5234_v32 = vld [vmem:[%s6158_s22 + $0x5dc] sm:$0xf]  ;;  %v4246_v44 = vor.u32 %v5129_v26, %v4243_v28  ;;  %v5094_v27 = vld [vmem:[%s6158_s22 + $0x174] sm:$0xf0] }
 0x462   : > { %2886 = vmatpush.bf16.msra.mxu0 %v4018_v49  ;;  %v5206_v49 = vld [vmem:[%s6158_s22 + $0x4f4] sm:$0xf0]  ;;  %v4539_v26 = vld [vmem:[%s6158_s22 + $0x4f8] sm:$0xf0] }
 0x463   : > { %2900 = vmatpush.bf16.msra.mxu1 %v4274_v55  ;;  %3025 = vmatpush.bf16.msra.mxu2 %v4570_v41  ;;  %v4538_v54 = vor.u32 %v5206_v49, %v4537_v50  ;;  %v4793_v55 = vld [vmem:[%s6158_s22 + $0x6d8] sm:$0xf]  ;;  %v3990_v41 = vor.u32 %v5065_v23, %v3987_v24  ;;  %v4638_v50 = vor.u32 %v5226_v42, %v4635_v43  ;;  %v5290_v49 = vld [vmem:[%s6158_s22 + $0x79c] sm:$0xf] }
 0x464   : > { %v4794_v60 = vor.u32 %v5270_v56, %v4793_v55  ;;  %v3923_v56 = vld [vmem:[%s6158_s22 + $0x30] sm:$0xf0]  ;;  %v4122_v23 = vor.u32 %v5102_v13, %v4121_v12  ;;  %v4089_v24 = vld [vmem:[%s6158_s22 + $0x158] sm:$0xf]  ;;  %v4507_v38 = vld [vmem:[%s6158_s22 + $0x4b8] sm:$0xf0] }
 0x465   : > { %3039 = vmatpush.bf16.msra.mxu3 %v4826_v46  ;;  %v3955_v46 = vld [vmem:[%s6158_s22 + $0x70] sm:$0xf0]  ;;  %v5258_v42 = vld [vmem:[%s6158_s22 + $0x69c] sm:$0xf]  ;;  %v5134_v12 = vld [vmem:[%s6158_s22 + $0x2b4] sm:$0xf0] }
 0x466   : > { %2887 = vmatpush.bf16.msra.mxu0 %v3986_v5  ;;  %v4506_v5 = vor.u32 %v5198_v2, %v4505_v62  ;;  %v3958_v55 = vor.u32 %v5057_v45, %v3955_v46  ;;  %v5113_v62 = vld [vmem:[%s6158_s22 + $0x214] sm:$0xf]  ;;  %v5110_v2 = vld [vmem:[%s6158_s22 + $0x1f4] sm:$0xf0]  ;;  %v4763_v43 = vld [vmem:[%s6158_s22 + $0x6b8] sm:$0xf0] }
 0x467   : > { %2901 = vmatpush.bf16.msra.mxu1 %v4242_v61  ;;  %3026 = vmatpush.bf16.msra.mxu2 %v4538_v54  ;;  %v5145_v61 = vld [vmem:[%s6158_s22 + $0x314] sm:$0xf]  ;;  %v5150_v45 = vld [vmem:[%s6158_s22 + $0x334] sm:$0xf0]  ;;  %v4766_v46 = vor.u32 %v5258_v42, %v4763_v43 }
 0x468   : > { %v4310_v15 = vor.u32 %v5145_v61, %v4307_v8  ;;  %v3926_v8 = vor.u32 %v5049_v53, %v3923_v56 }
 0x469   : > { %3040 = vmatpush.bf16.msra.mxu3 %v4794_v60 }
 0x46a   : > { %2888 = vmatpush.bf16.msra.mxu0 %v3954_v18  ;;  %v4729_v18 = vld [vmem:[%s6158_s22 + $0x658] sm:$0xf] }
 0x46b   : > { %2902 = vmatpush.bf16.msra.mxu1 %v4210_v21  ;;  %3027 = vmatpush.bf16.msra.mxu2 %v4506_v5  ;;  %v4730_v21 = vor.u32 %v5254_v19, %v4729_v18  ;;  %v4859_v5 = vld [vmem:[%s6158_s22 + $0x778] sm:$0xf0]  ;;  %v4377_v19 = vld [vmem:[%s6158_s22 + $0x398] sm:$0xf] }
 0x46c   : > { %v4862_v61 = vor.u32 %v5282_v4, %v4859_v5  ;;  %v4827_v18 = vld [vmem:[%s6158_s22 + $0x738] sm:$0xf0]  ;;  %v4378_v28 = vor.u32 %v5166_v20, %v4377_v19 }
 0x46d   : > { %3041 = vmatpush.bf16.msra.mxu3 %v4762_v10  ;;  %v4443_v4 = vld [vmem:[%s6158_s22 + $0x438] sm:$0xf0] }
 0x46e   : > { %2889 = vmatpush.bf16.msra.mxu0 %v3922_v33  ;;  %v4667_v33 = vld [vmem:[%s6158_s22 + $0x5f8] sm:$0xf0] }
 0x46f   : > { %2903 = vmatpush.bf16.msra.mxu1 %v4178_v34  ;;  %3028 = vmatpush.bf16.msra.mxu2 %v4474_v17  ;;  %v4697_v34 = vld [vmem:[%s6158_s22 + $0x618] sm:$0xf]  ;;  %v5274_v17 = vld [vmem:[%s6158_s22 + $0x71c] sm:$0xf] }
 0x471   : > { %2890 = vmatmul.bf16.vlgmr.msra.gmra.mxu0 %v6487_v52  ;;  %3042 = vmatpush.bf16.msra.mxu3 %v4730_v21  ;;  %v4830_v21 = vor.u32 %v5274_v17, %v4827_v18  ;;  %v3961_v17 = vld [vmem:[%s6158_s22 + $0x58] sm:$0xf] }
 0x472   : > { %2938 = vmatpush.bf16.msrb.mxu0 %v4150_v35  ;;  %2904 = vmatmul.bf16.vlgmr.msra.gmra.mxu1 %v6492_v57  ;;  %v4670_v35 = vor.u32 %v5234_v32, %v4667_v33  ;;  %v4345_v32 = vld [vmem:[%s6158_s22 + $0x358] sm:$0xf] }
 0x473   : > { %2952 = vmatpush.bf16.msrb.mxu1 %v4406_v39  ;;  %v4698_v39 = vor.u32 %v5246_v36, %v4697_v34  ;;  %3029 = vmatpush.bf16.msra.mxu2 %v4442_v31  ;;  %v4795_v31 = vld [vmem:[%s6158_s22 + $0x6f8] sm:$0xf0]  ;;  %v5158_v33 = vld [vmem:[%s6158_s22 + $0x374] sm:$0xf0] }
 0x474   : > { %v4057_v36 = vld [vmem:[%s6158_s22 + $0x118] sm:$0xf] }
 0x475   : > { %3043 = vmatpush.bf16.msra.mxu3 %v4698_v39  ;;  %v4346_v39 = vor.u32 %v5158_v33, %v4345_v32  ;;  %v5062_v18 = vld [vmem:[%s6158_s22 + $0x74] sm:$0xf0]  ;;  %v4411_v32 = vld [vmem:[%s6158_s22 + $0x3f8] sm:$0xf0] }
 0x476   : > { %2939 = vmatpush.bf16.msrb.mxu0 %v4118_v47  ;;  %v5121_v47 = vld [vmem:[%s6158_s22 + $0x254] sm:$0xf]  ;;  %3030 = vmatmul.bf16.vlgmr.msra.gmra.mxu2 %v6411_v1 }
 0x477   : > { %2953 = vmatpush.bf16.msrb.mxu1 %v4374_v51  ;;  %3078 = vmatpush.bf16.msrb.mxu2 %v4670_v35  ;;  %v4891_v51 = vld [vmem:[%s6158_s22 + $0x7b8] sm:$0xf0]  ;;  %v4214_v60 = vor.u32 %v5121_v47, %v4211_v48  ;;  %v4090_v35 = vor.u32 %v5094_v27, %v4089_v24  ;;  %v5118_v27 = vld [vmem:[%s6158_s22 + $0x234] sm:$0xf0] }
 0x478   : > { %v4894_v54 = vor.u32 %v5290_v49, %v4891_v51  ;;  %3044 = vmatmul.bf16.vlgmr.msra.gmra.mxu3 %v6417_v9  ;;  %v5186_v49 = vld [vmem:[%s6158_s22 + $0x45c] sm:$0xf] }
 0x479   : > { %3092 = vmatpush.bf16.msrb.mxu3 %v4926_v40  ;;  %v5086_v40 = vld [vmem:[%s6158_s22 + $0x134] sm:$0xf0]  ;;  %v4475_v51 = vld [vmem:[%s6158_s22 + $0x478] sm:$0xf0] }
 0x47a   : > { %2940 = vmatpush.bf16.msrb.mxu0 %v4086_v63  ;;  %v4179_v63 = vld [vmem:[%s6158_s22 + $0x230] sm:$0xf0]  ;;  %v4058_v48 = vor.u32 %v5086_v40, %v4057_v36  ;;  %v4478_v56 = vor.u32 %v5186_v49, %v4475_v51  ;;  %v4379_v40 = vld [vmem:[%s6158_s22 + $0x3b8] sm:$0xf0] }
 0x47b   : > { %2954 = vmatpush.bf16.msrb.mxu1 %v4342_v3  ;;  %3079 = vmatpush.bf16.msrb.mxu2 %v4638_v50  ;;  %v4606_v3 = vor.u32 %v5218_v58, %v4603_v59  ;;  %v4182_v10 = vor.u32 %v5113_v62, %v4179_v63  ;;  %v4025_v50 = vld [vmem:[%s6158_s22 + $0xd8] sm:$0xf]  ;;  %v5250_v58 = vld [vmem:[%s6158_s22 + $0x65c] sm:$0xf] }
 0x47c   : > { %v4731_v59 = vld [vmem:[%s6158_s22 + $0x678] sm:$0xf0]  ;;  %v5142_v62 = vld [vmem:[%s6158_s22 + $0x2f4] sm:$0xf0] }
 0x47d   : > { %3093 = vmatpush.bf16.msrb.mxu3 %v4894_v54  ;;  %v4734_v63 = vor.u32 %v5250_v58, %v4731_v59  ;;  %v5146_v58 = vld [vmem:[%s6158_s22 + $0x31c] sm:$0xf] }
 0x47e   : > { %2941 = vmatpush.bf16.msrb.mxu0 %v4054_v11  ;;  %v4154_v11 = vor.u32 %v5110_v2, %v4153_v0  ;;  %v3993_v2 = vld [vmem:[%s6158_s22 + $0x98] sm:$0xf]  ;;  %v4315_v59 = vld [vmem:[%s6158_s22 + $0x338] sm:$0xf0] }
 0x47f   : > { %2955 = vmatpush.bf16.msrb.mxu1 %v4310_v15  ;;  %v4410_v15 = vor.u32 %v5174_v7, %v4409_v6  ;;  %3080 = vmatpush.bf16.msrb.mxu2 %v4606_v3  ;;  %v5178_v3 = vld [vmem:[%s6158_s22 + $0x41c] sm:$0xf]  ;;  %v5070_v6 = vld [vmem:[%s6158_s22 + $0xb4] sm:$0xf0] }
 0x480   : > { %v4446_v7 = vor.u32 %v5178_v3, %v4443_v4  ;;  %v3994_v14 = vor.u32 %v5070_v6, %v3993_v2  ;;  %v4318_v2 = vor.u32 %v5146_v58, %v4315_v59  ;;  %v5074_v3 = vld [vmem:[%s6158_s22 + $0xdc] sm:$0xf] }
 0x481   : > { %3094 = vmatpush.bf16.msrb.mxu3 %v4862_v61  ;;  %v5242_v61 = vld [vmem:[%s6158_s22 + $0x61c] sm:$0xf] }
 0x482   : > { %2942 = vmatpush.bf16.msrb.mxu0 %v4022_v25  ;;  %v5202_v25 = vld [vmem:[%s6158_s22 + $0x4dc] sm:$0xf] }
 0x483   : > { %2956 = vmatpush.bf16.msrb.mxu1 %v4278_v30  ;;  %3081 = vmatpush.bf16.msrb.mxu2 %v4574_v22  ;;  %v4542_v29 = vor.u32 %v5202_v25, %v4539_v26  ;;  %v5266_v30 = vld [vmem:[%s6158_s22 + $0x6dc] sm:$0xf]  ;;  %v4217_v22 = vld [vmem:[%s6158_s22 + $0x258] sm:$0xf] }
 0x484   : > { %v4798_v34 = vor.u32 %v5266_v30, %v4795_v31  ;;  %v3929_v25 = vld [vmem:[%s6158_s22 + $0x18] sm:$0xf]  ;;  %v4155_v30 = vld [vmem:[%s6158_s22 + $0x1f8] sm:$0xf0] }
 0x485   : > { %3095 = vmatpush.bf16.msrb.mxu3 %v4830_v21  ;;  %v5126_v21 = vld [vmem:[%s6158_s22 + $0x274] sm:$0xf0]  ;;  %v5170_v31 = vld [vmem:[%s6158_s22 + $0x3dc] sm:$0xf] }
 0x486   : > { %2943 = vmatpush.bf16.msrb.mxu0 %v3990_v41  ;;  %v4510_v41 = vor.u32 %v5194_v37, %v4507_v38  ;;  %v4218_v24 = vor.u32 %v5126_v21, %v4217_v22  ;;  %v5054_v26 = vld [vmem:[%s6158_s22 + $0x34] sm:$0xf0]  ;;  %v4414_v36 = vor.u32 %v5170_v31, %v4411_v32  ;;  %v5098_v37 = vld [vmem:[%s6158_s22 + $0x19c] sm:$0xf] }
 0x487   : > { %2957 = vmatpush.bf16.msrb.mxu1 %v4246_v44  ;;  %3082 = vmatpush.bf16.msrb.mxu2 %v4542_v29  ;;  %v4313_v44 = vld [vmem:[%s6158_s22 + $0x318] sm:$0xf]  ;;  %v5106_v29 = vld [vmem:[%s6158_s22 + $0x1dc] sm:$0xf] }
 0x488   : > { %v4314_v54 = vor.u32 %v5150_v45, %v4313_v44  ;;  %v5090_v45 = vld [vmem:[%s6158_s22 + $0x15c] sm:$0xf] }
 0x489   : > { %3096 = vmatpush.bf16.msrb.mxu3 %v4798_v34  ;;  %v4027_v4 = vld [vmem:[%s6158_s22 + $0xf8] sm:$0xf0] }
 0x48a   : > { %2944 = vmatpush.bf16.msrb.mxu0 %v3958_v55  ;;  %v5078_v55 = vld [vmem:[%s6158_s22 + $0xf4] sm:$0xf0]  ;;  %v4283_v6 = vld [vmem:[%s6158_s22 + $0x2f8] sm:$0xf0] }
 0x48b   : > { %2958 = vmatpush.bf16.msrb.mxu1 %v4214_v60  ;;  %3083 = vmatpush.bf16.msrb.mxu2 %v4510_v41  ;;  %v4281_v60 = vld [vmem:[%s6158_s22 + $0x2d8] sm:$0xf]  ;;  %v4026_v0 = vor.u32 %v5078_v55, %v4025_v50  ;;  %v4347_v50 = vld [vmem:[%s6158_s22 + $0x378] sm:$0xf0] }
 0x48c   : > { %v4282_v5 = vor.u32 %v5142_v62, %v4281_v60  ;;  %v5082_v55 = vld [vmem:[%s6158_s22 + $0x11c] sm:$0xf] }
 0x48d   : > { %3097 = vmatpush.bf16.msrb.mxu3 %v4766_v46  ;;  %v4091_v46 = vld [vmem:[%s6158_s22 + $0x178] sm:$0xf0] }
 0x48e   : > { %2945 = vmatpush.bf16.msrb.mxu0 %v3926_v8  ;;  %v6788_v47 = vpop.f32.mrf.mxu0  ;;  %v4699_v8 = vld [vmem:[%s6158_s22 + $0x638] sm:$0xf0]  ;;  %v4094_v51 = vor.u32 %v5090_v45, %v4091_v46 }
 0x48f   : > { %2959 = vmatpush.bf16.msrb.mxu1 %v4182_v10  ;;  %v6793_v53 = vpop.f32.mrf.mxu1  ;;  %3084 = vmatpush.bf16.msrb.mxu2 %v4478_v56  ;;  %v6806_v10 = vpop.f32.mrf.mxu2  ;;  %v4702_v13 = vor.u32 %v5242_v61, %v4699_v8  ;;  %v4059_v56 = vld [vmem:[%s6158_s22 + $0x138] sm:$0xf0] }
 0x490   : > { %v4062_v62 = vor.u32 %v5082_v55, %v4059_v56  ;;  %v5058_v22 = vld [vmem:[%s6158_s22 + $0x5c] sm:$0xf] }
 0x491   : > { %2946 = vmatmul.bf16.vlgmr.msrb.gmra.mxu0 %v6487_v52  ;;  %3098 = vmatpush.bf16.msrb.mxu3 %v4734_v63  ;;  %v3963_v21 = vld [vmem:[%s6158_s22 + $0x78] sm:$0xf0] }
 0x492   : > { %2994 = vmatpush.bf16.msra.mxu0 %v4154_v11  ;;  %2960 = vmatmul.bf16.vlgmr.msrb.gmra.mxu1 %v6492_v57  ;;  %v4249_v11 = vld [vmem:[%s6158_s22 + $0x298] sm:$0xf]  ;;  %v5114_v31 = vld [vmem:[%s6158_s22 + $0x21c] sm:$0xf] }
 0x493   : > { %3008 = vmatpush.bf16.msra.mxu1 %v4410_v15  ;;  %v6810_v15 = vpop.f32.mrf.mxu3  ;;  %v4250_v16 = vor.u32 %v5134_v12, %v4249_v11  ;;  %3085 = vmatpush.bf16.msrb.mxu2 %v4446_v7  ;;  %v4030_v7 = vor.u32 %v5074_v3, %v4027_v4  ;;  %v5066_v11 = vld [vmem:[%s6158_s22 + $0x9c] sm:$0xf] }
 0x494   : > { %v3995_v12 = vld [vmem:[%s6158_s22 + $0xb8] sm:$0xf0] }
 0x495   : > { %3099 = vmatpush.bf16.msrb.mxu3 %v4702_v13  ;;  %v5130_v13 = vld [vmem:[%s6158_s22 + $0x29c] sm:$0xf] }
 0x496   : > { %2995 = vmatpush.bf16.msra.mxu0 %v4122_v23  ;;  %v6814_v19 = vpop.f32.mrf.mxu0  ;;  %v3962_v23 = vor.u32 %v5062_v18, %v3961_v17  ;;  %3086 = vmatmul.bf16.vlgmr.msrb.gmra.mxu2 %v6411_v1  ;;  %v3930_v1 = vor.u32 %v5054_v26, %v3929_v25  ;;  %v4187_v32 = vld [vmem:[%s6158_s22 + $0x238] sm:$0xf0] }
 0x497   : > { %3009 = vmatpush.bf16.msra.mxu1 %v4378_v28  ;;  %v6816_v20 = vpop.f32.mrf.mxu1  ;;  %v4185_v28 = vld [vmem:[%s6158_s22 + $0x218] sm:$0xf]  ;;  %v6830_v33 = vpop.f32.mrf.mxu2 }
 0x498   : > { %3100 = vmatmul.bf16.vlgmr.msrb.gmra.mxu3 %v6417_v9  ;;  %v4186_v34 = vor.u32 %v5118_v27, %v4185_v28  ;;  %v4123_v9 = vld [vmem:[%s6158_s22 + $0x1b8] sm:$0xf0]  ;;  %v3966_v28 = vor.u32 %v5058_v22, %v3963_v21 }
 0x499   : > { %v4126_v43 = vor.u32 %v5098_v37, %v4123_v9  ;;  %v4190_v37 = vor.u32 %v5114_v31, %v4187_v32 }
 0x49a   : > { %2996 = vmatpush.bf16.msra.mxu0 %v4090_v35  ;;  %v4158_v35 = vor.u32 %v5106_v29, %v4155_v30  ;;  %v5050_v29 = vld [vmem:[%s6158_s22 + $0x1c] sm:$0xf] }
 0x49b   : > { %3010 = vmatpush.bf16.msra.mxu1 %v4346_v39  ;;  %v6834_v38 = vpop.f32.mrf.mxu3  ;;  %v5162_v39 = vld [vmem:[%s6158_s22 + $0x39c] sm:$0xf] }
 0x49c   : > { %v4382_v44 = vor.u32 %v5162_v39, %v4379_v40  ;;  %v3931_v30 = vld [vmem:[%s6158_s22 + $0x38] sm:$0xf0] }
 0x49e   : > { %2997 = vmatpush.bf16.msra.mxu0 %v4058_v48  ;;  %v6838_v41 = vpop.f32.mrf.mxu0  ;;  %v5154_v48 = vld [vmem:[%s6158_s22 + $0x35c] sm:$0xf] }
 0x49f   : > { %3011 = vmatpush.bf16.msra.mxu1 %v4314_v54  ;;  %v6840_v42 = vpop.f32.mrf.mxu1  ;;  %v6847_v49 = vpop.f32.mrf.mxu2  ;;  %v4350_v54 = vor.u32 %v5154_v48, %v4347_v50 }
 0x4a2   : > { %2998 = vmatpush.bf16.msra.mxu0 %v4026_v0 }
 0x4a3   : > { %3012 = vmatpush.bf16.msra.mxu1 %v4282_v5  ;;  %v6854_v60 = vpop.f32.mrf.mxu3  ;;  %v5138_v5 = vld [vmem:[%s6158_s22 + $0x2dc] sm:$0xf] }
 0x4a4   : > { %v4286_v8 = vor.u32 %v5138_v5, %v4283_v6 }
 0x4a6   : > { %2999 = vmatpush.bf16.msra.mxu0 %v3994_v14  ;;  %v6856_v63 = vpop.f32.mrf.mxu0  ;;  %v4251_v14 = vld [vmem:[%s6158_s22 + $0x2b8] sm:$0xf0] }
 0x4a7   : > { %3013 = vmatpush.bf16.msra.mxu1 %v4250_v16  ;;  %v6858_v0 = vpop.f32.mrf.mxu1  ;;  %v6864_v61 = vpop.f32.mrf.mxu2  ;;  %v3998_v16 = vor.u32 %v5066_v11, %v3995_v12  ;;  %v4254_v18 = vor.u32 %v5130_v13, %v4251_v14 }
 0x4aa   : > { %3000 = vmatpush.bf16.msra.mxu0 %v3962_v23  ;;  %v5122_v23 = vld [vmem:[%s6158_s22 + $0x25c] sm:$0xf] }
 0x4ab   : > { %3014 = vmatpush.bf16.msra.mxu1 %v4218_v24  ;;  %v6870_v17 = vpop.f32.mrf.mxu3  ;;  %v4219_v24 = vld [vmem:[%s6158_s22 + $0x278] sm:$0xf0] }
 0x4ac   : > { %v4222_v27 = vor.u32 %v5122_v23, %v4219_v24 }
 0x4ae   : > { %3001 = vmatpush.bf16.msra.mxu0 %v3930_v1  ;;  %v2779_v25 = vpop.f32.mrf.mxu0 }
 0x4af   : > { %3015 = vmatpush.bf16.msra.mxu1 %v4186_v34  ;;  %v2793_v26 = vpop.f32.mrf.mxu1  ;;  %v2807_v1 = vpop.f32.mrf.mxu2 }
 0x4b0   : > { %v2794_v34 = vadd.f32 %v2793_v26, %v2779_v25 }
 0x4b1   : > { %3002 = vmatmul.bf16.vlgmr.msra.gmra.mxu0 %v6487_v52 }
 0x4b2   : > { %3050 = vmatpush.bf16.msrb.mxu0 %v4158_v35  ;;  %3016 = vmatmul.bf16.vlgmr.msra.gmra.mxu1 %v6492_v57  ;;  %v3934_v35 = vor.u32 %v5050_v29, %v3931_v30  ;;  %v2808_v39 = vadd.f32 %v2807_v1, %v2794_v34 }
 0x4b3   : > { %3064 = vmatpush.bf16.msrb.mxu1 %v4414_v36  ;;  %v2682_v36 = vadd.f32 %v6793_v53, %v6788_v47  ;;  %v2821_v9 = vpop.f32.mrf.mxu3  ;;  %v2684_v47 = vadd.f32 %v6816_v20, %v6814_v19 }
 0x4b4   : > { %v2822_v45 = vadd.f32 %v2821_v9, %v2808_v39 }
 0x4b5   : > { %v2696_v40 = vadd.f32 %v6806_v10, %v2682_v36  ;;  %v2698_v10 = vadd.f32 %v6830_v33, %v2684_v47  ;;  %v2738_v33 = vadd.f32 %v6840_v42, %v6838_v41 }
 0x4b6   : > { %3051 = vmatpush.bf16.msrb.mxu0 %v4126_v43  ;;  %v2781_v43 = vpop.f32.mrf.mxu0  ;;  %v4931_v50 = vmul.f32 -1.442695, %v2822_v45 }
 0x4b7   : > { %3065 = vmatpush.bf16.msrb.mxu1 %v4382_v44  ;;  %v2795_v44 = vpop.f32.mrf.mxu1  ;;  %v2710_v48 = vadd.f32 %v6810_v15, %v2696_v40  ;;  %v2809_v53 = vpop.f32.mrf.mxu2 }
 0x4b8   : > { %v2796_v46 = vadd.f32 %v2795_v44, %v2781_v43  ;;  %5455 = vpow2.f32 %v4931_v50 }
 0x4ba   : > { %3052 = vmatpush.bf16.msrb.mxu0 %v4094_v51  ;;  %v2810_v51 = vadd.f32 %v2809_v53, %v2796_v46 }
 0x4bb   : > { %3066 = vmatpush.bf16.msrb.mxu1 %v4350_v54  ;;  %v4927_v54 = vmul.f32 -1.442695, %v2710_v48  ;;  %v2823_v55 = vpop.f32.mrf.mxu3 }
 0x4bc   : > { %v2824_v56 = vadd.f32 %v2823_v55, %v2810_v51 }
 0x4bd   : > { %5457 = vpow2.f32 %v4927_v54 }
 0x4be   : > { %3053 = vmatpush.bf16.msrb.mxu0 %v4062_v62  ;;  %v4933_v58 = vmul.f32 -1.442695, %v2824_v56 }
 0x4bf   : > { %3067 = vmatpush.bf16.msrb.mxu1 %v4318_v2  ;;  %v2863_v3 = vpop.f32.mrf.mxu2 }
 0x4c0   : > { %5459 = vpow2.f32 %v4933_v58 }
 0x4c2   : > { %3054 = vmatpush.bf16.msrb.mxu0 %v4030_v7  ;;  %v2752_v7 = vadd.f32 %v6847_v49, %v2738_v33  ;;  %v2740_v49 = vadd.f32 %v6858_v0, %v6856_v63 }
 0x4c3   : > { %3068 = vmatpush.bf16.msrb.mxu1 %v4286_v8  ;;  %v2877_v4 = vpop.f32.mrf.mxu3 }
 0x4c4   : > { %v2766_v42 = vadd.f32 %v6854_v60, %v2752_v7 }
 0x4c6   : > { %3055 = vmatpush.bf16.msrb.mxu0 %v3998_v16  ;;  %v4928_v26 = vmul.f32 -1.442695, %v2766_v42 }
 0x4c7   : > { %3069 = vmatpush.bf16.msrb.mxu1 %v4254_v18  ;;  %v2865_v22 = vpop.f32.mrf.mxu2 }
 0x4ca   : > { %3056 = vmatpush.bf16.msrb.mxu0 %v3966_v28 }
 0x4cb   : > { %3070 = vmatpush.bf16.msrb.mxu1 %v4222_v27  ;;  %v2879_v24 = vpop.f32.mrf.mxu3  ;;  %v2754_v27 = vadd.f32 %v6864_v61, %v2740_v49 }
 0x4cd   : > { %v2768_v34 = vadd.f32 %v6870_v17, %v2754_v27 }
 0x4ce   : > { %3057 = vmatpush.bf16.msrb.mxu0 %v3934_v35  ;;  %v2835_v15 = vpop.f32.mrf.mxu0 }
 0x4cf   : > { %3071 = vmatpush.bf16.msrb.mxu1 %v4190_v37  ;;  %v2849_v2 = vpop.f32.mrf.mxu1  ;;  %v2919_v0 = vpop.f32.mrf.mxu2  ;;  %v4930_v46 = vmul.f32 -1.442695, %v2768_v34 }
 0x4d1   : > { %3058 = vmatmul.bf16.vlgmr.msrb.gmra.mxu0 %v6487_v52  ;;  %v2712_v52 = vadd.f32 %v6834_v38, %v2698_v10  ;;  %v2850_v38 = vadd.f32 %v2849_v2, %v2835_v15 }
 0x4d2   : > { %3072 = vmatmul.bf16.vlgmr.msrb.gmra.mxu1 %v6492_v57  ;;  %v5456_v57 = vpop.eup %5455 }
 0x4d3   : > { %v4929_v59 = vmul.f32 -1.442695, %v2712_v52  ;;  %v5458_v62 = vpop.eup %5457  ;;  %v6890_v19 = vadd.f32 1.0, %v5456_v57  ;;  %v2864_v11 = vadd.f32 %v2863_v3, %v2850_v38  ;;  %v2933_v61 = vpop.f32.mrf.mxu3 }
 0x4d4   : > { %v6892_v20 = vadd.f32 1.0, %v5458_v62  ;;  %v5460_v5 = vpop.eup %5459 }
 0x4d5   : > { %5461 = vpow2.f32 %v4929_v59  ;;  %v6899_v8 = vadd.f32 1.0, %v5460_v5  ;;  %v2878_v21 = vadd.f32 %v2877_v4, %v2864_v11  ;;  %v3209_v53 = vand.u32 2147483648, %v6890_v19  ;;  %v3338_v11 = vld [vmem:[#allocation4] sm:$0xff] }
 0x4d6   : > { %5463 = vrcp.f32 %v6890_v19  ;;  %v2837_v12 = vpop.f32.mrf.mxu0  ;;  %vm3203_vm0 = vweird.f32 %v6890_v19  ;;  %v3133_v10 = vand.u32 2147483648, %v6892_v20  ;;  %v3207_v55 = vand.u32 2147483647, %v6890_v19 }
 0x4d7   : > { %5465 = vrcp.f32 %v6892_v20  ;;  %v2851_v13 = vpop.f32.mrf.mxu1  ;;  %v4932_v60 = vmul.f32 -1.442695, %v2878_v21  ;;  %vm3127_vm2 = vweird.f32 %v6892_v20  ;;  %v3131_v58 = vand.u32 2147483647, %v6892_v20  ;;  %v2921_v3 = vpop.f32.mrf.mxu2 }
 0x4d8   : > { %v2852_v18 = vadd.f32 %v2851_v13, %v2837_v12  ;;  %5467 = vrcp.f32 %v6899_v8  ;;  %v3134_v5 = vor.u32 1.1754944e-38, %v3133_v10  ;;  %vm3208_vm4 = vcmp.eq.f32.partialorder %v3207_v55, 8.507059e+37 }
 0x4d9   : > { %vm3132_vm5 = vcmp.eq.f32.partialorder %v3131_v58, 8.507059e+37  ;;  %vm3233_vm8 = vweird.f32 %v6899_v8 }
 0x4da   : > { %v2866_v28 = vadd.f32 %v2865_v22, %v2852_v18  ;;  %v3239_v18 = vand.u32 2147483648, %v6899_v8 }
 0x4db   : > { %v5462_v6 = vpop.eup %5461 }
 0x4dc   : > { %v6901_v14 = vadd.f32 1.0, %v5462_v6  ;;  %v6903_v16 = vpop.eup %5463  ;;  %v2880_v63 = vadd.f32 %v2879_v24, %v2866_v28  ;;  %v2935_v6 = vpop.f32.mrf.mxu3 }
 0x4dd   : > { %v6905_v41 = vpop.eup %5465  ;;  %v3199_v23 = vmul.f32 %v6903_v16, %v6890_v19  ;;  %vm3204_vm15 = vweird.f32 %v6903_v16 }
 0x4de   : > { %5469 = vrcp.f32 %v6901_v14  ;;  %v3123_v25 = vmul.f32 %v6905_v41, %v6892_v20  ;;  %v6917_v30 = vpop.eup %5467  ;;  %v4934_v43 = vmul.f32 -1.442695, %v2880_v63  ;;  %vm3128_vm14 = vweird.f32 %v6905_v41  ;;  %vm6938_vm1 = vmor %vm3203_vm0, %vm3204_vm15 }
 0x4df   : > { %v3200_v29 = vsub.f32 1.0, %v3199_v23  ;;  %5471 = vpow2.f32 %v4928_v26  ;;  %v3229_v36 = vmul.f32 %v6917_v30, %v6899_v8  ;;  %vm6949_vm3 = vmor %vm3127_vm2, %vm3128_vm14  ;;  %v3210_v20 = vor.u32 1.1754944e-38, %v3209_v53 }
 0x4e0   : > { %v3124_v31 = vsub.f32 1.0, %v3123_v25  ;;  %5473 = vpow2.f32 %v4932_v60  ;;  %vm3234_vm6 = vweird.f32 %v6917_v30  ;;  %v3237_v25 = vand.u32 2147483647, %v6899_v8 }
 0x4e1   : > { %v3201_v35 = vmul.f32 %v6903_v16, %v3200_v29  ;;  %v3230_v17 = vsub.f32 1.0, %v3229_v36  ;;  %5475 = vpow2.f32 %v4934_v43  ;;  %vm6969_vm9 = vmor %vm3233_vm8, %vm3234_vm6  ;;  %vm3157_vm10 = vweird.f32 %v6901_v14  ;;  %v3340_v36 = vld [vmem:[#allocation4 + $0x10] sm:$0xff] }
 0x4e2   : > { %v3125_v40 = vmul.f32 %v6905_v41, %v3124_v31  ;;  %v3163_v28 = vand.u32 2147483648, %v6901_v14  ;;  %v3161_v29 = vand.u32 2147483647, %v6901_v14  ;;  %vm3238_vm12 = vcmp.eq.f32.partialorder %v3237_v25, 8.507059e+37 }
 0x4e3   : > { %v3202_v48 = vadd.f32 %v6903_v16, %v3201_v35  ;;  %v3231_v57 = vmul.f32 %v6917_v30, %v3230_v17  ;;  %v2975_v17 = vpop.f32.mrf.mxu2 }
 0x4e4   : > { %v6919_v32 = vpop.eup %5469  ;;  %v3126_v51 = vadd.f32 %v6905_v41, %v3125_v40  ;;  %v3164_v35 = vor.u32 1.1754944e-38, %v3163_v28  ;;  %vm3162_vm13 = vcmp.eq.f32.partialorder %v3161_v29, 8.507059e+37 }
 0x4e5   : > { %v3153_v9 = vmul.f32 %v6919_v32, %v6901_v14  ;;  %v5472_v45 = vpop.eup %5471  ;;  %v3206_v2 = vsel %vm6938_vm1, %v6903_v16, %v3202_v48  ;;  %vm3158_vm7 = vweird.f32 %v6919_v32 }
 0x4e6   : > { %v5474_v47 = vpop.eup %5473  ;;  %v6936_v56 = vadd.f32 1.0, %v5472_v45  ;;  %v3130_v33 = vsel %vm6949_vm3, %v6905_v41, %v3126_v51  ;;  %v3211_v7 = vsel %vm3208_vm4, %v3210_v20, %v3206_v2  ;;  %v3232_v41 = vadd.f32 %v6917_v30, %v3231_v57  ;;  %vm3159_vm11 = vmor %vm3157_vm10, %vm3158_vm7  ;;  %v2989_v51 = vpop.f32.mrf.mxu3 }
 0x4e7   : > { %v3154_v54 = vsub.f32 1.0, %v3153_v9  ;;  %v6945_v62 = vadd.f32 1.0, %v5474_v47  ;;  %v5476_v13 = vpop.eup %5475  ;;  %v3135_v16 = vsel %vm3132_vm5, %v3134_v5, %v3130_v33  ;;  %v3342_v23 = vmul.f32 %v3338_v11, %v3211_v7 }
 0x4e8   : > { %v6975_v60 = vadd.f32 1.0, %v5476_v13  ;;  %v3236_v31 = vsel %vm6969_vm9, %v6917_v30, %v3232_v41  ;;  %v3148_v33 = vand.u32 2147483648, %v6936_v56  ;;  %vm3142_vm2 = vweird.f32 %v6936_v56 }
 0x4e9   : > { %v3155_v38 = vmul.f32 %v6919_v32, %v3154_v54  ;;  %v3224_v15 = vand.u32 2147483648, %v6945_v62  ;;  %vm3218_vm15 = vweird.f32 %v6945_v62  ;;  %v3146_v5 = vand.u32 2147483647, %v6936_v56 }
 0x4ea   : > { %vm3248_vm8 = vweird.f32 %v6975_v60 }
 0x4eb   : > { %v3156_v21 = vadd.f32 %v6919_v32, %v3155_v38  ;;  %v2977_v11 = vpop.f32.mrf.mxu2  ;;  %vm3147_vm6 = vcmp.eq.f32.partialorder %v3146_v5, 8.507059e+37 }
 0x4ed   : > { %v3160_v34 = vsel %vm3159_vm11, %v6919_v32, %v3156_v21 }
 0x4ee   : > { %v2891_v1 = vpop.f32.mrf.mxu0 }
 0x4ef   : > { %v2905_v37 = vpop.f32.mrf.mxu1 }
 0x4f0   : > { %v2906_v39 = vadd.f32 %v2905_v37, %v2891_v1 }
 0x4f2   : > { %v2920_v44 = vadd.f32 %v2919_v0, %v2906_v39  ;;  %v3240_v0 = vor.u32 1.1754944e-38, %v3239_v18 }
 0x4f4   : > { %v2934_v50 = vadd.f32 %v2933_v61, %v2920_v44  ;;  %v3241_v14 = vsel %vm3238_vm12, %v3240_v0, %v3236_v31  ;;  %v3165_v61 = vsel %vm3162_vm13, %v3164_v35, %v3160_v34 }
 0x4f5   : > { %v3344_v9 = vmul.f32 %v3340_v36, %v3241_v14 }
 0x4f6   : > { %5477 = vtanh.f32 %v2934_v50  ;;  %v2893_v59 = vpop.f32.mrf.mxu0 }
 0x4f7   : > { %5479 = vpow2.f32 %v4930_v46  ;;  %v2907_v19 = vpop.f32.mrf.mxu1 }
 0x4f8   : > { %v2908_v4 = vadd.f32 %v2907_v19, %v2893_v59  ;;  %5481 = vrcp.f32 %v6936_v56 }
 0x4f9   : > { %5483 = vrcp.f32 %v6945_v62 }
 0x4fa   : > { %v2922_v12 = vadd.f32 %v2921_v3, %v2908_v4  ;;  %v3222_v3 = vand.u32 2147483647, %v6945_v62 }
 0x4fc   : > { %v5478_v42 = vpop.eup %5477  ;;  %v2936_v22 = vadd.f32 %v2935_v6, %v2922_v12  ;;  %vm3223_vm4 = vcmp.eq.f32.partialorder %v3222_v3, 8.507059e+37 }
 0x4fd   : > { %v5480_v49 = vpop.eup %5479  ;;  %v3346_v24 = vmul.f32 %v5478_v42, %v3135_v16  ;;  %v2991_v42 = vpop.f32.mrf.mxu3 }
 0x4fe   : > { %5485 = vtanh.f32 %v2936_v22  ;;  %v6983_v8 = vpop.eup %5481  ;;  %v6985_v63 = vadd.f32 1.0, %v5480_v49  ;;  %v3339_v22 = vld [vmem:[#allocation4 + $0x8] sm:$0xff] }
 0x4ff   : > { %v6977_v27 = vadd.f32 %v3346_v24, %v3342_v23  ;;  %v5484_v1 = vpop.eup %5483  ;;  %5487 = vrcp.f32 %v6975_v60  ;;  %v3138_v40 = vmul.f32 %v6983_v8, %v6936_v56  ;;  %vm3143_vm0 = vweird.f32 %v6983_v8 }
 0x500   : > { %5489 = vrcp.f32 %v6985_v63  ;;  %v3214_v37 = vmul.f32 %v5484_v1, %v6945_v62  ;;  %vm3219_vm14 = vweird.f32 %v5484_v1  ;;  %v3225_v62 = vor.u32 1.1754944e-38, %v3224_v15  ;;  %vm7023_vm3 = vmor %vm3142_vm2, %vm3143_vm0 }
 0x501   : > { %3362 = vst [vmem:[#allocation4] sm:$0xff] %v6977_v27  ;;  %v3139_v46 = vsub.f32 1.0, %v3138_v40  ;;  %vm7013_vm1 = vmor %vm3218_vm15, %vm3219_vm14  ;;  %v3149_v56 = vor.u32 1.1754944e-38, %v3148_v33  ;;  %v3254_v24 = vand.u32 2147483648, %v6975_v60  ;;  %v3178_v0 = vand.u32 2147483648, %v6985_v63 }
 0x502   : > { %v3215_v32 = vsub.f32 1.0, %v3214_v37  ;;  %vm3172_vm10 = vweird.f32 %v6985_v63  ;;  %v3176_v34 = vand.u32 2147483647, %v6985_v63  ;;  %v3341_v37 = vld [vmem:[#allocation4 + $0x18] sm:$0xff] }
 0x503   : > { %v3140_v55 = vmul.f32 %v6983_v8, %v3139_v46  ;;  %v3255_v14 = vor.u32 1.1754944e-38, %v3254_v24  ;;  %v3179_v36 = vor.u32 1.1754944e-38, %v3178_v0 }
 0x504   : > { %v5486_v30 = vpop.eup %5485  ;;  %v3216_v47 = vmul.f32 %v5484_v1, %v3215_v32  ;;  %vm3177_vm13 = vcmp.eq.f32.partialorder %v3176_v34, 8.507059e+37  ;;  %v3031_v32 = vpop.f32.mrf.mxu2 }
 0x505   : > { %v3348_v39 = vmul.f32 %v5486_v30, %v3165_v61  ;;  %v6998_v44 = vpop.eup %5487  ;;  %v3141_v19 = vadd.f32 %v6983_v8, %v3140_v55 }
 0x506   : > { %v7001_v45 = vpop.eup %5489  ;;  %v3244_v53 = vmul.f32 %v6998_v44, %v6975_v60  ;;  %v3217_v59 = vadd.f32 %v5484_v1, %v3216_v47  ;;  %vm3249_vm5 = vweird.f32 %v6998_v44 }
 0x507   : > { %v6996_v43 = vadd.f32 %v3348_v39, %v3344_v9  ;;  %v3168_v54 = vmul.f32 %v7001_v45, %v6985_v63  ;;  %v3145_v41 = vsel %vm7023_vm3, %v6983_v8, %v3141_v19  ;;  %vm3173_vm7 = vweird.f32 %v7001_v45  ;;  %vm3250_vm9 = vmor %vm3248_vm8, %vm3249_vm5 }
 0x508   : > { %v3245_v58 = vsub.f32 1.0, %v3244_v53  ;;  %v3221_v6 = vsel %vm7013_vm1, %v5484_v1, %v3217_v59  ;;  %v3150_v25 = vsel %vm3147_vm6, %v3149_v56, %v3145_v41  ;;  %v3252_v8 = vand.u32 2147483647, %v6975_v60  ;;  %vm3174_vm11 = vmor %vm3172_vm10, %vm3173_vm7 }
 0x509   : > { %3364 = vst [vmem:[#allocation4 + $0x10] sm:$0xff] %v6996_v43  ;;  %v3169_v57 = vsub.f32 1.0, %v3168_v54  ;;  %v3226_v18 = vsel %vm3223_vm4, %v3225_v62, %v3221_v6 }
 0x50a   : > { %v3246_v38 = vmul.f32 %v6998_v44, %v3245_v58  ;;  %v3343_v29 = vmul.f32 %v3339_v22, %v3226_v18  ;;  %vm3253_vm12 = vcmp.eq.f32.partialorder %v3252_v8, 8.507059e+37 }
 0x50b   : > { %v3170_v16 = vmul.f32 %v7001_v45, %v3169_v57 }
 0x50c   : > { %v3247_v49 = vadd.f32 %v6998_v44, %v3246_v38  ;;  %v3033_v54 = vpop.f32.mrf.mxu2 }
 0x50d   : > { %v3171_v28 = vadd.f32 %v7001_v45, %v3170_v16 }
 0x50e   : > { %v2947_v48 = vpop.f32.mrf.mxu0  ;;  %v3251_v35 = vsel %vm3250_vm9, %v6998_v44, %v3247_v49 }
 0x50f   : > { %v2961_v50 = vpop.f32.mrf.mxu1  ;;  %v3175_v60 = vsel %vm3174_vm11, %v7001_v45, %v3171_v28  ;;  %v3256_v30 = vsel %vm3253_vm12, %v3255_v14, %v3251_v35 }
 0x510   : > { %v2962_v10 = vadd.f32 %v2961_v50, %v2947_v48  ;;  %v3180_v9 = vsel %vm3177_vm13, %v3179_v36, %v3175_v60  ;;  %v3345_v39 = vmul.f32 %v3341_v37, %v3256_v30 }
 0x512   : > { %v2976_v52 = vadd.f32 %v2975_v17, %v2962_v10  ;;  %v3045_v17 = vpop.f32.mrf.mxu3 }
 0x514   : > { %v2990_v2 = vadd.f32 %v2989_v51, %v2976_v52 }
 0x516   : > { %5491 = vtanh.f32 %v2990_v2  ;;  %v2949_v4 = vpop.f32.mrf.mxu0 }
 0x517   : > { %v2963_v7 = vpop.f32.mrf.mxu1 }
 0x518   : > { %v2964_v13 = vadd.f32 %v2963_v7, %v2949_v4 }
 0x519   : > { %v3087_v7 = vpop.f32.mrf.mxu2 }
 0x51a   : > { %v2978_v21 = vadd.f32 %v2977_v11, %v2964_v13  ;;  %v3047_v55 = vpop.f32.mrf.mxu3 }
 0x51c   : > { %v5492_v23 = vpop.eup %5491  ;;  %v2992_v26 = vadd.f32 %v2991_v42, %v2978_v21 }
 0x51d   : > { %v3347_v31 = vmul.f32 %v5492_v23, %v3150_v25 }
 0x51e   : > { %5493 = vtanh.f32 %v2992_v26 }
 0x51f   : > { %v7039_v1 = vadd.f32 %v3347_v31, %v3343_v29 }
 0x521   : > { %3363 = vst [vmem:[#allocation4 + $0x8] sm:$0xff] %v7039_v1  ;;  %v3089_v34 = vpop.f32.mrf.mxu2 }
 0x522   : > { %v3101_v13 = vpop.f32.mrf.mxu3 }
 0x524   : > { %v5494_v61 = vpop.eup %5493 }
 0x525   : > { %v3349_v40 = vmul.f32 %v5494_v61, %v3180_v9 }
 0x527   : > { %v7048_v63 = vadd.f32 %v3349_v40, %v3345_v39 }
 0x529   : > { %3365 = vst [vmem:[#allocation4 + $0x18] sm:$0xff] %v7048_v63 }
 0x52a   : > { %v3103_v60 = vpop.f32.mrf.mxu3 }
 0x52e   : > { %v3003_v44 = vpop.f32.mrf.mxu0 }
 0x52f   : > { %v3017_v46 = vpop.f32.mrf.mxu1 }
 0x530   : > { %v3018_v48 = vadd.f32 %v3017_v46, %v3003_v44 }
 0x532   : > { %v3032_v47 = vadd.f32 %v3031_v32, %v3018_v48 }
 0x534   : > { %v3046_v45 = vadd.f32 %v3045_v17, %v3032_v47 }
 0x536   : > { %v4935_v53 = vmul.f32 -1.442695, %v3046_v45  ;;  %v3005_v50 = vpop.f32.mrf.mxu0 }
 0x537   : > { %v3019_v51 = vpop.f32.mrf.mxu1 }
 0x538   : > { %5495 = vpow2.f32 %v4935_v53  ;;  %v3020_v10 = vadd.f32 %v3019_v51, %v3005_v50 }
 0x53a   : > { %v3034_v52 = vadd.f32 %v3033_v54, %v3020_v10 }
 0x53c   : > { %v3048_v58 = vadd.f32 %v3047_v55, %v3034_v52 }
 0x53e   : > { %v5496_v59 = vpop.eup %5495  ;;  %v4937_v57 = vmul.f32 -1.442695, %v3048_v58 }
 0x53f   : > { %v3274_v15 = vadd.f32 1.0, %v5496_v59 }
 0x540   : > { %5497 = vpow2.f32 %v4937_v57 }
 0x541   : > { %5499 = vrcp.f32 %v3274_v15  ;;  %v3289_v4 = vand.u32 2147483648, %v3274_v15  ;;  %v3287_v6 = vand.u32 2147483647, %v3274_v15  ;;  %vm3283_vm15 = vweird.f32 %v3274_v15 }
 0x543   : > { %v3290_v41 = vor.u32 1.1754944e-38, %v3289_v4  ;;  %vm3288_vm1 = vcmp.eq.f32.partialorder %v3287_v6, 8.507059e+37 }
 0x546   : > { %v5498_v2 = vpop.eup %5497 }
 0x547   : > { %v5500_v19 = vpop.eup %5499  ;;  %v3276_v3 = vadd.f32 1.0, %v5498_v2 }
 0x548   : > { %v3279_v20 = vmul.f32 %v5500_v19, %v3274_v15  ;;  %vm3284_vm14 = vweird.f32 %v5500_v19 }
 0x549   : > { %5501 = vrcp.f32 %v3276_v3  ;;  %vm3285_vm0 = vmor %vm3283_vm15, %vm3284_vm14  ;;  %v3319_v24 = vand.u32 2147483648, %v3276_v3  ;;  %v3317_v29 = vand.u32 2147483647, %v3276_v3  ;;  %vm3313_vm3 = vweird.f32 %v3276_v3 }
 0x54a   : > { %v3280_v33 = vsub.f32 1.0, %v3279_v20  ;;  %5503 = vtanh.f32 %v6977_v27 }
 0x54b   : > { %5505 = vtanh.f32 %v6996_v43  ;;  %v3320_v35 = vor.u32 1.1754944e-38, %v3319_v24  ;;  %vm3318_vm5 = vcmp.eq.f32.partialorder %v3317_v29, 8.507059e+37 }
 0x54c   : > { %v3281_v5 = vmul.f32 %v5500_v19, %v3280_v33 }
 0x54e   : > { %v3059_v38 = vpop.f32.mrf.mxu0  ;;  %v3282_v12 = vadd.f32 %v5500_v19, %v3281_v5 }
 0x54f   : > { %v3073_v11 = vpop.f32.mrf.mxu1  ;;  %v5502_v16 = vpop.eup %5501 }
 0x550   : > { %v3074_v62 = vadd.f32 %v3073_v11, %v3059_v38  ;;  %v3286_v56 = vsel %vm3285_vm0, %v5500_v19, %v3282_v12  ;;  %v3309_v18 = vmul.f32 %v5502_v16, %v3276_v3  ;;  %v5504_v22 = vpop.eup %5503  ;;  %vm3314_vm2 = vweird.f32 %v5502_v16 }
 0x551   : > { %v3291_v27 = vsel %vm3288_vm1, %v3290_v41, %v3286_v56  ;;  %vm3315_vm4 = vmor %vm3313_vm3, %vm3314_vm2  ;;  %v5506_v36 = vpop.eup %5505 }
 0x552   : > { %v3088_v42 = vadd.f32 %v3087_v7, %v3074_v62  ;;  %v7052_v49 = vmul.f32 %v5504_v22, %v3291_v27  ;;  %v3310_v23 = vsub.f32 1.0, %v3309_v18 }
 0x554   : > { %v3102_v21 = vadd.f32 %v3101_v13, %v3088_v42  ;;  %3366 = vst [vmem:[#allocation3] sm:$0xff] %v7052_v49  ;;  %v3311_v28 = vmul.f32 %v5502_v16, %v3310_v23 }
 0x555   : > { %3370 = vst [vmem:[#allocation2 + $0x10] sm:$0xff] %v7052_v49 }
 0x556   : > { %v4936_v25 = vmul.f32 -1.442695, %v3102_v21  ;;  %v3061_v26 = vpop.f32.mrf.mxu0  ;;  %v3312_v0 = vadd.f32 %v5502_v16, %v3311_v28 }
 0x557   : > { %v3075_v31 = vpop.f32.mrf.mxu1 }
 0x558   : > { %5507 = vpow2.f32 %v4936_v25  ;;  %v3076_v8 = vadd.f32 %v3075_v31, %v3061_v26  ;;  %v3316_v43 = vsel %vm3315_vm4, %v5502_v16, %v3312_v0 }
 0x559   : > { %v3321_v30 = vsel %vm3318_vm5, %v3320_v35, %v3316_v43 }
 0x55a   : > { %v3090_v14 = vadd.f32 %v3089_v34, %v3076_v8  ;;  %v7057_v61 = vmul.f32 %v5506_v36, %v3321_v30 }
 0x55c   : > { %v3104_v37 = vadd.f32 %v3103_v60, %v3090_v14  ;;  %3368 = vst [vmem:[#allocation3 + $0x8] sm:$0xff] %v7057_v61 }
 0x55d   : > { %3372 = vst [vmem:[#allocation2 + $0x18] sm:$0xff] %v7057_v61 }
 0x55e   : > { %v5508_v9 = vpop.eup %5507  ;;  %v4938_v39 = vmul.f32 -1.442695, %v3104_v37 }
 0x55f   : > { %v3275_v40 = vadd.f32 1.0, %v5508_v9 }
 0x560   : > { %5509 = vpow2.f32 %v4938_v39 }
 0x561   : > { %5511 = vrcp.f32 %v3275_v40  ;;  %v3304_v47 = vand.u32 2147483648, %v3275_v40  ;;  %v3302_v53 = vand.u32 2147483647, %v3275_v40  ;;  %vm3298_vm7 = vweird.f32 %v3275_v40 }
 0x563   : > { %v3305_v54 = vor.u32 1.1754944e-38, %v3304_v47  ;;  %vm3303_vm9 = vcmp.eq.f32.partialorder %v3302_v53, 8.507059e+37 }
 0x566   : > { %v5510_v32 = vpop.eup %5509 }
 0x567   : > { %v5512_v44 = vpop.eup %5511  ;;  %v3277_v46 = vadd.f32 1.0, %v5510_v32 }
 0x568   : > { %v3294_v17 = vmul.f32 %v5512_v44, %v3275_v40  ;;  %vm3299_vm6 = vweird.f32 %v5512_v44 }
 0x569   : > { %5513 = vrcp.f32 %v3277_v46  ;;  %vm3300_vm8 = vmor %vm3298_vm7, %vm3299_vm6  ;;  %v3334_v15 = vand.u32 2147483648, %v3277_v46  ;;  %v3332_v2 = vand.u32 2147483647, %v3277_v46  ;;  %vm3328_vm11 = vweird.f32 %v3277_v46 }
 0x56a   : > { %v3295_v48 = vsub.f32 1.0, %v3294_v17  ;;  %5515 = vtanh.f32 %v7039_v1 }
 0x56b   : > { %5517 = vtanh.f32 %v7048_v63  ;;  %v3335_v3 = vor.u32 1.1754944e-38, %v3334_v15  ;;  %vm3333_vm13 = vcmp.eq.f32.partialorder %v3332_v2, 8.507059e+37 }
 0x56c   : > { %v3296_v45 = vmul.f32 %v5512_v44, %v3295_v48 }
 0x56e   : > { %v3297_v50 = vadd.f32 %v5512_v44, %v3296_v45 }
 0x56f   : > { %v5514_v51 = vpop.eup %5513 }
 0x570   : > { %v3301_v10 = vsel %vm3300_vm8, %v5512_v44, %v3297_v50  ;;  %v3324_v55 = vmul.f32 %v5514_v51, %v3277_v46  ;;  %v5516_v52 = vpop.eup %5515  ;;  %vm3329_vm10 = vweird.f32 %v5514_v51 }
 0x571   : > { %v3306_v58 = vsel %vm3303_vm9, %v3305_v54, %v3301_v10  ;;  %vm3330_vm12 = vmor %vm3328_vm11, %vm3329_vm10  ;;  %v5518_v33 = vpop.eup %5517 }
 0x572   : > { %v3359_v59 = vmul.f32 %v5516_v52, %v3306_v58  ;;  %v3325_v57 = vsub.f32 1.0, %v3324_v55 }
 0x574   : > { %3367 = vst [vmem:[#allocation3 + $0x18] sm:$0xff] %v3359_v59  ;;  %v3326_v1 = vmul.f32 %v5514_v51, %v3325_v57 }
 0x575   : > { %3371 = vst [vmem:[#allocation2] sm:$0xff] %v3359_v59 }
 0x576   : > { %v3327_v19 = vadd.f32 %v5514_v51, %v3326_v1 }
 0x578   : > { %v3331_v20 = vsel %vm3330_vm12, %v5514_v51, %v3327_v19 }
 0x579   : > { %v3336_v4 = vsel %vm3333_vm13, %v3335_v3, %v3331_v20  ;;  %3377 = sbr.rel (%p4939_p1) target bundleno = 1577 (0x629), region = 108 }
 0x57a   : > { %v3361_v38 = vmul.f32 %v5518_v33, %v3336_v4 }
 0x57c   : > { %3369 = vst [vmem:[#allocation3 + $0x10] sm:$0xff] %v3361_v38 }
 0x57d   : > { %3373 = vst [vmem:[#allocation2 + $0x8] sm:$0xff] %v3361_v38 }
 0x57e   : > { %v5310_v63 = vld [vmem:[#allocation15 + $0x38] sm:$0xff]  ;;  %v5309_v6 = vld [vmem:[#allocation15 + $0x30] sm:$0xff]  ;;  %v5308_v11 = vld [vmem:[#allocation15 + $0x28] sm:$0xff]  ;;  %v3378_v23 = vpack.c.bf16 %v7057_v61, %v7052_v49  ;;  %v3379_v24 = vpack.c.bf16 %v3361_v38, %v3359_v59 }
 0x57f   : > { %v5318_v5 = vld [vmem:[#allocation15 + $0x78] sm:$0xff]  ;;  %3512 = vmatpush.bf16.msra.mxu0 %v5310_v63  ;;  %v5317_v7 = vld [vmem:[#allocation15 + $0x70] sm:$0xff]  ;;  %v5316_v62 = vld [vmem:[#allocation15 + $0x68] sm:$0xff] }
 0x580   : > { %3526 = vmatpush.bf16.msra.mxu1 %v5318_v5  ;;  %v5307_v12 = vld [vmem:[#allocation15 + $0x20] sm:$0xff]  ;;  %v5306_v16 = vld [vmem:[#allocation15 + $0x18] sm:$0xff]  ;;  %v5305_v42 = vld [vmem:[#allocation15 + $0x10] sm:$0xff] }
 0x581   : > { %v5315_v13 = vld [vmem:[#allocation15 + $0x60] sm:$0xff]  ;;  %v5314_v41 = vld [vmem:[#allocation15 + $0x58] sm:$0xff]  ;;  %v5313_v56 = vld [vmem:[#allocation15 + $0x50] sm:$0xff] }
 0x582   : > { %v5304_v18 = vld [vmem:[#allocation15 + $0x8] sm:$0xff]  ;;  %v5303_v27 = vld [vmem:[#allocation15] sm:$0xff] }
 0x583   : > { %3513 = vmatpush.bf16.msra.mxu0 %v5309_v6  ;;  %v5312_v22 = vld [vmem:[#allocation15 + $0x48] sm:$0xff]  ;;  %v5311_v21 = vld [vmem:[#allocation15 + $0x40] sm:$0xff] }
 0x584   : > { %3527 = vmatpush.bf16.msra.mxu1 %v5317_v7  ;;  %v5519_v25 = vld [vmem:[#allocation16] ss:$0 sm:$0xff] }
 0x587   : > { %3514 = vmatpush.bf16.msra.mxu0 %v5308_v11 }
 0x588   : > { %3528 = vmatpush.bf16.msra.mxu1 %v5316_v62 }
 0x58b   : > { %3515 = vmatpush.bf16.msra.mxu0 %v5307_v12 }
 0x58c   : > { %3529 = vmatpush.bf16.msra.mxu1 %v5315_v13 }
 0x58f   : > { %3516 = vmatpush.bf16.msra.mxu0 %v5306_v16 }
 0x590   : > { %3530 = vmatpush.bf16.msra.mxu1 %v5314_v41 }
 0x593   : > { %3517 = vmatpush.bf16.msra.mxu0 %v5305_v42 }
 0x594   : > { %3531 = vmatpush.bf16.msra.mxu1 %v5313_v56 }
 0x597   : > { %3518 = vmatpush.bf16.msra.mxu0 %v5304_v18 }
 0x598   : > { %3532 = vmatpush.bf16.msra.mxu1 %v5312_v22 }
 0x59b   : > { %3519 = vmatpush.bf16.msra.mxu0 %v5303_v27 }
 0x59c   : > { %3533 = vmatpush.bf16.msra.mxu1 %v5311_v21 }
 0x59e   : > { %3520 = vmatmul.bf16.vlgmr.msra.gmra.mxu0 %v3378_v23 }
 0x59f   : > { %3534 = vmatmul.bf16.vlgmr.msra.gmra.mxu1 %v3379_v24 }
 0x61b   : > { %v3521_v26 = vpop.f32.mrf.mxu0 }
 0x61c   : > { %v3535_v28 = vpop.f32.mrf.mxu1  ;;  %v3522_v29 = vadd.f32 %v5519_v25, %v3521_v26 }
 0x61e   : > { %v3536_v31 = vadd.f32 %v3535_v28, %v3522_v29 }
 0x620   : > { %3540 = vst [vmem:[#allocation18] sm:$0xff] %v3536_v31 }
 0x623   : > { %v3523_v8 = vpop.f32.mrf.mxu0 }
 0x624   : > { %v3524_v0 = vadd.f32 %v5519_v25, %v3523_v8  ;;  %v3537_v34 = vpop.f32.mrf.mxu1 }
 0x626   : > { %v3538_v35 = vadd.f32 %v3537_v34, %v3524_v0 }
 0x628   : > { %3541 = vst [vmem:[#allocation18 + $0x8] sm:$0xff] %v3538_v35 }
 0x629 PF: > { %s7143_s21 = sld [smem:[#allocation27_spill]]  ;;  %s5885_s30 = smov [#allocation18]  }
 0x62a   : > { %s3547_s14 = sshll.u32 %s5885_s30, 4  ;;  %s7144_s24 = sld [smem:[#allocation35_spill]]  ;;  %s3548_s14 = int_to_ptr.vmem [resolvable:$true] %s3547_s14 }
 0x62b   : > { %s5886_s27 = smov 128   ;;  %s5887_s11 = smov 8  }
 0x62f   : > { %p5391_p4 = scmp.eq.s32.totalorder %s7143_s21, 3 }
 0x630   : > { %s3549_s15 = sshll.u32 %s7144_s24, 4  ;;  %s3550_s15 = int_to_ptr.hbm [resolvable:$true] %s3549_s15 }
 0x631   : > { %5350 = dma.vmem_to_hbm [thread:$0]  (%p5391_p4), %s3548_s14, 256, %s3550_s15, [#allocation7], %s5886_s27, %s5886_s27, %s5887_s11  }
 0x632   : > { %5855 = dma.done.wait (%p5391_p4), [#allocation7], 256  }
 0x633   : > { %5857 = vsyncadd (%p5391_p4), [#allocation7], 4294967040 }
 0x634 PF: > { %s7145_s20 = sld [smem:[#allocation29_spill]] }
 0x635   : > { %s7146_s17 = sld [smem:[#allocation25_spill]] }
 0x636   : > { %s7147_s18 = sld [smem:[#allocation26_spill]] }
 0x637   : > { %s7148_s19 = sld [smem:[#allocation30_spill]] }
 0x63a   : > { %p22_p5 = scmp.ge.s32.totalorder %s7145_s20, 6  }
 0x63c   :  { %24 = sbr.rel (!%p22_p5) target bundleno = 11 (0xb), region = 168 }
 0x641   :  { %3566 = vsyncpa [#allocation6], 1 }
 0x642   :  { %3568 = vsyncpa [#allocation6 + $0x1], 1 }
 0x643   :  { %3569 = vsyncpa [#allocation9], 1 }
 0x644   :  { %3570 = vsyncpa [#allocation17], 1 }
 0x645   :  { %3571 = vsyncpa [#allocation7], 1 }
 0x646   :  { %3573 = vsyncpa [#allocation7 + $0x1], 1 }

</bundles_post_ra>
